<compile_context>
chip_gen: v6e
topology: v6e:2x2x1
jax: 0.10.0
libtpu: 0.0.40
codegen_flags: <defaults>
</compile_context>

<pallas_src>
import functools
import math

import jax
import jax.numpy as jnp
from jax.experimental import pallas as pl
from jax.experimental.pallas import tpu as pltpu


# ----------------------------- small fused kernels -----------------------------

def _dense_kernel(x_ref, w_ref, b_ref, o_ref):
    o_ref[...] = (jnp.dot(x_ref[...], w_ref[...],
                          preferred_element_type=jnp.float32) + b_ref[...])


def dense(x, w, b):
    """y = x @ w + b   (x, w in bf16; accumulate + bias in f32)."""
    M, K = x.shape
    N = w.shape[1]
    return pl.pallas_call(
        _dense_kernel,
        out_shape=jax.ShapeDtypeStruct((M, N), jnp.float32),
        grid=(1,),
        in_specs=[pl.BlockSpec((M, K), lambda i: (0, 0)),
                  pl.BlockSpec((K, N), lambda i: (0, 0)),
                  pl.BlockSpec((1, N), lambda i: (0, 0))],
        out_specs=pl.BlockSpec((M, N), lambda i: (0, 0)),
    )(x, w, b)


def _emb_transform_kernel(tri_ref, w_ref, b_ref, res_ref, g_ref, bb_ref, o_ref):
    y = jnp.dot(tri_ref[...], w_ref[...], preferred_element_type=jnp.float32)
    y = y + b_ref[...] + res_ref[...]           # bias + (position + token-type) embeddings
    o_ref[...] = y * g_ref[...] + bb_ref[...]   # MobileBERT NoNorm


def emb_transform(tri, w, b, res, g, bb):
    M, K = tri.shape
    N = w.shape[1]
    return pl.pallas_call(
        _emb_transform_kernel,
        out_shape=jax.ShapeDtypeStruct((M, N), jnp.float32),
        grid=(1,),
        in_specs=[pl.BlockSpec((M, K), lambda i: (0, 0)),
                  pl.BlockSpec((K, N), lambda i: (0, 0)),
                  pl.BlockSpec((1, N), lambda i: (0, 0)),
                  pl.BlockSpec((M, N), lambda i: (0, 0)),
                  pl.BlockSpec((1, N), lambda i: (0, 0)),
                  pl.BlockSpec((1, N), lambda i: (0, 0))],
        out_specs=pl.BlockSpec((M, N), lambda i: (0, 0)),
    )(tri, w, b, res, g, bb)


def _pooler_regressor_kernel(x_ref, wp_ref, bp_ref, wr_ref, br_ref, o_ref):
    pooled = jnp.tanh(jnp.dot(x_ref[...], wp_ref[...],
                              preferred_element_type=jnp.float32) + bp_ref[...])
    o_ref[...] = (jnp.dot(pooled.astype(jnp.bfloat16), wr_ref[...],
                          preferred_element_type=jnp.float32) + br_ref[...])


def pooler_regressor(x, wp, bp, wr, br):
    B, H = x.shape
    Dout = wr.shape[1]
    return pl.pallas_call(
        _pooler_regressor_kernel,
        out_shape=jax.ShapeDtypeStruct((B, Dout), jnp.float32),
        grid=(1,),
        in_specs=[pl.BlockSpec((B, H), lambda i: (0, 0)),
                  pl.BlockSpec((H, H), lambda i: (0, 0)),
                  pl.BlockSpec((1, H), lambda i: (0, 0)),
                  pl.BlockSpec((H, Dout), lambda i: (0, 0)),
                  pl.BlockSpec((1, Dout), lambda i: (0, 0))],
        out_specs=pl.BlockSpec((B, Dout), lambda i: (0, 0)),
    )(x, wp, bp, wr, br)


# ----------------------------- fused encoder kernel -----------------------------
# One grid step == one MobileBERT layer.  All activations stay resident in VMEM;
# the hidden-state carry persists across layers in a VMEM scratch.

def _encoder_layer_kernel(
        h_ref,
        w_bni_ref, b_bni_ref, g_bni_ref, bb_bni_ref,
        w_bna_ref, b_bna_ref, g_bna_ref, bb_bna_ref,
        w_q_ref, b_q_ref, w_k_ref, b_k_ref, w_v_ref, b_v_ref,
        w_ao_ref, b_ao_ref, g_ao_ref, bb_ao_ref,
        w_fi_ref, b_fi_ref, w_fo_ref, b_fo_ref, g_f_ref, bb_f_ref,
        w_ob_ref, b_ob_ref, g_ob_ref, bb_ob_ref,
        o_ref,
        h_sc,
        *, B, S, nH, n_ffn):
    layer = pl.program_id(0)

    @pl.when(layer == 0)
    def _():
        h_sc[...] = h_ref[...]

    h = h_sc[...]                       # (M, H) f32 carry
    h_b = h.astype(jnp.bfloat16)

    # --- bottleneck: layer_input (attention residual) & shared q/k input ---------
    layer_input = (jnp.dot(h_b, w_bni_ref[0], preferred_element_type=jnp.float32)
                   + b_bni_ref[0]) * g_bni_ref[0] + bb_bni_ref[0]          # (M, I)
    shared = (jnp.dot(h_b, w_bna_ref[0], preferred_element_type=jnp.float32)
              + b_bna_ref[0]) * g_bna_ref[0] + bb_bna_ref[0]               # (M, I)
    shared_b = shared.astype(jnp.bfloat16)

    # --- self-attention (heads + batches unrolled, 1/sqrt(Dh) folded into Wq) ----
    # Accumulates dense(context) + bias + residual directly per head.
    ao = b_ao_ref[0] + layer_input                                         # (M, I)
    for hd in range(nH):
        q_h = jnp.dot(shared_b, w_q_ref[0, hd],
                      preferred_element_type=jnp.float32) + b_q_ref[0, hd]  # (M, Dh)
        k_h = jnp.dot(shared_b, w_k_ref[0, hd],
                      preferred_element_type=jnp.float32) + b_k_ref[0, hd]  # (M, Dh)
        v_h = jnp.dot(h_b, w_v_ref[0, hd],
                      preferred_element_type=jnp.float32) + b_v_ref[0, hd]  # (M, Dh)
        ctx_parts = []
        for b in range(B):
            r0 = b * S                                   # sublane-aligned row slice
            qb = q_h[r0:r0 + S].astype(jnp.bfloat16)
            kb = k_h[r0:r0 + S].astype(jnp.bfloat16)
            vb = v_h[r0:r0 + S].astype(jnp.bfloat16)
            # attention_mask is all-ones -> additive mask == 0 (omitted).
            s = jax.lax.dot_general(qb, kb, (((1,), (1,)), ((), ())),
                                    preferred_element_type=jnp.float32)     # (S, S)
            s = s - jnp.max(s, axis=-1, keepdims=True)
            p = jnp.exp(s)
            p = p * pl.reciprocal(jnp.sum(p, axis=-1, keepdims=True), approx=True)
            ctx_parts.append(jnp.dot(p.astype(jnp.bfloat16), vb,
                                     preferred_element_type=jnp.float32))   # (S, Dh)
        ctx_h = jnp.concatenate(ctx_parts, axis=0)                          # (M, Dh)
        ao = ao + jnp.dot(ctx_h.astype(jnp.bfloat16), w_ao_ref[0, hd],
                          preferred_element_type=jnp.float32)
    cur = ao * g_ao_ref[0] + bb_ao_ref[0]                                   # (M, I)

    # --- FFN stack: 3 intra-block FFNs + final intermediate/output ---------------
    for j in range(n_ffn):
        inter = jnp.maximum(
            jnp.dot(cur.astype(jnp.bfloat16), w_fi_ref[0, j],
                    preferred_element_type=jnp.float32) + b_fi_ref[0, j], 0.0)
        y = jnp.dot(inter.astype(jnp.bfloat16), w_fo_ref[0, j],
                    preferred_element_type=jnp.float32) + b_fo_ref[0, j] + cur
        cur = y * g_f_ref[0, j] + bb_f_ref[0, j]

    # --- output bottleneck back to hidden size, residual = layer's input hidden --
    h_new = (jnp.dot(cur.astype(jnp.bfloat16), w_ob_ref[0],
                     preferred_element_type=jnp.float32)
             + b_ob_ref[0] + h) * g_ob_ref[0] + bb_ob_ref[0]                # (M, H)

    h_sc[...] = h_new
    o_ref[...] = h_new


_ENC_KEYS = ("w_bni", "b_bni", "g_bni", "bb_bni",
             "w_bna", "b_bna", "g_bna", "bb_bna",
             "w_q", "b_q", "w_k", "b_k", "w_v", "b_v",
             "w_ao", "b_ao", "g_ao", "bb_ao",
             "w_fi", "b_fi", "w_fo", "b_fo", "g_f", "bb_f",
             "w_ob", "b_ob", "g_ob", "bb_ob")


def run_encoder(h, enc, cfg, B, S):
    M, H = h.shape
    L = cfg.num_hidden_layers
    nH = cfg.num_attention_heads
    n_ffn = cfg.num_feedforward_networks

    def layer_spec(arr):
        nd = arr.ndim
        return pl.BlockSpec((1,) + arr.shape[1:],
                            lambda l, _nd=nd: (l,) + (0,) * (_nd - 1))

    act_spec = pl.BlockSpec((M, H), lambda l: (0, 0))
    kernel = functools.partial(_encoder_layer_kernel, B=B, S=S, nH=nH, n_ffn=n_ffn)

    return pl.pallas_call(
        kernel,
        out_shape=jax.ShapeDtypeStruct((M, H), jnp.float32),
        grid=(L,),
        in_specs=[act_spec] + [layer_spec(enc[k]) for k in _ENC_KEYS],
        out_specs=act_spec,
        scratch_shapes=[pltpu.VMEM((M, H), jnp.float32)],
        compiler_params=pltpu.CompilerParams(
            dimension_semantics=("arbitrary",)),   # sequential layer carry
    )(h, *[enc[k] for k in _ENC_KEYS])


# ----------------------------- synthetic MobileBERT config -----------------------------

class Config:
    hidden_size = 32            # config.embedding_size is set equal to hidden_size
    embedding_size = 32
    intra_bottleneck_size = 16  # true_hidden_size
    num_attention_heads = 4
    num_hidden_layers = 2
    intermediate_size = 32
    num_feedforward_networks = 4
    max_position_embeddings = 64
    type_vocab_size = 2
    # MobileBERT defaults: trigram_input=True, use_bottleneck=True,
    # key_query_shared_bottleneck=True, use_bottleneck_attention=False,
    # normalization_type="no_norm", hidden_act="relu", classifier_activation=True


# ----------------------------- deterministic parameters -----------------------------

def make_params(key, cfg, input_dim, output_dim):
    cnt = [0]

    def nk():
        cnt[0] += 1
        return jax.random.fold_in(key, cnt[0])

    def lin(din, dout):
        return {"w": 0.02 * jax.random.normal(nk(), (din, dout), jnp.float32),
                "b": jnp.zeros((dout,), jnp.float32)}

    def norm(d):   # NoNorm: elementwise weight*x + bias
        return {"g": jnp.ones((d,), jnp.float32), "b": jnp.zeros((d,), jnp.float32)}

    H, I, F = cfg.hidden_size, cfg.intra_bottleneck_size, cfg.intermediate_size
    p = {
        "input_proj": lin(input_dim, H),
        "emb_transform": lin(3 * cfg.embedding_size, H),
        "emb_norm": norm(H),
        "pos_emb": 0.02 * jax.random.normal(nk(), (cfg.max_position_embeddings, H), jnp.float32),
        "tok_emb": 0.02 * jax.random.normal(nk(), (cfg.type_vocab_size, H), jnp.float32),
        "layers": [],
        "pooler": lin(H, H),
        "regressor": lin(H, output_dim),
    }
    for _ in range(cfg.num_hidden_layers):
        p["layers"].append({
            "bn_in": lin(H, I), "bn_in_norm": norm(I),
            "bn_att": lin(H, I), "bn_att_norm": norm(I),
            "q": lin(I, I), "k": lin(I, I), "v": lin(H, I),
            "attn_out": lin(I, I), "attn_out_norm": norm(I),
            "ffn": [{"inter": lin(I, F), "out": lin(F, I), "norm": norm(I)}
                    for _ in range(cfg.num_feedforward_networks - 1)],
            "inter": lin(I, F),
            "out": lin(F, I), "out_norm": norm(I),
            "out_bn": lin(I, H), "out_bn_norm": norm(H),
        })
    return p


def prepare_params(p, cfg, S):
    """One-time host-side prep: bf16 weights, f32 biases/NoNorms, per-head q/k/v/ao
    splits, attention scale folded into Wq, per-layer stacking for the fused encoder."""
    I = cfg.intra_bottleneck_size
    nH = cfg.num_attention_heads
    Dh = I // nH
    scale = 1.0 / math.sqrt(Dh)
    bf, f32 = jnp.bfloat16, jnp.float32

    def row(v):                 # (N,) -> (1, N) f32
        return v.reshape(1, -1).astype(f32)

    def heads_out_w(w):         # (K, I) -> (nH, K, Dh): split output features per head
        return w.reshape(w.shape[0], nH, Dh).transpose(1, 0, 2)

    def heads_out_b(b):         # (I,) -> (nH, 1, Dh)
        return b.reshape(nH, 1, Dh)

    def heads_in_w(w):          # (I, N) -> (nH, Dh, N): split input features per head
        return w.reshape(nH, Dh, w.shape[1])

    prep = {
        "input_proj_w": p["input_proj"]["w"].astype(bf),
        "input_proj_b": row(p["input_proj"]["b"]),
        "emb_w": p["emb_transform"]["w"].astype(bf),
        "emb_b": row(p["emb_transform"]["b"]),
        "emb_g": row(p["emb_norm"]["g"]),
        "emb_bb": row(p["emb_norm"]["b"]),
        "emb_res": (p["pos_emb"][:S] + p["tok_emb"][0][None, :]).astype(f32),   # (S, H)
        "pool_w": p["pooler"]["w"].astype(bf),
        "pool_b": row(p["pooler"]["b"]),
        "reg_w": p["regressor"]["w"].astype(bf),
        "reg_b": row(p["regressor"]["b"]),
    }

    def per_layer(fn, dtype):
        return jnp.stack([fn(lp) for lp in p["layers"]], axis=0).astype(dtype)

    prep["enc"] = {
        "w_bni": per_layer(lambda lp: lp["bn_in"]["w"], bf),
        "b_bni": per_layer(lambda lp: lp["bn_in"]["b"][None, :], f32),
        "g_bni": per_layer(lambda lp: lp["bn_in_norm"]["g"][None, :], f32),
        "bb_bni": per_layer(lambda lp: lp["bn_in_norm"]["b"][None, :], f32),
        "w_bna": per_layer(lambda lp: lp["bn_att"]["w"], bf),
        "b_bna": per_layer(lambda lp: lp["bn_att"]["b"][None, :], f32),
        "g_bna": per_layer(lambda lp: lp["bn_att_norm"]["g"][None, :], f32),
        "bb_bna": per_layer(lambda lp: lp["bn_att_norm"]["b"][None, :], f32),
        "w_q": per_layer(lambda lp: heads_out_w(lp["q"]["w"] * scale), bf),
        "b_q": per_layer(lambda lp: heads_out_b(lp["q"]["b"] * scale), f32),
        "w_k": per_layer(lambda lp: heads_out_w(lp["k"]["w"]), bf),
        "b_k": per_layer(lambda lp: heads_out_b(lp["k"]["b"]), f32),
        "w_v": per_layer(lambda lp: heads_out_w(lp["v"]["w"]), bf),
        "b_v": per_layer(lambda lp: heads_out_b(lp["v"]["b"]), f32),
        "w_ao": per_layer(lambda lp: heads_in_w(lp["attn_out"]["w"]), bf),
        "b_ao": per_layer(lambda lp: lp["attn_out"]["b"][None, :], f32),
        "g_ao": per_layer(lambda lp: lp["attn_out_norm"]["g"][None, :], f32),
        "bb_ao": per_layer(lambda lp: lp["attn_out_norm"]["b"][None, :], f32),
        "w_fi": per_layer(lambda lp: jnp.stack([f["inter"]["w"] for f in lp["ffn"]]
                                               + [lp["inter"]["w"]]), bf),
        "b_fi": per_layer(lambda lp: jnp.stack([f["inter"]["b"][None, :] for f in lp["ffn"]]
                                               + [lp["inter"]["b"][None, :]]), f32),
        "w_fo": per_layer(lambda lp: jnp.stack([f["out"]["w"] for f in lp["ffn"]]
                                               + [lp["out"]["w"]]), bf),
        "b_fo": per_layer(lambda lp: jnp.stack([f["out"]["b"][None, :] for f in lp["ffn"]]
                                               + [lp["out"]["b"][None, :]]), f32),
        "g_f": per_layer(lambda lp: jnp.stack([f["norm"]["g"][None, :] for f in lp["ffn"]]
                                              + [lp["out_norm"]["g"][None, :]]), f32),
        "bb_f": per_layer(lambda lp: jnp.stack([f["norm"]["b"][None, :] for f in lp["ffn"]]
                                               + [lp["out_norm"]["b"][None, :]]), f32),
        "w_ob": per_layer(lambda lp: lp["out_bn"]["w"], bf),
        "b_ob": per_layer(lambda lp: lp["out_bn"]["b"][None, :], f32),
        "g_ob": per_layer(lambda lp: lp["out_bn_norm"]["g"][None, :], f32),
        "bb_ob": per_layer(lambda lp: lp["out_bn_norm"]["b"][None, :], f32),
    }
    return prep


# ----------------------------- forward pass -----------------------------

def mobilebert_timeseries_forward(x, prep, cfg):
    B, S, Din = x.shape
    H = cfg.hidden_size
    M = B * S

    # input_proj
    h = dense(x.reshape(M, Din).astype(jnp.bfloat16),
              prep["input_proj_w"], prep["input_proj_b"]).reshape(B, S, H)

    # MobileBertEmbeddings with inputs_embeds (trigram_input=True): tiny shifted
    # concat stays in plain JAX, the transform + pos/tok add + NoNorm is one kernel.
    zeros = jnp.zeros((B, 1, H), jnp.float32)
    tri = jnp.concatenate([
        jnp.concatenate([h[:, 1:], zeros], axis=1),   # next-token, zero-padded at end
        h,
        jnp.concatenate([zeros, h[:, :-1]], axis=1),  # prev-token, zero-padded at start
    ], axis=2).reshape(M, 3 * H).astype(jnp.bfloat16)
    res = jnp.broadcast_to(prep["emb_res"][None], (B, S, H)).reshape(M, H)
    h = emb_transform(tri, prep["emb_w"], prep["emb_b"], res,
                      prep["emb_g"], prep["emb_bb"])
    # TODO(synk): dropout layers are identity in eval mode; omitted.

    # encoder: single pallas_call, grid over layers, hidden state carried in VMEM.
    # attention_mask is all-ones -> extended additive mask == 0, omitted.
    h = run_encoder(h, prep["enc"], cfg, B, S)

    # pooler (first token -> dense -> tanh) fused with the regressor
    pooled_in = h.reshape(B, S, H)[:, 0, :].astype(jnp.bfloat16)
    return pooler_regressor(pooled_in, prep["pool_w"], prep["pool_b"],
                            prep["reg_w"], prep["reg_b"])


# ----------------------------- main -----------------------------

if __name__ == "__main__":
    cfg = Config()
    B, S, input_dim, output_dim = 2, 8, 4, 3
    key = jax.random.PRNGKey(0)
    x = jax.random.normal(jax.random.fold_in(key, 12345), (B, S, input_dim), jnp.float32)

    params = make_params(key, cfg, input_dim, output_dim)
    prep = prepare_params(params, cfg, S)

    fwd = jax.jit(lambda xx, pp: mobilebert_timeseries_forward(xx, pp, cfg))
    out = jax.block_until_ready(fwd(x, prep))

    assert out.shape == (B, output_dim), out.shape
    assert bool(jnp.all(jnp.isfinite(out)))
    print("KERNEL_OK")
</pallas_src>

<mosaic_0001>
module attributes {stable_mosaic.version = 11 : i64} {
  func.func @_dense_kernel(%arg0: i32, %arg1: memref<16x4xbf16, #tpu.memory_space<vmem>>, %arg2: memref<4x32xbf16, #tpu.memory_space<vmem>>, %arg3: memref<1x32xf32, #tpu.memory_space<vmem>>, %arg4: memref<16x32xf32, #tpu.memory_space<vmem>>) attributes {dimension_semantics = [#tpu.dimension_semantics<arbitrary>], iteration_bounds = array<i64: 1>, scalar_prefetch = 0 : i64, scratch_operands = 0 : i64, tpu.core_type = #tpu.core_type<tc>, window_params = [{pipeline_mode = #tpu.pipeline_mode<synchronous>, transform_indices = @transform_0, window_bounds = array<i64: 16, 4>}, {pipeline_mode = #tpu.pipeline_mode<synchronous>, transform_indices = @transform_1, window_bounds = array<i64: 4, 32>}, {pipeline_mode = #tpu.pipeline_mode<synchronous>, transform_indices = @transform_2, window_bounds = array<i64: 1, 32>}, {pipeline_mode = #tpu.pipeline_mode<synchronous>, transform_indices = @transform_3, window_bounds = array<i64: 16, 32>}]} {
    %c0 = arith.constant 0 : index
    %c0_0 = arith.constant 0 : index
    %0 = vector.load %arg1[%c0, %c0_0] : memref<16x4xbf16, #tpu.memory_space<vmem>>, vector<16x4xbf16>
    %c0_1 = arith.constant 0 : index
    %c0_2 = arith.constant 0 : index
    %1 = vector.load %arg2[%c0_1, %c0_2] : memref<4x32xbf16, #tpu.memory_space<vmem>>, vector<4x32xbf16>
    %cst = arith.constant dense<0.000000e+00> : vector<16x32xf32>
    %2 = tpu.matmul %0, %1, %cst {dimension_numbers = #tpu.dot_dimension_numbers<[1], [0], [0], [1], [0, 0, 1, 1], [], []>} : vector<16x4xbf16>, vector<4x32xbf16>, vector<16x32xf32> -> vector<16x32xf32>
    %c0_3 = arith.constant 0 : index
    %c0_4 = arith.constant 0 : index
    %3 = vector.load %arg3[%c0_3, %c0_4] : memref<1x32xf32, #tpu.memory_space<vmem>>, vector<1x32xf32>
    %4 = vector.broadcast %3 : vector<1x32xf32> to vector<16x32xf32>
    %5 = arith.addf %2, %4 : vector<16x32xf32>
    %c0_5 = arith.constant 0 : index
    %c0_6 = arith.constant 0 : index
    %6 = vector.load %arg4[%c0_5, %c0_6] : memref<16x32xf32, #tpu.memory_space<vmem>>, vector<16x32xf32>
    tpu.vector_store %arg4[%c0_5, %c0_6], %5 {strides = array<i32>} : memref<16x32xf32, #tpu.memory_space<vmem>>, vector<16x32xf32>,
    return
  }
  func.func @transform_0(%arg0: i32) -> (i32, i32) {
    %c0_i32 = arith.constant 0 : i32
    %c0_i32_0 = arith.constant 0 : i32
    %c0_i32_1 = arith.constant 0 : i32
    return %c0_i32, %c0_i32_0 : i32, i32
  }
  func.func @transform_1(%arg0: i32) -> (i32, i32) {
    %c0_i32 = arith.constant 0 : i32
    %c0_i32_0 = arith.constant 0 : i32
    %c0_i32_1 = arith.constant 0 : i32
    return %c0_i32, %c0_i32_0 : i32, i32
  }
  func.func @transform_2(%arg0: i32) -> (i32, i32) {
    %c0_i32 = arith.constant 0 : i32
    %c0_i32_0 = arith.constant 0 : i32
    %c0_i32_1 = arith.constant 0 : i32
    return %c0_i32, %c0_i32_0 : i32, i32
  }
  func.func @transform_3(%arg0: i32) -> (i32, i32) {
    %c0_i32 = arith.constant 0 : i32
    %c0_i32_0 = arith.constant 0 : i32
    %c0_i32_1 = arith.constant 0 : i32
    return %c0_i32, %c0_i32_0 : i32, i32
  }
}

module attributes {stable_mosaic.version = 11 : i64} {
  func.func @_emb_transform_kernel(%arg0: i32, %arg1: memref<16x96xbf16, #tpu.memory_space<vmem>>, %arg2: memref<96x32xbf16, #tpu.memory_space<vmem>>, %arg3: memref<1x32xf32, #tpu.memory_space<vmem>>, %arg4: memref<16x32xf32, #tpu.memory_space<vmem>>, %arg5: memref<1x32xf32, #tpu.memory_space<vmem>>, %arg6: memref<1x32xf32, #tpu.memory_space<vmem>>, %arg7: memref<16x32xf32, #tpu.memory_space<vmem>>) attributes {dimension_semantics = [#tpu.dimension_semantics<arbitrary>], iteration_bounds = array<i64: 1>, scalar_prefetch = 0 : i64, scratch_operands = 0 : i64, tpu.core_type = #tpu.core_type<tc>, window_params = [{pipeline_mode = #tpu.pipeline_mode<synchronous>, transform_indices = @transform_0, window_bounds = array<i64: 16, 96>}, {pipeline_mode = #tpu.pipeline_mode<synchronous>, transform_indices = @transform_1, window_bounds = array<i64: 96, 32>}, {pipeline_mode = #tpu.pipeline_mode<synchronous>, transform_indices = @transform_2, window_bounds = array<i64: 1, 32>}, {pipeline_mode = #tpu.pipeline_mode<synchronous>, transform_indices = @transform_3, window_bounds = array<i64: 16, 32>}, {pipeline_mode = #tpu.pipeline_mode<synchronous>, transform_indices = @transform_4, window_bounds = array<i64: 1, 32>}, {pipeline_mode = #tpu.pipeline_mode<synchronous>, transform_indices = @transform_5, window_bounds = array<i64: 1, 32>}, {pipeline_mode = #tpu.pipeline_mode<synchronous>, transform_indices = @transform_6, window_bounds = array<i64: 16, 32>}]} {
    %c0 = arith.constant 0 : index
    %c0_0 = arith.constant 0 : index
    %0 = vector.load %arg1[%c0, %c0_0] : memref<16x96xbf16, #tpu.memory_space<vmem>>, vector<16x96xbf16>
    %c0_1 = arith.constant 0 : index
    %c0_2 = arith.constant 0 : index
    %1 = vector.load %arg2[%c0_1, %c0_2] : memref<96x32xbf16, #tpu.memory_space<vmem>>, vector<96x32xbf16>
    %cst = arith.constant dense<0.000000e+00> : vector<16x32xf32>
    %2 = tpu.matmul %0, %1, %cst {dimension_numbers = #tpu.dot_dimension_numbers<[1], [0], [0], [1], [0, 0, 1, 1], [], []>} : vector<16x96xbf16>, vector<96x32xbf16>, vector<16x32xf32> -> vector<16x32xf32>
    %c0_3 = arith.constant 0 : index
    %c0_4 = arith.constant 0 : index
    %3 = vector.load %arg3[%c0_3, %c0_4] : memref<1x32xf32, #tpu.memory_space<vmem>>, vector<1x32xf32>
    %4 = vector.broadcast %3 : vector<1x32xf32> to vector<16x32xf32>
    %5 = arith.addf %2, %4 : vector<16x32xf32>
    %c0_5 = arith.constant 0 : index
    %c0_6 = arith.constant 0 : index
    %6 = vector.load %arg4[%c0_5, %c0_6] : memref<16x32xf32, #tpu.memory_space<vmem>>, vector<16x32xf32>
    %7 = arith.addf %5, %6 : vector<16x32xf32>
    %c0_7 = arith.constant 0 : index
    %c0_8 = arith.constant 0 : index
    %8 = vector.load %arg5[%c0_7, %c0_8] : memref<1x32xf32, #tpu.memory_space<vmem>>, vector<1x32xf32>
    %9 = vector.broadcast %8 : vector<1x32xf32> to vector<16x32xf32>
    %10 = arith.mulf %7, %9 : vector<16x32xf32>
    %c0_9 = arith.constant 0 : index
    %c0_10 = arith.constant 0 : index
    %11 = vector.load %arg6[%c0_9, %c0_10] : memref<1x32xf32, #tpu.memory_space<vmem>>, vector<1x32xf32>
    %12 = vector.broadcast %11 : vector<1x32xf32> to vector<16x32xf32>
    %13 = arith.addf %10, %12 : vector<16x32xf32>
    %c0_11 = arith.constant 0 : index
    %c0_12 = arith.constant 0 : index
    %14 = vector.load %arg7[%c0_11, %c0_12] : memref<16x32xf32, #tpu.memory_space<vmem>>, vector<16x32xf32>
    tpu.vector_store %arg7[%c0_11, %c0_12], %13 {strides = array<i32>} : memref<16x32xf32, #tpu.memory_space<vmem>>, vector<16x32xf32>,
    return
  }
  func.func @transform_0(%arg0: i32) -> (i32, i32) {
    %c0_i32 = arith.constant 0 : i32
    %c0_i32_0 = arith.constant 0 : i32
    %c0_i32_1 = arith.constant 0 : i32
    return %c0_i32, %c0_i32_0 : i32, i32
  }
  func.func @transform_1(%arg0: i32) -> (i32, i32) {
    %c0_i32 = arith.constant 0 : i32
    %c0_i32_0 = arith.constant 0 : i32
    %c0_i32_1 = arith.constant 0 : i32
    return %c0_i32, %c0_i32_0 : i32, i32
  }
  func.func @transform_2(%arg0: i32) -> (i32, i32) {
    %c0_i32 = arith.constant 0 : i32
    %c0_i32_0 = arith.constant 0 : i32
    %c0_i32_1 = arith.constant 0 : i32
    return %c0_i32, %c0_i32_0 : i32, i32
  }
  func.func @transform_3(%arg0: i32) -> (i32, i32) {
    %c0_i32 = arith.constant 0 : i32
    %c0_i32_0 = arith.constant 0 : i32
    %c0_i32_1 = arith.constant 0 : i32
    return %c0_i32, %c0_i32_0 : i32, i32
  }
  func.func @transform_4(%arg0: i32) -> (i32, i32) {
    %c0_i32 = arith.constant 0 : i32
    %c0_i32_0 = arith.constant 0 : i32
    %c0_i32_1 = arith.constant 0 : i32
    return %c0_i32, %c0_i32_0 : i32, i32
  }
  func.func @transform_5(%arg0: i32) -> (i32, i32) {
    %c0_i32 = arith.constant 0 : i32
    %c0_i32_0 = arith.constant 0 : i32
    %c0_i32_1 = arith.constant 0 : i32
    return %c0_i32, %c0_i32_0 : i32, i32
  }
  func.func @transform_6(%arg0: i32) -> (i32, i32) {
    %c0_i32 = arith.constant 0 : i32
    %c0_i32_0 = arith.constant 0 : i32
    %c0_i32_1 = arith.constant 0 : i32
    return %c0_i32, %c0_i32_0 : i32, i32
  }
}

module attributes {stable_mosaic.version = 11 : i64} {
  func.func @_pooler_regressor_kernel(%arg0: i32, %arg1: memref<2x32xbf16, #tpu.memory_space<vmem>>, %arg2: memref<32x32xbf16, #tpu.memory_space<vmem>>, %arg3: memref<1x32xf32, #tpu.memory_space<vmem>>, %arg4: memref<32x3xbf16, #tpu.memory_space<vmem>>, %arg5: memref<1x3xf32, #tpu.memory_space<vmem>>, %arg6: memref<2x3xf32, #tpu.memory_space<vmem>>) attributes {dimension_semantics = [#tpu.dimension_semantics<arbitrary>], iteration_bounds = array<i64: 1>, scalar_prefetch = 0 : i64, scratch_operands = 0 : i64, tpu.core_type = #tpu.core_type<tc>, window_params = [{pipeline_mode = #tpu.pipeline_mode<synchronous>, transform_indices = @transform_0, window_bounds = array<i64: 2, 32>}, {pipeline_mode = #tpu.pipeline_mode<synchronous>, transform_indices = @transform_1, window_bounds = array<i64: 32, 32>}, {pipeline_mode = #tpu.pipeline_mode<synchronous>, transform_indices = @transform_2, window_bounds = array<i64: 1, 32>}, {pipeline_mode = #tpu.pipeline_mode<synchronous>, transform_indices = @transform_3, window_bounds = array<i64: 32, 3>}, {pipeline_mode = #tpu.pipeline_mode<synchronous>, transform_indices = @transform_4, window_bounds = array<i64: 1, 3>}, {pipeline_mode = #tpu.pipeline_mode<synchronous>, transform_indices = @transform_5, window_bounds = array<i64: 2, 3>}]} {
    %c0 = arith.constant 0 : index
    %c0_0 = arith.constant 0 : index
    %0 = vector.load %arg1[%c0, %c0_0] : memref<2x32xbf16, #tpu.memory_space<vmem>>, vector<2x32xbf16>
    %c0_1 = arith.constant 0 : index
    %c0_2 = arith.constant 0 : index
    %1 = vector.load %arg2[%c0_1, %c0_2] : memref<32x32xbf16, #tpu.memory_space<vmem>>, vector<32x32xbf16>
    %cst = arith.constant dense<0.000000e+00> : vector<2x32xf32>
    %2 = tpu.matmul %0, %1, %cst {dimension_numbers = #tpu.dot_dimension_numbers<[1], [0], [0], [1], [0, 0, 1, 1], [], []>} : vector<2x32xbf16>, vector<32x32xbf16>, vector<2x32xf32> -> vector<2x32xf32>
    %c0_3 = arith.constant 0 : index
    %c0_4 = arith.constant 0 : index
    %3 = vector.load %arg3[%c0_3, %c0_4] : memref<1x32xf32, #tpu.memory_space<vmem>>, vector<1x32xf32>
    %4 = vector.broadcast %3 : vector<1x32xf32> to vector<2x32xf32>
    %5 = arith.addf %2, %4 : vector<2x32xf32>
    %6 = math.tanh %5 : vector<2x32xf32>
    %7 = arith.truncf %6 : vector<2x32xf32> to vector<2x32xbf16>
    %c0_5 = arith.constant 0 : index
    %c0_6 = arith.constant 0 : index
    %8 = vector.load %arg4[%c0_5, %c0_6] : memref<32x3xbf16, #tpu.memory_space<vmem>>, vector<32x3xbf16>
    %cst_7 = arith.constant dense<0.000000e+00> : vector<2x3xf32>
    %9 = tpu.matmul %7, %8, %cst_7 {dimension_numbers = #tpu.dot_dimension_numbers<[1], [0], [0], [1], [0, 0, 1, 1], [], []>} : vector<2x32xbf16>, vector<32x3xbf16>, vector<2x3xf32> -> vector<2x3xf32>
    %c0_8 = arith.constant 0 : index
    %c0_9 = arith.constant 0 : index
    %10 = vector.load %arg5[%c0_8, %c0_9] : memref<1x3xf32, #tpu.memory_space<vmem>>, vector<1x3xf32>
    %11 = vector.broadcast %10 : vector<1x3xf32> to vector<2x3xf32>
    %12 = arith.addf %9, %11 : vector<2x3xf32>
    %c0_10 = arith.constant 0 : index
    %c0_11 = arith.constant 0 : index
    %13 = vector.load %arg6[%c0_10, %c0_11] : memref<2x3xf32, #tpu.memory_space<vmem>>, vector<2x3xf32>
    tpu.vector_store %arg6[%c0_10, %c0_11], %12 {strides = array<i32>} : memref<2x3xf32, #tpu.memory_space<vmem>>, vector<2x3xf32>,
    return
  }
  func.func @transform_0(%arg0: i32) -> (i32, i32) {
    %c0_i32 = arith.constant 0 : i32
    %c0_i32_0 = arith.constant 0 : i32
    %c0_i32_1 = arith.constant 0 : i32
    return %c0_i32, %c0_i32_0 : i32, i32
  }
  func.func @transform_1(%arg0: i32) -> (i32, i32) {
    %c0_i32 = arith.constant 0 : i32
    %c0_i32_0 = arith.constant 0 : i32
    %c0_i32_1 = arith.constant 0 : i32
    return %c0_i32, %c0_i32_0 : i32, i32
  }
  func.func @transform_2(%arg0: i32) -> (i32, i32) {
    %c0_i32 = arith.constant 0 : i32
    %c0_i32_0 = arith.constant 0 : i32
    %c0_i32_1 = arith.constant 0 : i32
    return %c0_i32, %c0_i32_0 : i32, i32
  }
  func.func @transform_3(%arg0: i32) -> (i32, i32) {
    %c0_i32 = arith.constant 0 : i32
    %c0_i32_0 = arith.constant 0 : i32
    %c0_i32_1 = arith.constant 0 : i32
    return %c0_i32, %c0_i32_0 : i32, i32
  }
  func.func @transform_4(%arg0: i32) -> (i32, i32) {
    %c0_i32 = arith.constant 0 : i32
    %c0_i32_0 = arith.constant 0 : i32
    %c0_i32_1 = arith.constant 0 : i32
    return %c0_i32, %c0_i32_0 : i32, i32
  }
  func.func @transform_5(%arg0: i32) -> (i32, i32) {
    %c0_i32 = arith.constant 0 : i32
    %c0_i32_0 = arith.constant 0 : i32
    %c0_i32_1 = arith.constant 0 : i32
    return %c0_i32, %c0_i32_0 : i32, i32
  }
}

module attributes {stable_mosaic.version = 11 : i64} {
  func.func @_encoder_layer_kernel(%arg0: i32, %arg1: memref<16x32xf32, #tpu.memory_space<vmem>>, %arg2: memref<1x32x16xbf16, #tpu.memory_space<vmem>>, %arg3: memref<1x1x16xf32, #tpu.memory_space<vmem>>, %arg4: memref<1x1x16xf32, #tpu.memory_space<vmem>>, %arg5: memref<1x1x16xf32, #tpu.memory_space<vmem>>, %arg6: memref<1x32x16xbf16, #tpu.memory_space<vmem>>, %arg7: memref<1x1x16xf32, #tpu.memory_space<vmem>>, %arg8: memref<1x1x16xf32, #tpu.memory_space<vmem>>, %arg9: memref<1x1x16xf32, #tpu.memory_space<vmem>>, %arg10: memref<1x4x16x4xbf16, #tpu.memory_space<vmem>>, %arg11: memref<1x4x1x4xf32, #tpu.memory_space<vmem>>, %arg12: memref<1x4x16x4xbf16, #tpu.memory_space<vmem>>, %arg13: memref<1x4x1x4xf32, #tpu.memory_space<vmem>>, %arg14: memref<1x4x32x4xbf16, #tpu.memory_space<vmem>>, %arg15: memref<1x4x1x4xf32, #tpu.memory_space<vmem>>, %arg16: memref<1x4x4x16xbf16, #tpu.memory_space<vmem>>, %arg17: memref<1x1x16xf32, #tpu.memory_space<vmem>>, %arg18: memref<1x1x16xf32, #tpu.memory_space<vmem>>, %arg19: memref<1x1x16xf32, #tpu.memory_space<vmem>>, %arg20: memref<1x4x16x32xbf16, #tpu.memory_space<vmem>>, %arg21: memref<1x4x1x32xf32, #tpu.memory_space<vmem>>, %arg22: memref<1x4x32x16xbf16, #tpu.memory_space<vmem>>, %arg23: memref<1x4x1x16xf32, #tpu.memory_space<vmem>>, %arg24: memref<1x4x1x16xf32, #tpu.memory_space<vmem>>, %arg25: memref<1x4x1x16xf32, #tpu.memory_space<vmem>>, %arg26: memref<1x16x32xbf16, #tpu.memory_space<vmem>>, %arg27: memref<1x1x32xf32, #tpu.memory_space<vmem>>, %arg28: memref<1x1x32xf32, #tpu.memory_space<vmem>>, %arg29: memref<1x1x32xf32, #tpu.memory_space<vmem>>, %arg30: memref<16x32xf32, #tpu.memory_space<vmem>>, %arg31: memref<16x32xf32, #tpu.memory_space<vmem>>) attributes {dimension_semantics = [#tpu.dimension_semantics<arbitrary>], iteration_bounds = array<i64: 2>, scalar_prefetch = 0 : i64, scratch_operands = 1 : i64, tpu.core_type = #tpu.core_type<tc>, window_params = [{pipeline_mode = #tpu.pipeline_mode<synchronous>, transform_indices = @transform_0, window_bounds = array<i64: 16, 32>}, {transform_indices = @transform_1, window_bounds = array<i64: 1, 32, 16>}, {transform_indices = @transform_2, window_bounds = array<i64: 1, 1, 16>}, {transform_indices = @transform_3, window_bounds = array<i64: 1, 1, 16>}, {transform_indices = @transform_4, window_bounds = array<i64: 1, 1, 16>}, {transform_indices = @transform_5, window_bounds = array<i64: 1, 32, 16>}, {transform_indices = @transform_6, window_bounds = array<i64: 1, 1, 16>}, {transform_indices = @transform_7, window_bounds = array<i64: 1, 1, 16>}, {transform_indices = @transform_8, window_bounds = array<i64: 1, 1, 16>}, {transform_indices = @transform_9, window_bounds = array<i64: 1, 4, 16, 4>}, {transform_indices = @transform_10, window_bounds = array<i64: 1, 4, 1, 4>}, {transform_indices = @transform_11, window_bounds = array<i64: 1, 4, 16, 4>}, {transform_indices = @transform_12, window_bounds = array<i64: 1, 4, 1, 4>}, {transform_indices = @transform_13, window_bounds = array<i64: 1, 4, 32, 4>}, {transform_indices = @transform_14, window_bounds = array<i64: 1, 4, 1, 4>}, {transform_indices = @transform_15, window_bounds = array<i64: 1, 4, 4, 16>}, {transform_indices = @transform_16, window_bounds = array<i64: 1, 1, 16>}, {transform_indices = @transform_17, window_bounds = array<i64: 1, 1, 16>}, {transform_indices = @transform_18, window_bounds = array<i64: 1, 1, 16>}, {transform_indices = @transform_19, window_bounds = array<i64: 1, 4, 16, 32>}, {transform_indices = @transform_20, window_bounds = array<i64: 1, 4, 1, 32>}, {transform_indices = @transform_21, window_bounds = array<i64: 1, 4, 32, 16>}, {transform_indices = @transform_22, window_bounds = array<i64: 1, 4, 1, 16>}, {transform_indices = @transform_23, window_bounds = array<i64: 1, 4, 1, 16>}, {transform_indices = @transform_24, window_bounds = array<i64: 1, 4, 1, 16>}, {transform_indices = @transform_25, window_bounds = array<i64: 1, 16, 32>}, {transform_indices = @transform_26, window_bounds = array<i64: 1, 1, 32>}, {transform_indices = @transform_27, window_bounds = array<i64: 1, 1, 32>}, {transform_indices = @transform_28, window_bounds = array<i64: 1, 1, 32>}, {pipeline_mode = #tpu.pipeline_mode<synchronous>, transform_indices = @transform_29, window_bounds = array<i64: 16, 32>}]} {
    %c0_i32 = arith.constant 0 : i32
    %0 = arith.cmpi eq, %arg0, %c0_i32 : i32
    %1 = arith.extui %0 : i1 to i32
    %c0_i32_0 = arith.constant 0 : i32
    %2 = arith.cmpi ne, %1, %c0_i32_0 : i32
    scf.if %2 {
      %c0_318 = arith.constant 0 : index
      %c0_319 = arith.constant 0 : index
      %435 = vector.load %arg1[%c0_318, %c0_319] : memref<16x32xf32, #tpu.memory_space<vmem>>, vector<16x32xf32>
      %c0_320 = arith.constant 0 : index
      %c0_321 = arith.constant 0 : index
      %436 = vector.load %arg31[%c0_320, %c0_321] : memref<16x32xf32, #tpu.memory_space<vmem>>, vector<16x32xf32>
      tpu.vector_store %arg31[%c0_320, %c0_321], %435 {strides = array<i32>} : memref<16x32xf32, #tpu.memory_space<vmem>>, vector<16x32xf32>,
    } else {
    }
    %c0 = arith.constant 0 : index
    %c0_1 = arith.constant 0 : index
    %3 = vector.load %arg31[%c0, %c0_1] : memref<16x32xf32, #tpu.memory_space<vmem>>, vector<16x32xf32>
    %4 = arith.truncf %3 : vector<16x32xf32> to vector<16x32xbf16>
    %c0_2 = arith.constant 0 : index
    %c0_3 = arith.constant 0 : index
    %c0_4 = arith.constant 0 : index
    %5 = vector.load %arg2[%c0_2, %c0_3, %c0_4] : memref<1x32x16xbf16, #tpu.memory_space<vmem>>, vector<1x32x16xbf16>
    %6 = vector.shape_cast %5 : vector<1x32x16xbf16> to vector<32x16xbf16>
    %cst = arith.constant dense<0.000000e+00> : vector<16x16xf32>
    %7 = tpu.matmul %4, %6, %cst {dimension_numbers = #tpu.dot_dimension_numbers<[1], [0], [0], [1], [0, 0, 1, 1], [], []>} : vector<16x32xbf16>, vector<32x16xbf16>, vector<16x16xf32> -> vector<16x16xf32>
    %c0_5 = arith.constant 0 : index
    %c0_6 = arith.constant 0 : index
    %c0_7 = arith.constant 0 : index
    %8 = vector.load %arg3[%c0_5, %c0_6, %c0_7] : memref<1x1x16xf32, #tpu.memory_space<vmem>>, vector<1x1x16xf32>
    %9 = vector.shape_cast %8 : vector<1x1x16xf32> to vector<1x16xf32>
    %10 = vector.broadcast %9 : vector<1x16xf32> to vector<16x16xf32>
    %11 = arith.addf %7, %10 : vector<16x16xf32>
    %c0_8 = arith.constant 0 : index
    %c0_9 = arith.constant 0 : index
    %c0_10 = arith.constant 0 : index
    %12 = vector.load %arg4[%c0_8, %c0_9, %c0_10] : memref<1x1x16xf32, #tpu.memory_space<vmem>>, vector<1x1x16xf32>
    %13 = vector.shape_cast %12 : vector<1x1x16xf32> to vector<1x16xf32>
    %14 = vector.broadcast %13 : vector<1x16xf32> to vector<16x16xf32>
    %15 = arith.mulf %11, %14 : vector<16x16xf32>
    %c0_11 = arith.constant 0 : index
    %c0_12 = arith.constant 0 : index
    %c0_13 = arith.constant 0 : index
    %16 = vector.load %arg5[%c0_11, %c0_12, %c0_13] : memref<1x1x16xf32, #tpu.memory_space<vmem>>, vector<1x1x16xf32>
    %17 = vector.shape_cast %16 : vector<1x1x16xf32> to vector<1x16xf32>
    %18 = vector.broadcast %17 : vector<1x16xf32> to vector<16x16xf32>
    %19 = arith.addf %15, %18 : vector<16x16xf32>
    %c0_14 = arith.constant 0 : index
    %c0_15 = arith.constant 0 : index
    %c0_16 = arith.constant 0 : index
    %20 = vector.load %arg6[%c0_14, %c0_15, %c0_16] : memref<1x32x16xbf16, #tpu.memory_space<vmem>>, vector<1x32x16xbf16>
    %21 = vector.shape_cast %20 : vector<1x32x16xbf16> to vector<32x16xbf16>
    %cst_17 = arith.constant dense<0.000000e+00> : vector<16x16xf32>
    %22 = tpu.matmul %4, %21, %cst_17 {dimension_numbers = #tpu.dot_dimension_numbers<[1], [0], [0], [1], [0, 0, 1, 1], [], []>} : vector<16x32xbf16>, vector<32x16xbf16>, vector<16x16xf32> -> vector<16x16xf32>
    %c0_18 = arith.constant 0 : index
    %c0_19 = arith.constant 0 : index
    %c0_20 = arith.constant 0 : index
    %23 = vector.load %arg7[%c0_18, %c0_19, %c0_20] : memref<1x1x16xf32, #tpu.memory_space<vmem>>, vector<1x1x16xf32>
    %24 = vector.shape_cast %23 : vector<1x1x16xf32> to vector<1x16xf32>
    %25 = vector.broadcast %24 : vector<1x16xf32> to vector<16x16xf32>
    %26 = arith.addf %22, %25 : vector<16x16xf32>
    %c0_21 = arith.constant 0 : index
    %c0_22 = arith.constant 0 : index
    %c0_23 = arith.constant 0 : index
    %27 = vector.load %arg8[%c0_21, %c0_22, %c0_23] : memref<1x1x16xf32, #tpu.memory_space<vmem>>, vector<1x1x16xf32>
    %28 = vector.shape_cast %27 : vector<1x1x16xf32> to vector<1x16xf32>
    %29 = vector.broadcast %28 : vector<1x16xf32> to vector<16x16xf32>
    %30 = arith.mulf %26, %29 : vector<16x16xf32>
    %c0_24 = arith.constant 0 : index
    %c0_25 = arith.constant 0 : index
    %c0_26 = arith.constant 0 : index
    %31 = vector.load %arg9[%c0_24, %c0_25, %c0_26] : memref<1x1x16xf32, #tpu.memory_space<vmem>>, vector<1x1x16xf32>
    %32 = vector.shape_cast %31 : vector<1x1x16xf32> to vector<1x16xf32>
    %33 = vector.broadcast %32 : vector<1x16xf32> to vector<16x16xf32>
    %34 = arith.addf %30, %33 : vector<16x16xf32>
    %35 = arith.truncf %34 : vector<16x16xf32> to vector<16x16xbf16>
    %c0_27 = arith.constant 0 : index
    %c0_28 = arith.constant 0 : index
    %c0_29 = arith.constant 0 : index
    %36 = vector.load %arg17[%c0_27, %c0_28, %c0_29] : memref<1x1x16xf32, #tpu.memory_space<vmem>>, vector<1x1x16xf32>
    %37 = vector.shape_cast %36 : vector<1x1x16xf32> to vector<1x16xf32>
    %38 = vector.broadcast %37 : vector<1x16xf32> to vector<16x16xf32>
    %39 = arith.addf %38, %19 : vector<16x16xf32>
    %c0_30 = arith.constant 0 : index
    %c0_31 = arith.constant 0 : index
    %c0_32 = arith.constant 0 : index
    %c0_33 = arith.constant 0 : index
    %40 = vector.load %arg10[%c0_30, %c0_31, %c0_32, %c0_33] : memref<1x4x16x4xbf16, #tpu.memory_space<vmem>>, vector<1x1x16x4xbf16>
    %41 = vector.shape_cast %40 : vector<1x1x16x4xbf16> to vector<16x4xbf16>
    %cst_34 = arith.constant dense<0.000000e+00> : vector<16x4xf32>
    %42 = tpu.matmul %35, %41, %cst_34 {dimension_numbers = #tpu.dot_dimension_numbers<[1], [0], [0], [1], [0, 0, 1, 1], [], []>} : vector<16x16xbf16>, vector<16x4xbf16>, vector<16x4xf32> -> vector<16x4xf32>
    %c0_35 = arith.constant 0 : index
    %c0_36 = arith.constant 0 : index
    %c0_37 = arith.constant 0 : index
    %c0_38 = arith.constant 0 : index
    %43 = vector.load %arg11[%c0_35, %c0_36, %c0_37, %c0_38] : memref<1x4x1x4xf32, #tpu.memory_space<vmem>>, vector<1x1x1x4xf32>
    %44 = vector.shape_cast %43 : vector<1x1x1x4xf32> to vector<1x4xf32>
    %45 = vector.broadcast %44 : vector<1x4xf32> to vector<16x4xf32>
    %46 = arith.addf %42, %45 : vector<16x4xf32>
    %c0_39 = arith.constant 0 : index
    %c0_40 = arith.constant 0 : index
    %c0_41 = arith.constant 0 : index
    %c0_42 = arith.constant 0 : index
    %47 = vector.load %arg12[%c0_39, %c0_40, %c0_41, %c0_42] : memref<1x4x16x4xbf16, #tpu.memory_space<vmem>>, vector<1x1x16x4xbf16>
    %48 = vector.shape_cast %47 : vector<1x1x16x4xbf16> to vector<16x4xbf16>
    %cst_43 = arith.constant dense<0.000000e+00> : vector<16x4xf32>
    %49 = tpu.matmul %35, %48, %cst_43 {dimension_numbers = #tpu.dot_dimension_numbers<[1], [0], [0], [1], [0, 0, 1, 1], [], []>} : vector<16x16xbf16>, vector<16x4xbf16>, vector<16x4xf32> -> vector<16x4xf32>
    %c0_44 = arith.constant 0 : index
    %c0_45 = arith.constant 0 : index
    %c0_46 = arith.constant 0 : index
    %c0_47 = arith.constant 0 : index
    %50 = vector.load %arg13[%c0_44, %c0_45, %c0_46, %c0_47] : memref<1x4x1x4xf32, #tpu.memory_space<vmem>>, vector<1x1x1x4xf32>
    %51 = vector.shape_cast %50 : vector<1x1x1x4xf32> to vector<1x4xf32>
    %52 = vector.broadcast %51 : vector<1x4xf32> to vector<16x4xf32>
    %53 = arith.addf %49, %52 : vector<16x4xf32>
    %c0_48 = arith.constant 0 : index
    %c0_49 = arith.constant 0 : index
    %c0_50 = arith.constant 0 : index
    %c0_51 = arith.constant 0 : index
    %54 = vector.load %arg14[%c0_48, %c0_49, %c0_50, %c0_51] : memref<1x4x32x4xbf16, #tpu.memory_space<vmem>>, vector<1x1x32x4xbf16>
    %55 = vector.shape_cast %54 : vector<1x1x32x4xbf16> to vector<32x4xbf16>
    %cst_52 = arith.constant dense<0.000000e+00> : vector<16x4xf32>
    %56 = tpu.matmul %4, %55, %cst_52 {dimension_numbers = #tpu.dot_dimension_numbers<[1], [0], [0], [1], [0, 0, 1, 1], [], []>} : vector<16x32xbf16>, vector<32x4xbf16>, vector<16x4xf32> -> vector<16x4xf32>
    %c0_53 = arith.constant 0 : index
    %c0_54 = arith.constant 0 : index
    %c0_55 = arith.constant 0 : index
    %c0_56 = arith.constant 0 : index
    %57 = vector.load %arg15[%c0_53, %c0_54, %c0_55, %c0_56] : memref<1x4x1x4xf32, #tpu.memory_space<vmem>>, vector<1x1x1x4xf32>
    %58 = vector.shape_cast %57 : vector<1x1x1x4xf32> to vector<1x4xf32>
    %59 = vector.broadcast %58 : vector<1x4xf32> to vector<16x4xf32>
    %60 = arith.addf %56, %59 : vector<16x4xf32>
    %61 = vector.extract_strided_slice %46 {offsets = [0, 0], sizes = [8, 4], strides = [1, 1]} : vector<16x4xf32> to vector<8x4xf32>
    %62 = arith.truncf %61 : vector<8x4xf32> to vector<8x4xbf16>
    %63 = vector.extract_strided_slice %53 {offsets = [0, 0], sizes = [8, 4], strides = [1, 1]} : vector<16x4xf32> to vector<8x4xf32>
    %64 = arith.truncf %63 : vector<8x4xf32> to vector<8x4xbf16>
    %65 = vector.extract_strided_slice %60 {offsets = [0, 0], sizes = [8, 4], strides = [1, 1]} : vector<16x4xf32> to vector<8x4xf32>
    %66 = arith.truncf %65 : vector<8x4xf32> to vector<8x4xbf16>
    %cst_57 = arith.constant dense<0.000000e+00> : vector<8x8xf32>
    %67 = tpu.matmul %62, %64, %cst_57 {dimension_numbers = #tpu.dot_dimension_numbers<[1], [1], [0], [0], [0, 0, 1, 0], [], []>} : vector<8x4xbf16>, vector<8x4xbf16>, vector<8x8xf32> -> vector<8x8xf32>
    %cst_58 = arith.constant dense<0xFF800000> : vector<8xf32>
    %68 = vector.multi_reduction <maximumf>, %67, %cst_58 [1] : vector<8x8xf32> to vector<8xf32>
    %69 = vector.shape_cast %68 : vector<8xf32> to vector<8x1xf32>
    %70 = vector.broadcast %69 : vector<8x1xf32> to vector<8x8xf32>
    %71 = arith.subf %67, %70 : vector<8x8xf32>
    %72 = math.exp %71 : vector<8x8xf32>
    %cst_59 = arith.constant dense<0.000000e+00> : vector<8xf32>
    %73 = vector.multi_reduction <add>, %72, %cst_59 [1] : vector<8x8xf32> to vector<8xf32>
    %74 = vector.shape_cast %73 : vector<8xf32> to vector<8x1xf32>
    %75 = tpu.reciprocal %74 {approx = true} : vector<8x1xf32> -> vector<8x1xf32>
    %76 = vector.broadcast %75 : vector<8x1xf32> to vector<8x8xf32>
    %77 = arith.mulf %72, %76 : vector<8x8xf32>
    %78 = arith.truncf %77 : vector<8x8xf32> to vector<8x8xbf16>
    %cst_60 = arith.constant dense<0.000000e+00> : vector<8x4xf32>
    %79 = tpu.matmul %78, %66, %cst_60 {dimension_numbers = #tpu.dot_dimension_numbers<[1], [0], [0], [1], [0, 0, 1, 1], [], []>} : vector<8x8xbf16>, vector<8x4xbf16>, vector<8x4xf32> -> vector<8x4xf32>
    %80 = vector.extract_strided_slice %46 {offsets = [8, 0], sizes = [8, 4], strides = [1, 1]} : vector<16x4xf32> to vector<8x4xf32>
    %81 = arith.truncf %80 : vector<8x4xf32> to vector<8x4xbf16>
    %82 = vector.extract_strided_slice %53 {offsets = [8, 0], sizes = [8, 4], strides = [1, 1]} : vector<16x4xf32> to vector<8x4xf32>
    %83 = arith.truncf %82 : vector<8x4xf32> to vector<8x4xbf16>
    %84 = vector.extract_strided_slice %60 {offsets = [8, 0], sizes = [8, 4], strides = [1, 1]} : vector<16x4xf32> to vector<8x4xf32>
    %85 = arith.truncf %84 : vector<8x4xf32> to vector<8x4xbf16>
    %cst_61 = arith.constant dense<0.000000e+00> : vector<8x8xf32>
    %86 = tpu.matmul %81, %83, %cst_61 {dimension_numbers = #tpu.dot_dimension_numbers<[1], [1], [0], [0], [0, 0, 1, 0], [], []>} : vector<8x4xbf16>, vector<8x4xbf16>, vector<8x8xf32> -> vector<8x8xf32>
    %cst_62 = arith.constant dense<0xFF800000> : vector<8xf32>
    %87 = vector.multi_reduction <maximumf>, %86, %cst_62 [1] : vector<8x8xf32> to vector<8xf32>
    %88 = vector.shape_cast %87 : vector<8xf32> to vector<8x1xf32>
    %89 = vector.broadcast %88 : vector<8x1xf32> to vector<8x8xf32>
    %90 = arith.subf %86, %89 : vector<8x8xf32>
    %91 = math.exp %90 : vector<8x8xf32>
    %cst_63 = arith.constant dense<0.000000e+00> : vector<8xf32>
    %92 = vector.multi_reduction <add>, %91, %cst_63 [1] : vector<8x8xf32> to vector<8xf32>
    %93 = vector.shape_cast %92 : vector<8xf32> to vector<8x1xf32>
    %94 = tpu.reciprocal %93 {approx = true} : vector<8x1xf32> -> vector<8x1xf32>
    %95 = vector.broadcast %94 : vector<8x1xf32> to vector<8x8xf32>
    %96 = arith.mulf %91, %95 : vector<8x8xf32>
    %97 = arith.truncf %96 : vector<8x8xf32> to vector<8x8xbf16>
    %cst_64 = arith.constant dense<0.000000e+00> : vector<8x4xf32>
    %98 = tpu.matmul %97, %85, %cst_64 {dimension_numbers = #tpu.dot_dimension_numbers<[1], [0], [0], [1], [0, 0, 1, 1], [], []>} : vector<8x8xbf16>, vector<8x4xbf16>, vector<8x4xf32> -> vector<8x4xf32>
    %99 = tpu.concatenate %79, %98 in 0 : vector<8x4xf32>, vector<8x4xf32> -> vector<16x4xf32>
    %100 = arith.truncf %99 : vector<16x4xf32> to vector<16x4xbf16>
    %c0_65 = arith.constant 0 : index
    %c0_66 = arith.constant 0 : index
    %c0_67 = arith.constant 0 : index
    %c0_68 = arith.constant 0 : index
    %101 = vector.load %arg16[%c0_65, %c0_66, %c0_67, %c0_68] : memref<1x4x4x16xbf16, #tpu.memory_space<vmem>>, vector<1x1x4x16xbf16>
    %102 = vector.shape_cast %101 : vector<1x1x4x16xbf16> to vector<4x16xbf16>
    %cst_69 = arith.constant dense<0.000000e+00> : vector<16x16xf32>
    %103 = tpu.matmul %100, %102, %cst_69 {dimension_numbers = #tpu.dot_dimension_numbers<[1], [0], [0], [1], [0, 0, 1, 1], [], []>} : vector<16x4xbf16>, vector<4x16xbf16>, vector<16x16xf32> -> vector<16x16xf32>
    %104 = arith.addf %39, %103 : vector<16x16xf32>
    %c0_70 = arith.constant 0 : index
    %c1 = arith.constant 1 : index
    %c0_71 = arith.constant 0 : index
    %c0_72 = arith.constant 0 : index
    %105 = vector.load %arg10[%c0_70, %c1, %c0_71, %c0_72] : memref<1x4x16x4xbf16, #tpu.memory_space<vmem>>, vector<1x1x16x4xbf16>
    %106 = vector.shape_cast %105 : vector<1x1x16x4xbf16> to vector<16x4xbf16>
    %cst_73 = arith.constant dense<0.000000e+00> : vector<16x4xf32>
    %107 = tpu.matmul %35, %106, %cst_73 {dimension_numbers = #tpu.dot_dimension_numbers<[1], [0], [0], [1], [0, 0, 1, 1], [], []>} : vector<16x16xbf16>, vector<16x4xbf16>, vector<16x4xf32> -> vector<16x4xf32>
    %c0_74 = arith.constant 0 : index
    %c1_75 = arith.constant 1 : index
    %c0_76 = arith.constant 0 : index
    %c0_77 = arith.constant 0 : index
    %108 = vector.load %arg11[%c0_74, %c1_75, %c0_76, %c0_77] : memref<1x4x1x4xf32, #tpu.memory_space<vmem>>, vector<1x1x1x4xf32>
    %109 = vector.shape_cast %108 : vector<1x1x1x4xf32> to vector<1x4xf32>
    %110 = vector.broadcast %109 : vector<1x4xf32> to vector<16x4xf32>
    %111 = arith.addf %107, %110 : vector<16x4xf32>
    %c0_78 = arith.constant 0 : index
    %c1_79 = arith.constant 1 : index
    %c0_80 = arith.constant 0 : index
    %c0_81 = arith.constant 0 : index
    %112 = vector.load %arg12[%c0_78, %c1_79, %c0_80, %c0_81] : memref<1x4x16x4xbf16, #tpu.memory_space<vmem>>, vector<1x1x16x4xbf16>
    %113 = vector.shape_cast %112 : vector<1x1x16x4xbf16> to vector<16x4xbf16>
    %cst_82 = arith.constant dense<0.000000e+00> : vector<16x4xf32>
    %114 = tpu.matmul %35, %113, %cst_82 {dimension_numbers = #tpu.dot_dimension_numbers<[1], [0], [0], [1], [0, 0, 1, 1], [], []>} : vector<16x16xbf16>, vector<16x4xbf16>, vector<16x4xf32> -> vector<16x4xf32>
    %c0_83 = arith.constant 0 : index
    %c1_84 = arith.constant 1 : index
    %c0_85 = arith.constant 0 : index
    %c0_86 = arith.constant 0 : index
    %115 = vector.load %arg13[%c0_83, %c1_84, %c0_85, %c0_86] : memref<1x4x1x4xf32, #tpu.memory_space<vmem>>, vector<1x1x1x4xf32>
    %116 = vector.shape_cast %115 : vector<1x1x1x4xf32> to vector<1x4xf32>
    %117 = vector.broadcast %116 : vector<1x4xf32> to vector<16x4xf32>
    %118 = arith.addf %114, %117 : vector<16x4xf32>
    %c0_87 = arith.constant 0 : index
    %c1_88 = arith.constant 1 : index
    %c0_89 = arith.constant 0 : index
    %c0_90 = arith.constant 0 : index
    %119 = vector.load %arg14[%c0_87, %c1_88, %c0_89, %c0_90] : memref<1x4x32x4xbf16, #tpu.memory_space<vmem>>, vector<1x1x32x4xbf16>
    %120 = vector.shape_cast %119 : vector<1x1x32x4xbf16> to vector<32x4xbf16>
    %cst_91 = arith.constant dense<0.000000e+00> : vector<16x4xf32>
    %121 = tpu.matmul %4, %120, %cst_91 {dimension_numbers = #tpu.dot_dimension_numbers<[1], [0], [0], [1], [0, 0, 1, 1], [], []>} : vector<16x32xbf16>, vector<32x4xbf16>, vector<16x4xf32> -> vector<16x4xf32>
    %c0_92 = arith.constant 0 : index
    %c1_93 = arith.constant 1 : index
    %c0_94 = arith.constant 0 : index
    %c0_95 = arith.constant 0 : index
    %122 = vector.load %arg15[%c0_92, %c1_93, %c0_94, %c0_95] : memref<1x4x1x4xf32, #tpu.memory_space<vmem>>, vector<1x1x1x4xf32>
    %123 = vector.shape_cast %122 : vector<1x1x1x4xf32> to vector<1x4xf32>
    %124 = vector.broadcast %123 : vector<1x4xf32> to vector<16x4xf32>
    %125 = arith.addf %121, %124 : vector<16x4xf32>
    %126 = vector.extract_strided_slice %111 {offsets = [0, 0], sizes = [8, 4], strides = [1, 1]} : vector<16x4xf32> to vector<8x4xf32>
    %127 = arith.truncf %126 : vector<8x4xf32> to vector<8x4xbf16>
    %128 = vector.extract_strided_slice %118 {offsets = [0, 0], sizes = [8, 4], strides = [1, 1]} : vector<16x4xf32> to vector<8x4xf32>
    %129 = arith.truncf %128 : vector<8x4xf32> to vector<8x4xbf16>
    %130 = vector.extract_strided_slice %125 {offsets = [0, 0], sizes = [8, 4], strides = [1, 1]} : vector<16x4xf32> to vector<8x4xf32>
    %131 = arith.truncf %130 : vector<8x4xf32> to vector<8x4xbf16>
    %cst_96 = arith.constant dense<0.000000e+00> : vector<8x8xf32>
    %132 = tpu.matmul %127, %129, %cst_96 {dimension_numbers = #tpu.dot_dimension_numbers<[1], [1], [0], [0], [0, 0, 1, 0], [], []>} : vector<8x4xbf16>, vector<8x4xbf16>, vector<8x8xf32> -> vector<8x8xf32>
    %cst_97 = arith.constant dense<0xFF800000> : vector<8xf32>
    %133 = vector.multi_reduction <maximumf>, %132, %cst_97 [1] : vector<8x8xf32> to vector<8xf32>
    %134 = vector.shape_cast %133 : vector<8xf32> to vector<8x1xf32>
    %135 = vector.broadcast %134 : vector<8x1xf32> to vector<8x8xf32>
    %136 = arith.subf %132, %135 : vector<8x8xf32>
    %137 = math.exp %136 : vector<8x8xf32>
    %cst_98 = arith.constant dense<0.000000e+00> : vector<8xf32>
    %138 = vector.multi_reduction <add>, %137, %cst_98 [1] : vector<8x8xf32> to vector<8xf32>
    %139 = vector.shape_cast %138 : vector<8xf32> to vector<8x1xf32>
    %140 = tpu.reciprocal %139 {approx = true} : vector<8x1xf32> -> vector<8x1xf32>
    %141 = vector.broadcast %140 : vector<8x1xf32> to vector<8x8xf32>
    %142 = arith.mulf %137, %141 : vector<8x8xf32>
    %143 = arith.truncf %142 : vector<8x8xf32> to vector<8x8xbf16>
    %cst_99 = arith.constant dense<0.000000e+00> : vector<8x4xf32>
    %144 = tpu.matmul %143, %131, %cst_99 {dimension_numbers = #tpu.dot_dimension_numbers<[1], [0], [0], [1], [0, 0, 1, 1], [], []>} : vector<8x8xbf16>, vector<8x4xbf16>, vector<8x4xf32> -> vector<8x4xf32>
    %145 = vector.extract_strided_slice %111 {offsets = [8, 0], sizes = [8, 4], strides = [1, 1]} : vector<16x4xf32> to vector<8x4xf32>
    %146 = arith.truncf %145 : vector<8x4xf32> to vector<8x4xbf16>
    %147 = vector.extract_strided_slice %118 {offsets = [8, 0], sizes = [8, 4], strides = [1, 1]} : vector<16x4xf32> to vector<8x4xf32>
    %148 = arith.truncf %147 : vector<8x4xf32> to vector<8x4xbf16>
    %149 = vector.extract_strided_slice %125 {offsets = [8, 0], sizes = [8, 4], strides = [1, 1]} : vector<16x4xf32> to vector<8x4xf32>
    %150 = arith.truncf %149 : vector<8x4xf32> to vector<8x4xbf16>
    %cst_100 = arith.constant dense<0.000000e+00> : vector<8x8xf32>
    %151 = tpu.matmul %146, %148, %cst_100 {dimension_numbers = #tpu.dot_dimension_numbers<[1], [1], [0], [0], [0, 0, 1, 0], [], []>} : vector<8x4xbf16>, vector<8x4xbf16>, vector<8x8xf32> -> vector<8x8xf32>
    %cst_101 = arith.constant dense<0xFF800000> : vector<8xf32>
    %152 = vector.multi_reduction <maximumf>, %151, %cst_101 [1] : vector<8x8xf32> to vector<8xf32>
    %153 = vector.shape_cast %152 : vector<8xf32> to vector<8x1xf32>
    %154 = vector.broadcast %153 : vector<8x1xf32> to vector<8x8xf32>
    %155 = arith.subf %151, %154 : vector<8x8xf32>
    %156 = math.exp %155 : vector<8x8xf32>
    %cst_102 = arith.constant dense<0.000000e+00> : vector<8xf32>
    %157 = vector.multi_reduction <add>, %156, %cst_102 [1] : vector<8x8xf32> to vector<8xf32>
    %158 = vector.shape_cast %157 : vector<8xf32> to vector<8x1xf32>
    %159 = tpu.reciprocal %158 {approx = true} : vector<8x1xf32> -> vector<8x1xf32>
    %160 = vector.broadcast %159 : vector<8x1xf32> to vector<8x8xf32>
    %161 = arith.mulf %156, %160 : vector<8x8xf32>
    %162 = arith.truncf %161 : vector<8x8xf32> to vector<8x8xbf16>
    %cst_103 = arith.constant dense<0.000000e+00> : vector<8x4xf32>
    %163 = tpu.matmul %162, %150, %cst_103 {dimension_numbers = #tpu.dot_dimension_numbers<[1], [0], [0], [1], [0, 0, 1, 1], [], []>} : vector<8x8xbf16>, vector<8x4xbf16>, vector<8x4xf32> -> vector<8x4xf32>
    %164 = tpu.concatenate %144, %163 in 0 : vector<8x4xf32>, vector<8x4xf32> -> vector<16x4xf32>
    %165 = arith.truncf %164 : vector<16x4xf32> to vector<16x4xbf16>
    %c0_104 = arith.constant 0 : index
    %c1_105 = arith.constant 1 : index
    %c0_106 = arith.constant 0 : index
    %c0_107 = arith.constant 0 : index
    %166 = vector.load %arg16[%c0_104, %c1_105, %c0_106, %c0_107] : memref<1x4x4x16xbf16, #tpu.memory_space<vmem>>, vector<1x1x4x16xbf16>
    %167 = vector.shape_cast %166 : vector<1x1x4x16xbf16> to vector<4x16xbf16>
    %cst_108 = arith.constant dense<0.000000e+00> : vector<16x16xf32>
    %168 = tpu.matmul %165, %167, %cst_108 {dimension_numbers = #tpu.dot_dimension_numbers<[1], [0], [0], [1], [0, 0, 1, 1], [], []>} : vector<16x4xbf16>, vector<4x16xbf16>, vector<16x16xf32> -> vector<16x16xf32>
    %169 = arith.addf %104, %168 : vector<16x16xf32>
    %c0_109 = arith.constant 0 : index
    %c2 = arith.constant 2 : index
    %c0_110 = arith.constant 0 : index
    %c0_111 = arith.constant 0 : index
    %170 = vector.load %arg10[%c0_109, %c2, %c0_110, %c0_111] : memref<1x4x16x4xbf16, #tpu.memory_space<vmem>>, vector<1x1x16x4xbf16>
    %171 = vector.shape_cast %170 : vector<1x1x16x4xbf16> to vector<16x4xbf16>
    %cst_112 = arith.constant dense<0.000000e+00> : vector<16x4xf32>
    %172 = tpu.matmul %35, %171, %cst_112 {dimension_numbers = #tpu.dot_dimension_numbers<[1], [0], [0], [1], [0, 0, 1, 1], [], []>} : vector<16x16xbf16>, vector<16x4xbf16>, vector<16x4xf32> -> vector<16x4xf32>
    %c0_113 = arith.constant 0 : index
    %c2_114 = arith.constant 2 : index
    %c0_115 = arith.constant 0 : index
    %c0_116 = arith.constant 0 : index
    %173 = vector.load %arg11[%c0_113, %c2_114, %c0_115, %c0_116] : memref<1x4x1x4xf32, #tpu.memory_space<vmem>>, vector<1x1x1x4xf32>
    %174 = vector.shape_cast %173 : vector<1x1x1x4xf32> to vector<1x4xf32>
    %175 = vector.broadcast %174 : vector<1x4xf32> to vector<16x4xf32>
    %176 = arith.addf %172, %175 : vector<16x4xf32>
    %c0_117 = arith.constant 0 : index
    %c2_118 = arith.constant 2 : index
    %c0_119 = arith.constant 0 : index
    %c0_120 = arith.constant 0 : index
    %177 = vector.load %arg12[%c0_117, %c2_118, %c0_119, %c0_120] : memref<1x4x16x4xbf16, #tpu.memory_space<vmem>>, vector<1x1x16x4xbf16>
    %178 = vector.shape_cast %177 : vector<1x1x16x4xbf16> to vector<16x4xbf16>
    %cst_121 = arith.constant dense<0.000000e+00> : vector<16x4xf32>
    %179 = tpu.matmul %35, %178, %cst_121 {dimension_numbers = #tpu.dot_dimension_numbers<[1], [0], [0], [1], [0, 0, 1, 1], [], []>} : vector<16x16xbf16>, vector<16x4xbf16>, vector<16x4xf32> -> vector<16x4xf32>
    %c0_122 = arith.constant 0 : index
    %c2_123 = arith.constant 2 : index
    %c0_124 = arith.constant 0 : index
    %c0_125 = arith.constant 0 : index
    %180 = vector.load %arg13[%c0_122, %c2_123, %c0_124, %c0_125] : memref<1x4x1x4xf32, #tpu.memory_space<vmem>>, vector<1x1x1x4xf32>
    %181 = vector.shape_cast %180 : vector<1x1x1x4xf32> to vector<1x4xf32>
    %182 = vector.broadcast %181 : vector<1x4xf32> to vector<16x4xf32>
    %183 = arith.addf %179, %182 : vector<16x4xf32>
    %c0_126 = arith.constant 0 : index
    %c2_127 = arith.constant 2 : index
    %c0_128 = arith.constant 0 : index
    %c0_129 = arith.constant 0 : index
    %184 = vector.load %arg14[%c0_126, %c2_127, %c0_128, %c0_129] : memref<1x4x32x4xbf16, #tpu.memory_space<vmem>>, vector<1x1x32x4xbf16>
    %185 = vector.shape_cast %184 : vector<1x1x32x4xbf16> to vector<32x4xbf16>
    %cst_130 = arith.constant dense<0.000000e+00> : vector<16x4xf32>
    %186 = tpu.matmul %4, %185, %cst_130 {dimension_numbers = #tpu.dot_dimension_numbers<[1], [0], [0], [1], [0, 0, 1, 1], [], []>} : vector<16x32xbf16>, vector<32x4xbf16>, vector<16x4xf32> -> vector<16x4xf32>
    %c0_131 = arith.constant 0 : index
    %c2_132 = arith.constant 2 : index
    %c0_133 = arith.constant 0 : index
    %c0_134 = arith.constant 0 : index
    %187 = vector.load %arg15[%c0_131, %c2_132, %c0_133, %c0_134] : memref<1x4x1x4xf32, #tpu.memory_space<vmem>>, vector<1x1x1x4xf32>
    %188 = vector.shape_cast %187 : vector<1x1x1x4xf32> to vector<1x4xf32>
    %189 = vector.broadcast %188 : vector<1x4xf32> to vector<16x4xf32>
    %190 = arith.addf %186, %189 : vector<16x4xf32>
    %191 = vector.extract_strided_slice %176 {offsets = [0, 0], sizes = [8, 4], strides = [1, 1]} : vector<16x4xf32> to vector<8x4xf32>
    %192 = arith.truncf %191 : vector<8x4xf32> to vector<8x4xbf16>
    %193 = vector.extract_strided_slice %183 {offsets = [0, 0], sizes = [8, 4], strides = [1, 1]} : vector<16x4xf32> to vector<8x4xf32>
    %194 = arith.truncf %193 : vector<8x4xf32> to vector<8x4xbf16>
    %195 = vector.extract_strided_slice %190 {offsets = [0, 0], sizes = [8, 4], strides = [1, 1]} : vector<16x4xf32> to vector<8x4xf32>
    %196 = arith.truncf %195 : vector<8x4xf32> to vector<8x4xbf16>
    %cst_135 = arith.constant dense<0.000000e+00> : vector<8x8xf32>
    %197 = tpu.matmul %192, %194, %cst_135 {dimension_numbers = #tpu.dot_dimension_numbers<[1], [1], [0], [0], [0, 0, 1, 0], [], []>} : vector<8x4xbf16>, vector<8x4xbf16>, vector<8x8xf32> -> vector<8x8xf32>
    %cst_136 = arith.constant dense<0xFF800000> : vector<8xf32>
    %198 = vector.multi_reduction <maximumf>, %197, %cst_136 [1] : vector<8x8xf32> to vector<8xf32>
    %199 = vector.shape_cast %198 : vector<8xf32> to vector<8x1xf32>
    %200 = vector.broadcast %199 : vector<8x1xf32> to vector<8x8xf32>
    %201 = arith.subf %197, %200 : vector<8x8xf32>
    %202 = math.exp %201 : vector<8x8xf32>
    %cst_137 = arith.constant dense<0.000000e+00> : vector<8xf32>
    %203 = vector.multi_reduction <add>, %202, %cst_137 [1] : vector<8x8xf32> to vector<8xf32>
    %204 = vector.shape_cast %203 : vector<8xf32> to vector<8x1xf32>
    %205 = tpu.reciprocal %204 {approx = true} : vector<8x1xf32> -> vector<8x1xf32>
    %206 = vector.broadcast %205 : vector<8x1xf32> to vector<8x8xf32>
    %207 = arith.mulf %202, %206 : vector<8x8xf32>
    %208 = arith.truncf %207 : vector<8x8xf32> to vector<8x8xbf16>
    %cst_138 = arith.constant dense<0.000000e+00> : vector<8x4xf32>
    %209 = tpu.matmul %208, %196, %cst_138 {dimension_numbers = #tpu.dot_dimension_numbers<[1], [0], [0], [1], [0, 0, 1, 1], [], []>} : vector<8x8xbf16>, vector<8x4xbf16>, vector<8x4xf32> -> vector<8x4xf32>
    %210 = vector.extract_strided_slice %176 {offsets = [8, 0], sizes = [8, 4], strides = [1, 1]} : vector<16x4xf32> to vector<8x4xf32>
    %211 = arith.truncf %210 : vector<8x4xf32> to vector<8x4xbf16>
    %212 = vector.extract_strided_slice %183 {offsets = [8, 0], sizes = [8, 4], strides = [1, 1]} : vector<16x4xf32> to vector<8x4xf32>
    %213 = arith.truncf %212 : vector<8x4xf32> to vector<8x4xbf16>
    %214 = vector.extract_strided_slice %190 {offsets = [8, 0], sizes = [8, 4], strides = [1, 1]} : vector<16x4xf32> to vector<8x4xf32>
    %215 = arith.truncf %214 : vector<8x4xf32> to vector<8x4xbf16>
    %cst_139 = arith.constant dense<0.000000e+00> : vector<8x8xf32>
    %216 = tpu.matmul %211, %213, %cst_139 {dimension_numbers = #tpu.dot_dimension_numbers<[1], [1], [0], [0], [0, 0, 1, 0], [], []>} : vector<8x4xbf16>, vector<8x4xbf16>, vector<8x8xf32> -> vector<8x8xf32>
    %cst_140 = arith.constant dense<0xFF800000> : vector<8xf32>
    %217 = vector.multi_reduction <maximumf>, %216, %cst_140 [1] : vector<8x8xf32> to vector<8xf32>
    %218 = vector.shape_cast %217 : vector<8xf32> to vector<8x1xf32>
    %219 = vector.broadcast %218 : vector<8x1xf32> to vector<8x8xf32>
    %220 = arith.subf %216, %219 : vector<8x8xf32>
    %221 = math.exp %220 : vector<8x8xf32>
    %cst_141 = arith.constant dense<0.000000e+00> : vector<8xf32>
    %222 = vector.multi_reduction <add>, %221, %cst_141 [1] : vector<8x8xf32> to vector<8xf32>
    %223 = vector.shape_cast %222 : vector<8xf32> to vector<8x1xf32>
    %224 = tpu.reciprocal %223 {approx = true} : vector<8x1xf32> -> vector<8x1xf32>
    %225 = vector.broadcast %224 : vector<8x1xf32> to vector<8x8xf32>
    %226 = arith.mulf %221, %225 : vector<8x8xf32>
    %227 = arith.truncf %226 : vector<8x8xf32> to vector<8x8xbf16>
    %cst_142 = arith.constant dense<0.000000e+00> : vector<8x4xf32>
    %228 = tpu.matmul %227, %215, %cst_142 {dimension_numbers = #tpu.dot_dimension_numbers<[1], [0], [0], [1], [0, 0, 1, 1], [], []>} : vector<8x8xbf16>, vector<8x4xbf16>, vector<8x4xf32> -> vector<8x4xf32>
    %229 = tpu.concatenate %209, %228 in 0 : vector<8x4xf32>, vector<8x4xf32> -> vector<16x4xf32>
    %230 = arith.truncf %229 : vector<16x4xf32> to vector<16x4xbf16>
    %c0_143 = arith.constant 0 : index
    %c2_144 = arith.constant 2 : index
    %c0_145 = arith.constant 0 : index
    %c0_146 = arith.constant 0 : index
    %231 = vector.load %arg16[%c0_143, %c2_144, %c0_145, %c0_146] : memref<1x4x4x16xbf16, #tpu.memory_space<vmem>>, vector<1x1x4x16xbf16>
    %232 = vector.shape_cast %231 : vector<1x1x4x16xbf16> to vector<4x16xbf16>
    %cst_147 = arith.constant dense<0.000000e+00> : vector<16x16xf32>
    %233 = tpu.matmul %230, %232, %cst_147 {dimension_numbers = #tpu.dot_dimension_numbers<[1], [0], [0], [1], [0, 0, 1, 1], [], []>} : vector<16x4xbf16>, vector<4x16xbf16>, vector<16x16xf32> -> vector<16x16xf32>
    %234 = arith.addf %169, %233 : vector<16x16xf32>
    %c0_148 = arith.constant 0 : index
    %c3 = arith.constant 3 : index
    %c0_149 = arith.constant 0 : index
    %c0_150 = arith.constant 0 : index
    %235 = vector.load %arg10[%c0_148, %c3, %c0_149, %c0_150] : memref<1x4x16x4xbf16, #tpu.memory_space<vmem>>, vector<1x1x16x4xbf16>
    %236 = vector.shape_cast %235 : vector<1x1x16x4xbf16> to vector<16x4xbf16>
    %cst_151 = arith.constant dense<0.000000e+00> : vector<16x4xf32>
    %237 = tpu.matmul %35, %236, %cst_151 {dimension_numbers = #tpu.dot_dimension_numbers<[1], [0], [0], [1], [0, 0, 1, 1], [], []>} : vector<16x16xbf16>, vector<16x4xbf16>, vector<16x4xf32> -> vector<16x4xf32>
    %c0_152 = arith.constant 0 : index
    %c3_153 = arith.constant 3 : index
    %c0_154 = arith.constant 0 : index
    %c0_155 = arith.constant 0 : index
    %238 = vector.load %arg11[%c0_152, %c3_153, %c0_154, %c0_155] : memref<1x4x1x4xf32, #tpu.memory_space<vmem>>, vector<1x1x1x4xf32>
    %239 = vector.shape_cast %238 : vector<1x1x1x4xf32> to vector<1x4xf32>
    %240 = vector.broadcast %239 : vector<1x4xf32> to vector<16x4xf32>
    %241 = arith.addf %237, %240 : vector<16x4xf32>
    %c0_156 = arith.constant 0 : index
    %c3_157 = arith.constant 3 : index
    %c0_158 = arith.constant 0 : index
    %c0_159 = arith.constant 0 : index
    %242 = vector.load %arg12[%c0_156, %c3_157, %c0_158, %c0_159] : memref<1x4x16x4xbf16, #tpu.memory_space<vmem>>, vector<1x1x16x4xbf16>
    %243 = vector.shape_cast %242 : vector<1x1x16x4xbf16> to vector<16x4xbf16>
    %cst_160 = arith.constant dense<0.000000e+00> : vector<16x4xf32>
    %244 = tpu.matmul %35, %243, %cst_160 {dimension_numbers = #tpu.dot_dimension_numbers<[1], [0], [0], [1], [0, 0, 1, 1], [], []>} : vector<16x16xbf16>, vector<16x4xbf16>, vector<16x4xf32> -> vector<16x4xf32>
    %c0_161 = arith.constant 0 : index
    %c3_162 = arith.constant 3 : index
    %c0_163 = arith.constant 0 : index
    %c0_164 = arith.constant 0 : index
    %245 = vector.load %arg13[%c0_161, %c3_162, %c0_163, %c0_164] : memref<1x4x1x4xf32, #tpu.memory_space<vmem>>, vector<1x1x1x4xf32>
    %246 = vector.shape_cast %245 : vector<1x1x1x4xf32> to vector<1x4xf32>
    %247 = vector.broadcast %246 : vector<1x4xf32> to vector<16x4xf32>
    %248 = arith.addf %244, %247 : vector<16x4xf32>
    %c0_165 = arith.constant 0 : index
    %c3_166 = arith.constant 3 : index
    %c0_167 = arith.constant 0 : index
    %c0_168 = arith.constant 0 : index
    %249 = vector.load %arg14[%c0_165, %c3_166, %c0_167, %c0_168] : memref<1x4x32x4xbf16, #tpu.memory_space<vmem>>, vector<1x1x32x4xbf16>
    %250 = vector.shape_cast %249 : vector<1x1x32x4xbf16> to vector<32x4xbf16>
    %cst_169 = arith.constant dense<0.000000e+00> : vector<16x4xf32>
    %251 = tpu.matmul %4, %250, %cst_169 {dimension_numbers = #tpu.dot_dimension_numbers<[1], [0], [0], [1], [0, 0, 1, 1], [], []>} : vector<16x32xbf16>, vector<32x4xbf16>, vector<16x4xf32> -> vector<16x4xf32>
    %c0_170 = arith.constant 0 : index
    %c3_171 = arith.constant 3 : index
    %c0_172 = arith.constant 0 : index
    %c0_173 = arith.constant 0 : index
    %252 = vector.load %arg15[%c0_170, %c3_171, %c0_172, %c0_173] : memref<1x4x1x4xf32, #tpu.memory_space<vmem>>, vector<1x1x1x4xf32>
    %253 = vector.shape_cast %252 : vector<1x1x1x4xf32> to vector<1x4xf32>
    %254 = vector.broadcast %253 : vector<1x4xf32> to vector<16x4xf32>
    %255 = arith.addf %251, %254 : vector<16x4xf32>
    %256 = vector.extract_strided_slice %241 {offsets = [0, 0], sizes = [8, 4], strides = [1, 1]} : vector<16x4xf32> to vector<8x4xf32>
    %257 = arith.truncf %256 : vector<8x4xf32> to vector<8x4xbf16>
    %258 = vector.extract_strided_slice %248 {offsets = [0, 0], sizes = [8, 4], strides = [1, 1]} : vector<16x4xf32> to vector<8x4xf32>
    %259 = arith.truncf %258 : vector<8x4xf32> to vector<8x4xbf16>
    %260 = vector.extract_strided_slice %255 {offsets = [0, 0], sizes = [8, 4], strides = [1, 1]} : vector<16x4xf32> to vector<8x4xf32>
    %261 = arith.truncf %260 : vector<8x4xf32> to vector<8x4xbf16>
    %cst_174 = arith.constant dense<0.000000e+00> : vector<8x8xf32>
    %262 = tpu.matmul %257, %259, %cst_174 {dimension_numbers = #tpu.dot_dimension_numbers<[1], [1], [0], [0], [0, 0, 1, 0], [], []>} : vector<8x4xbf16>, vector<8x4xbf16>, vector<8x8xf32> -> vector<8x8xf32>
    %cst_175 = arith.constant dense<0xFF800000> : vector<8xf32>
    %263 = vector.multi_reduction <maximumf>, %262, %cst_175 [1] : vector<8x8xf32> to vector<8xf32>
    %264 = vector.shape_cast %263 : vector<8xf32> to vector<8x1xf32>
    %265 = vector.broadcast %264 : vector<8x1xf32> to vector<8x8xf32>
    %266 = arith.subf %262, %265 : vector<8x8xf32>
    %267 = math.exp %266 : vector<8x8xf32>
    %cst_176 = arith.constant dense<0.000000e+00> : vector<8xf32>
    %268 = vector.multi_reduction <add>, %267, %cst_176 [1] : vector<8x8xf32> to vector<8xf32>
    %269 = vector.shape_cast %268 : vector<8xf32> to vector<8x1xf32>
    %270 = tpu.reciprocal %269 {approx = true} : vector<8x1xf32> -> vector<8x1xf32>
    %271 = vector.broadcast %270 : vector<8x1xf32> to vector<8x8xf32>
    %272 = arith.mulf %267, %271 : vector<8x8xf32>
    %273 = arith.truncf %272 : vector<8x8xf32> to vector<8x8xbf16>
    %cst_177 = arith.constant dense<0.000000e+00> : vector<8x4xf32>
    %274 = tpu.matmul %273, %261, %cst_177 {dimension_numbers = #tpu.dot_dimension_numbers<[1], [0], [0], [1], [0, 0, 1, 1], [], []>} : vector<8x8xbf16>, vector<8x4xbf16>, vector<8x4xf32> -> vector<8x4xf32>
    %275 = vector.extract_strided_slice %241 {offsets = [8, 0], sizes = [8, 4], strides = [1, 1]} : vector<16x4xf32> to vector<8x4xf32>
    %276 = arith.truncf %275 : vector<8x4xf32> to vector<8x4xbf16>
    %277 = vector.extract_strided_slice %248 {offsets = [8, 0], sizes = [8, 4], strides = [1, 1]} : vector<16x4xf32> to vector<8x4xf32>
    %278 = arith.truncf %277 : vector<8x4xf32> to vector<8x4xbf16>
    %279 = vector.extract_strided_slice %255 {offsets = [8, 0], sizes = [8, 4], strides = [1, 1]} : vector<16x4xf32> to vector<8x4xf32>
    %280 = arith.truncf %279 : vector<8x4xf32> to vector<8x4xbf16>
    %cst_178 = arith.constant dense<0.000000e+00> : vector<8x8xf32>
    %281 = tpu.matmul %276, %278, %cst_178 {dimension_numbers = #tpu.dot_dimension_numbers<[1], [1], [0], [0], [0, 0, 1, 0], [], []>} : vector<8x4xbf16>, vector<8x4xbf16>, vector<8x8xf32> -> vector<8x8xf32>
    %cst_179 = arith.constant dense<0xFF800000> : vector<8xf32>
    %282 = vector.multi_reduction <maximumf>, %281, %cst_179 [1] : vector<8x8xf32> to vector<8xf32>
    %283 = vector.shape_cast %282 : vector<8xf32> to vector<8x1xf32>
    %284 = vector.broadcast %283 : vector<8x1xf32> to vector<8x8xf32>
    %285 = arith.subf %281, %284 : vector<8x8xf32>
    %286 = math.exp %285 : vector<8x8xf32>
    %cst_180 = arith.constant dense<0.000000e+00> : vector<8xf32>
    %287 = vector.multi_reduction <add>, %286, %cst_180 [1] : vector<8x8xf32> to vector<8xf32>
    %288 = vector.shape_cast %287 : vector<8xf32> to vector<8x1xf32>
    %289 = tpu.reciprocal %288 {approx = true} : vector<8x1xf32> -> vector<8x1xf32>
    %290 = vector.broadcast %289 : vector<8x1xf32> to vector<8x8xf32>
    %291 = arith.mulf %286, %290 : vector<8x8xf32>
    %292 = arith.truncf %291 : vector<8x8xf32> to vector<8x8xbf16>
    %cst_181 = arith.constant dense<0.000000e+00> : vector<8x4xf32>
    %293 = tpu.matmul %292, %280, %cst_181 {dimension_numbers = #tpu.dot_dimension_numbers<[1], [0], [0], [1], [0, 0, 1, 1], [], []>} : vector<8x8xbf16>, vector<8x4xbf16>, vector<8x4xf32> -> vector<8x4xf32>
    %294 = tpu.concatenate %274, %293 in 0 : vector<8x4xf32>, vector<8x4xf32> -> vector<16x4xf32>
    %295 = arith.truncf %294 : vector<16x4xf32> to vector<16x4xbf16>
    %c0_182 = arith.constant 0 : index
    %c3_183 = arith.constant 3 : index
    %c0_184 = arith.constant 0 : index
    %c0_185 = arith.constant 0 : index
    %296 = vector.load %arg16[%c0_182, %c3_183, %c0_184, %c0_185] : memref<1x4x4x16xbf16, #tpu.memory_space<vmem>>, vector<1x1x4x16xbf16>
    %297 = vector.shape_cast %296 : vector<1x1x4x16xbf16> to vector<4x16xbf16>
    %cst_186 = arith.constant dense<0.000000e+00> : vector<16x16xf32>
    %298 = tpu.matmul %295, %297, %cst_186 {dimension_numbers = #tpu.dot_dimension_numbers<[1], [0], [0], [1], [0, 0, 1, 1], [], []>} : vector<16x4xbf16>, vector<4x16xbf16>, vector<16x16xf32> -> vector<16x16xf32>
    %299 = arith.addf %234, %298 : vector<16x16xf32>
    %c0_187 = arith.constant 0 : index
    %c0_188 = arith.constant 0 : index
    %c0_189 = arith.constant 0 : index
    %300 = vector.load %arg18[%c0_187, %c0_188, %c0_189] : memref<1x1x16xf32, #tpu.memory_space<vmem>>, vector<1x1x16xf32>
    %301 = vector.shape_cast %300 : vector<1x1x16xf32> to vector<1x16xf32>
    %302 = vector.broadcast %301 : vector<1x16xf32> to vector<16x16xf32>
    %303 = arith.mulf %299, %302 : vector<16x16xf32>
    %c0_190 = arith.constant 0 : index
    %c0_191 = arith.constant 0 : index
    %c0_192 = arith.constant 0 : index
    %304 = vector.load %arg19[%c0_190, %c0_191, %c0_192] : memref<1x1x16xf32, #tpu.memory_space<vmem>>, vector<1x1x16xf32>
    %305 = vector.shape_cast %304 : vector<1x1x16xf32> to vector<1x16xf32>
    %306 = vector.broadcast %305 : vector<1x16xf32> to vector<16x16xf32>
    %307 = arith.addf %303, %306 : vector<16x16xf32>
    %308 = arith.truncf %307 : vector<16x16xf32> to vector<16x16xbf16>
    %c0_193 = arith.constant 0 : index
    %c0_194 = arith.constant 0 : index
    %c0_195 = arith.constant 0 : index
    %c0_196 = arith.constant 0 : index
    %309 = vector.load %arg20[%c0_193, %c0_194, %c0_195, %c0_196] : memref<1x4x16x32xbf16, #tpu.memory_space<vmem>>, vector<1x1x16x32xbf16>
    %310 = vector.shape_cast %309 : vector<1x1x16x32xbf16> to vector<16x32xbf16>
    %cst_197 = arith.constant dense<0.000000e+00> : vector<16x32xf32>
    %311 = tpu.matmul %308, %310, %cst_197 {dimension_numbers = #tpu.dot_dimension_numbers<[1], [0], [0], [1], [0, 0, 1, 1], [], []>} : vector<16x16xbf16>, vector<16x32xbf16>, vector<16x32xf32> -> vector<16x32xf32>
    %c0_198 = arith.constant 0 : index
    %c0_199 = arith.constant 0 : index
    %c0_200 = arith.constant 0 : index
    %c0_201 = arith.constant 0 : index
    %312 = vector.load %arg21[%c0_198, %c0_199, %c0_200, %c0_201] : memref<1x4x1x32xf32, #tpu.memory_space<vmem>>, vector<1x1x1x32xf32>
    %313 = vector.shape_cast %312 : vector<1x1x1x32xf32> to vector<1x32xf32>
    %314 = vector.broadcast %313 : vector<1x32xf32> to vector<16x32xf32>
    %315 = arith.addf %311, %314 : vector<16x32xf32>
    %cst_202 = arith.constant 0.000000e+00 : f32
    %316 = vector.broadcast %cst_202 : f32 to vector<16x32xf32>
    %317 = arith.maximumf %315, %316 : vector<16x32xf32>
    %318 = arith.truncf %317 : vector<16x32xf32> to vector<16x32xbf16>
    %c0_203 = arith.constant 0 : index
    %c0_204 = arith.constant 0 : index
    %c0_205 = arith.constant 0 : index
    %c0_206 = arith.constant 0 : index
    %319 = vector.load %arg22[%c0_203, %c0_204, %c0_205, %c0_206] : memref<1x4x32x16xbf16, #tpu.memory_space<vmem>>, vector<1x1x32x16xbf16>
    %320 = vector.shape_cast %319 : vector<1x1x32x16xbf16> to vector<32x16xbf16>
    %cst_207 = arith.constant dense<0.000000e+00> : vector<16x16xf32>
    %321 = tpu.matmul %318, %320, %cst_207 {dimension_numbers = #tpu.dot_dimension_numbers<[1], [0], [0], [1], [0, 0, 1, 1], [], []>} : vector<16x32xbf16>, vector<32x16xbf16>, vector<16x16xf32> -> vector<16x16xf32>
    %c0_208 = arith.constant 0 : index
    %c0_209 = arith.constant 0 : index
    %c0_210 = arith.constant 0 : index
    %c0_211 = arith.constant 0 : index
    %322 = vector.load %arg23[%c0_208, %c0_209, %c0_210, %c0_211] : memref<1x4x1x16xf32, #tpu.memory_space<vmem>>, vector<1x1x1x16xf32>
    %323 = vector.shape_cast %322 : vector<1x1x1x16xf32> to vector<1x16xf32>
    %324 = vector.broadcast %323 : vector<1x16xf32> to vector<16x16xf32>
    %325 = arith.addf %321, %324 : vector<16x16xf32>
    %326 = arith.addf %325, %307 : vector<16x16xf32>
    %c0_212 = arith.constant 0 : index
    %c0_213 = arith.constant 0 : index
    %c0_214 = arith.constant 0 : index
    %c0_215 = arith.constant 0 : index
    %327 = vector.load %arg24[%c0_212, %c0_213, %c0_214, %c0_215] : memref<1x4x1x16xf32, #tpu.memory_space<vmem>>, vector<1x1x1x16xf32>
    %328 = vector.shape_cast %327 : vector<1x1x1x16xf32> to vector<1x16xf32>
    %329 = vector.broadcast %328 : vector<1x16xf32> to vector<16x16xf32>
    %330 = arith.mulf %326, %329 : vector<16x16xf32>
    %c0_216 = arith.constant 0 : index
    %c0_217 = arith.constant 0 : index
    %c0_218 = arith.constant 0 : index
    %c0_219 = arith.constant 0 : index
    %331 = vector.load %arg25[%c0_216, %c0_217, %c0_218, %c0_219] : memref<1x4x1x16xf32, #tpu.memory_space<vmem>>, vector<1x1x1x16xf32>
    %332 = vector.shape_cast %331 : vector<1x1x1x16xf32> to vector<1x16xf32>
    %333 = vector.broadcast %332 : vector<1x16xf32> to vector<16x16xf32>
    %334 = arith.addf %330, %333 : vector<16x16xf32>
    %335 = arith.truncf %334 : vector<16x16xf32> to vector<16x16xbf16>
    %c0_220 = arith.constant 0 : index
    %c1_221 = arith.constant 1 : index
    %c0_222 = arith.constant 0 : index
    %c0_223 = arith.constant 0 : index
    %336 = vector.load %arg20[%c0_220, %c1_221, %c0_222, %c0_223] : memref<1x4x16x32xbf16, #tpu.memory_space<vmem>>, vector<1x1x16x32xbf16>
    %337 = vector.shape_cast %336 : vector<1x1x16x32xbf16> to vector<16x32xbf16>
    %cst_224 = arith.constant dense<0.000000e+00> : vector<16x32xf32>
    %338 = tpu.matmul %335, %337, %cst_224 {dimension_numbers = #tpu.dot_dimension_numbers<[1], [0], [0], [1], [0, 0, 1, 1], [], []>} : vector<16x16xbf16>, vector<16x32xbf16>, vector<16x32xf32> -> vector<16x32xf32>
    %c0_225 = arith.constant 0 : index
    %c1_226 = arith.constant 1 : index
    %c0_227 = arith.constant 0 : index
    %c0_228 = arith.constant 0 : index
    %339 = vector.load %arg21[%c0_225, %c1_226, %c0_227, %c0_228] : memref<1x4x1x32xf32, #tpu.memory_space<vmem>>, vector<1x1x1x32xf32>
    %340 = vector.shape_cast %339 : vector<1x1x1x32xf32> to vector<1x32xf32>
    %341 = vector.broadcast %340 : vector<1x32xf32> to vector<16x32xf32>
    %342 = arith.addf %338, %341 : vector<16x32xf32>
    %cst_229 = arith.constant 0.000000e+00 : f32
    %343 = vector.broadcast %cst_229 : f32 to vector<16x32xf32>
    %344 = arith.maximumf %342, %343 : vector<16x32xf32>
    %345 = arith.truncf %344 : vector<16x32xf32> to vector<16x32xbf16>
    %c0_230 = arith.constant 0 : index
    %c1_231 = arith.constant 1 : index
    %c0_232 = arith.constant 0 : index
    %c0_233 = arith.constant 0 : index
    %346 = vector.load %arg22[%c0_230, %c1_231, %c0_232, %c0_233] : memref<1x4x32x16xbf16, #tpu.memory_space<vmem>>, vector<1x1x32x16xbf16>
    %347 = vector.shape_cast %346 : vector<1x1x32x16xbf16> to vector<32x16xbf16>
    %cst_234 = arith.constant dense<0.000000e+00> : vector<16x16xf32>
    %348 = tpu.matmul %345, %347, %cst_234 {dimension_numbers = #tpu.dot_dimension_numbers<[1], [0], [0], [1], [0, 0, 1, 1], [], []>} : vector<16x32xbf16>, vector<32x16xbf16>, vector<16x16xf32> -> vector<16x16xf32>
    %c0_235 = arith.constant 0 : index
    %c1_236 = arith.constant 1 : index
    %c0_237 = arith.constant 0 : index
    %c0_238 = arith.constant 0 : index
    %349 = vector.load %arg23[%c0_235, %c1_236, %c0_237, %c0_238] : memref<1x4x1x16xf32, #tpu.memory_space<vmem>>, vector<1x1x1x16xf32>
    %350 = vector.shape_cast %349 : vector<1x1x1x16xf32> to vector<1x16xf32>
    %351 = vector.broadcast %350 : vector<1x16xf32> to vector<16x16xf32>
    %352 = arith.addf %348, %351 : vector<16x16xf32>
    %353 = arith.addf %352, %334 : vector<16x16xf32>
    %c0_239 = arith.constant 0 : index
    %c1_240 = arith.constant 1 : index
    %c0_241 = arith.constant 0 : index
    %c0_242 = arith.constant 0 : index
    %354 = vector.load %arg24[%c0_239, %c1_240, %c0_241, %c0_242] : memref<1x4x1x16xf32, #tpu.memory_space<vmem>>, vector<1x1x1x16xf32>
    %355 = vector.shape_cast %354 : vector<1x1x1x16xf32> to vector<1x16xf32>
    %356 = vector.broadcast %355 : vector<1x16xf32> to vector<16x16xf32>
    %357 = arith.mulf %353, %356 : vector<16x16xf32>
    %c0_243 = arith.constant 0 : index
    %c1_244 = arith.constant 1 : index
    %c0_245 = arith.constant 0 : index
    %c0_246 = arith.constant 0 : index
    %358 = vector.load %arg25[%c0_243, %c1_244, %c0_245, %c0_246] : memref<1x4x1x16xf32, #tpu.memory_space<vmem>>, vector<1x1x1x16xf32>
    %359 = vector.shape_cast %358 : vector<1x1x1x16xf32> to vector<1x16xf32>
    %360 = vector.broadcast %359 : vector<1x16xf32> to vector<16x16xf32>
    %361 = arith.addf %357, %360 : vector<16x16xf32>
    %362 = arith.truncf %361 : vector<16x16xf32> to vector<16x16xbf16>
    %c0_247 = arith.constant 0 : index
    %c2_248 = arith.constant 2 : index
    %c0_249 = arith.constant 0 : index
    %c0_250 = arith.constant 0 : index
    %363 = vector.load %arg20[%c0_247, %c2_248, %c0_249, %c0_250] : memref<1x4x16x32xbf16, #tpu.memory_space<vmem>>, vector<1x1x16x32xbf16>
    %364 = vector.shape_cast %363 : vector<1x1x16x32xbf16> to vector<16x32xbf16>
    %cst_251 = arith.constant dense<0.000000e+00> : vector<16x32xf32>
    %365 = tpu.matmul %362, %364, %cst_251 {dimension_numbers = #tpu.dot_dimension_numbers<[1], [0], [0], [1], [0, 0, 1, 1], [], []>} : vector<16x16xbf16>, vector<16x32xbf16>, vector<16x32xf32> -> vector<16x32xf32>
    %c0_252 = arith.constant 0 : index
    %c2_253 = arith.constant 2 : index
    %c0_254 = arith.constant 0 : index
    %c0_255 = arith.constant 0 : index
    %366 = vector.load %arg21[%c0_252, %c2_253, %c0_254, %c0_255] : memref<1x4x1x32xf32, #tpu.memory_space<vmem>>, vector<1x1x1x32xf32>
    %367 = vector.shape_cast %366 : vector<1x1x1x32xf32> to vector<1x32xf32>
    %368 = vector.broadcast %367 : vector<1x32xf32> to vector<16x32xf32>
    %369 = arith.addf %365, %368 : vector<16x32xf32>
    %cst_256 = arith.constant 0.000000e+00 : f32
    %370 = vector.broadcast %cst_256 : f32 to vector<16x32xf32>
    %371 = arith.maximumf %369, %370 : vector<16x32xf32>
    %372 = arith.truncf %371 : vector<16x32xf32> to vector<16x32xbf16>
    %c0_257 = arith.constant 0 : index
    %c2_258 = arith.constant 2 : index
    %c0_259 = arith.constant 0 : index
    %c0_260 = arith.constant 0 : index
    %373 = vector.load %arg22[%c0_257, %c2_258, %c0_259, %c0_260] : memref<1x4x32x16xbf16, #tpu.memory_space<vmem>>, vector<1x1x32x16xbf16>
    %374 = vector.shape_cast %373 : vector<1x1x32x16xbf16> to vector<32x16xbf16>
    %cst_261 = arith.constant dense<0.000000e+00> : vector<16x16xf32>
    %375 = tpu.matmul %372, %374, %cst_261 {dimension_numbers = #tpu.dot_dimension_numbers<[1], [0], [0], [1], [0, 0, 1, 1], [], []>} : vector<16x32xbf16>, vector<32x16xbf16>, vector<16x16xf32> -> vector<16x16xf32>
    %c0_262 = arith.constant 0 : index
    %c2_263 = arith.constant 2 : index
    %c0_264 = arith.constant 0 : index
    %c0_265 = arith.constant 0 : index
    %376 = vector.load %arg23[%c0_262, %c2_263, %c0_264, %c0_265] : memref<1x4x1x16xf32, #tpu.memory_space<vmem>>, vector<1x1x1x16xf32>
    %377 = vector.shape_cast %376 : vector<1x1x1x16xf32> to vector<1x16xf32>
    %378 = vector.broadcast %377 : vector<1x16xf32> to vector<16x16xf32>
    %379 = arith.addf %375, %378 : vector<16x16xf32>
    %380 = arith.addf %379, %361 : vector<16x16xf32>
    %c0_266 = arith.constant 0 : index
    %c2_267 = arith.constant 2 : index
    %c0_268 = arith.constant 0 : index
    %c0_269 = arith.constant 0 : index
    %381 = vector.load %arg24[%c0_266, %c2_267, %c0_268, %c0_269] : memref<1x4x1x16xf32, #tpu.memory_space<vmem>>, vector<1x1x1x16xf32>
    %382 = vector.shape_cast %381 : vector<1x1x1x16xf32> to vector<1x16xf32>
    %383 = vector.broadcast %382 : vector<1x16xf32> to vector<16x16xf32>
    %384 = arith.mulf %380, %383 : vector<16x16xf32>
    %c0_270 = arith.constant 0 : index
    %c2_271 = arith.constant 2 : index
    %c0_272 = arith.constant 0 : index
    %c0_273 = arith.constant 0 : index
    %385 = vector.load %arg25[%c0_270, %c2_271, %c0_272, %c0_273] : memref<1x4x1x16xf32, #tpu.memory_space<vmem>>, vector<1x1x1x16xf32>
    %386 = vector.shape_cast %385 : vector<1x1x1x16xf32> to vector<1x16xf32>
    %387 = vector.broadcast %386 : vector<1x16xf32> to vector<16x16xf32>
    %388 = arith.addf %384, %387 : vector<16x16xf32>
    %389 = arith.truncf %388 : vector<16x16xf32> to vector<16x16xbf16>
    %c0_274 = arith.constant 0 : index
    %c3_275 = arith.constant 3 : index
    %c0_276 = arith.constant 0 : index
    %c0_277 = arith.constant 0 : index
    %390 = vector.load %arg20[%c0_274, %c3_275, %c0_276, %c0_277] : memref<1x4x16x32xbf16, #tpu.memory_space<vmem>>, vector<1x1x16x32xbf16>
    %391 = vector.shape_cast %390 : vector<1x1x16x32xbf16> to vector<16x32xbf16>
    %cst_278 = arith.constant dense<0.000000e+00> : vector<16x32xf32>
    %392 = tpu.matmul %389, %391, %cst_278 {dimension_numbers = #tpu.dot_dimension_numbers<[1], [0], [0], [1], [0, 0, 1, 1], [], []>} : vector<16x16xbf16>, vector<16x32xbf16>, vector<16x32xf32> -> vector<16x32xf32>
    %c0_279 = arith.constant 0 : index
    %c3_280 = arith.constant 3 : index
    %c0_281 = arith.constant 0 : index
    %c0_282 = arith.constant 0 : index
    %393 = vector.load %arg21[%c0_279, %c3_280, %c0_281, %c0_282] : memref<1x4x1x32xf32, #tpu.memory_space<vmem>>, vector<1x1x1x32xf32>
    %394 = vector.shape_cast %393 : vector<1x1x1x32xf32> to vector<1x32xf32>
    %395 = vector.broadcast %394 : vector<1x32xf32> to vector<16x32xf32>
    %396 = arith.addf %392, %395 : vector<16x32xf32>
    %cst_283 = arith.constant 0.000000e+00 : f32
    %397 = vector.broadcast %cst_283 : f32 to vector<16x32xf32>
    %398 = arith.maximumf %396, %397 : vector<16x32xf32>
    %399 = arith.truncf %398 : vector<16x32xf32> to vector<16x32xbf16>
    %c0_284 = arith.constant 0 : index
    %c3_285 = arith.constant 3 : index
    %c0_286 = arith.constant 0 : index
    %c0_287 = arith.constant 0 : index
    %400 = vector.load %arg22[%c0_284, %c3_285, %c0_286, %c0_287] : memref<1x4x32x16xbf16, #tpu.memory_space<vmem>>, vector<1x1x32x16xbf16>
    %401 = vector.shape_cast %400 : vector<1x1x32x16xbf16> to vector<32x16xbf16>
    %cst_288 = arith.constant dense<0.000000e+00> : vector<16x16xf32>
    %402 = tpu.matmul %399, %401, %cst_288 {dimension_numbers = #tpu.dot_dimension_numbers<[1], [0], [0], [1], [0, 0, 1, 1], [], []>} : vector<16x32xbf16>, vector<32x16xbf16>, vector<16x16xf32> -> vector<16x16xf32>
    %c0_289 = arith.constant 0 : index
    %c3_290 = arith.constant 3 : index
    %c0_291 = arith.constant 0 : index
    %c0_292 = arith.constant 0 : index
    %403 = vector.load %arg23[%c0_289, %c3_290, %c0_291, %c0_292] : memref<1x4x1x16xf32, #tpu.memory_space<vmem>>, vector<1x1x1x16xf32>
    %404 = vector.shape_cast %403 : vector<1x1x1x16xf32> to vector<1x16xf32>
    %405 = vector.broadcast %404 : vector<1x16xf32> to vector<16x16xf32>
    %406 = arith.addf %402, %405 : vector<16x16xf32>
    %407 = arith.addf %406, %388 : vector<16x16xf32>
    %c0_293 = arith.constant 0 : index
    %c3_294 = arith.constant 3 : index
    %c0_295 = arith.constant 0 : index
    %c0_296 = arith.constant 0 : index
    %408 = vector.load %arg24[%c0_293, %c3_294, %c0_295, %c0_296] : memref<1x4x1x16xf32, #tpu.memory_space<vmem>>, vector<1x1x1x16xf32>
    %409 = vector.shape_cast %408 : vector<1x1x1x16xf32> to vector<1x16xf32>
    %410 = vector.broadcast %409 : vector<1x16xf32> to vector<16x16xf32>
    %411 = arith.mulf %407, %410 : vector<16x16xf32>
    %c0_297 = arith.constant 0 : index
    %c3_298 = arith.constant 3 : index
    %c0_299 = arith.constant 0 : index
    %c0_300 = arith.constant 0 : index
    %412 = vector.load %arg25[%c0_297, %c3_298, %c0_299, %c0_300] : memref<1x4x1x16xf32, #tpu.memory_space<vmem>>, vector<1x1x1x16xf32>
    %413 = vector.shape_cast %412 : vector<1x1x1x16xf32> to vector<1x16xf32>
    %414 = vector.broadcast %413 : vector<1x16xf32> to vector<16x16xf32>
    %415 = arith.addf %411, %414 : vector<16x16xf32>
    %416 = arith.truncf %415 : vector<16x16xf32> to vector<16x16xbf16>
    %c0_301 = arith.constant 0 : index
    %c0_302 = arith.constant 0 : index
    %c0_303 = arith.constant 0 : index
    %417 = vector.load %arg26[%c0_301, %c0_302, %c0_303] : memref<1x16x32xbf16, #tpu.memory_space<vmem>>, vector<1x16x32xbf16>
    %418 = vector.shape_cast %417 : vector<1x16x32xbf16> to vector<16x32xbf16>
    %cst_304 = arith.constant dense<0.000000e+00> : vector<16x32xf32>
    %419 = tpu.matmul %416, %418, %cst_304 {dimension_numbers = #tpu.dot_dimension_numbers<[1], [0], [0], [1], [0, 0, 1, 1], [], []>} : vector<16x16xbf16>, vector<16x32xbf16>, vector<16x32xf32> -> vector<16x32xf32>
    %c0_305 = arith.constant 0 : index
    %c0_306 = arith.constant 0 : index
    %c0_307 = arith.constant 0 : index
    %420 = vector.load %arg27[%c0_305, %c0_306, %c0_307] : memref<1x1x32xf32, #tpu.memory_space<vmem>>, vector<1x1x32xf32>
    %421 = vector.shape_cast %420 : vector<1x1x32xf32> to vector<1x32xf32>
    %422 = vector.broadcast %421 : vector<1x32xf32> to vector<16x32xf32>
    %423 = arith.addf %419, %422 : vector<16x32xf32>
    %424 = arith.addf %423, %3 : vector<16x32xf32>
    %c0_308 = arith.constant 0 : index
    %c0_309 = arith.constant 0 : index
    %c0_310 = arith.constant 0 : index
    %425 = vector.load %arg28[%c0_308, %c0_309, %c0_310] : memref<1x1x32xf32, #tpu.memory_space<vmem>>, vector<1x1x32xf32>
    %426 = vector.shape_cast %425 : vector<1x1x32xf32> to vector<1x32xf32>
    %427 = vector.broadcast %426 : vector<1x32xf32> to vector<16x32xf32>
    %428 = arith.mulf %424, %427 : vector<16x32xf32>
    %c0_311 = arith.constant 0 : index
    %c0_312 = arith.constant 0 : index
    %c0_313 = arith.constant 0 : index
    %429 = vector.load %arg29[%c0_311, %c0_312, %c0_313] : memref<1x1x32xf32, #tpu.memory_space<vmem>>, vector<1x1x32xf32>
    %430 = vector.shape_cast %429 : vector<1x1x32xf32> to vector<1x32xf32>
    %431 = vector.broadcast %430 : vector<1x32xf32> to vector<16x32xf32>
    %432 = arith.addf %428, %431 : vector<16x32xf32>
    %c0_314 = arith.constant 0 : index
    %c0_315 = arith.constant 0 : index
    %433 = vector.load %arg31[%c0_314, %c0_315] : memref<16x32xf32, #tpu.memory_space<vmem>>, vector<16x32xf32>
    tpu.vector_store %arg31[%c0_314, %c0_315], %432 {strides = array<i32>} : memref<16x32xf32, #tpu.memory_space<vmem>>, vector<16x32xf32>,
    %c0_316 = arith.constant 0 : index
    %c0_317 = arith.constant 0 : index
    %434 = vector.load %arg30[%c0_316, %c0_317] : memref<16x32xf32, #tpu.memory_space<vmem>>, vector<16x32xf32>
    tpu.vector_store %arg30[%c0_316, %c0_317], %432 {strides = array<i32>} : memref<16x32xf32, #tpu.memory_space<vmem>>, vector<16x32xf32>,
    return
  }
  func.func @transform_0(%arg0: i32) -> (i32, i32) {
    %c0_i32 = arith.constant 0 : i32
    %c0_i32_0 = arith.constant 0 : i32
    %c0_i32_1 = arith.constant 0 : i32
    return %c0_i32, %c0_i32_0 : i32, i32
  }
  func.func @transform_1(%arg0: i32) -> (i32, i32, i32) {
    %c0_i32 = arith.constant 0 : i32
    %c0_i32_0 = arith.constant 0 : i32
    %c0_i32_1 = arith.constant 0 : i32
    return %arg0, %c0_i32, %c0_i32_0 : i32, i32, i32
  }
  func.func @transform_2(%arg0: i32) -> (i32, i32, i32) {
    %c0_i32 = arith.constant 0 : i32
    %c0_i32_0 = arith.constant 0 : i32
    %c0_i32_1 = arith.constant 0 : i32
    return %arg0, %c0_i32, %c0_i32_0 : i32, i32, i32
  }
  func.func @transform_3(%arg0: i32) -> (i32, i32, i32) {
    %c0_i32 = arith.constant 0 : i32
    %c0_i32_0 = arith.constant 0 : i32
    %c0_i32_1 = arith.constant 0 : i32
    return %arg0, %c0_i32, %c0_i32_0 : i32, i32, i32
  }
  func.func @transform_4(%arg0: i32) -> (i32, i32, i32) {
    %c0_i32 = arith.constant 0 : i32
    %c0_i32_0 = arith.constant 0 : i32
    %c0_i32_1 = arith.constant 0 : i32
    return %arg0, %c0_i32, %c0_i32_0 : i32, i32, i32
  }
  func.func @transform_5(%arg0: i32) -> (i32, i32, i32) {
    %c0_i32 = arith.constant 0 : i32
    %c0_i32_0 = arith.constant 0 : i32
    %c0_i32_1 = arith.constant 0 : i32
    return %arg0, %c0_i32, %c0_i32_0 : i32, i32, i32
  }
  func.func @transform_6(%arg0: i32) -> (i32, i32, i32) {
    %c0_i32 = arith.constant 0 : i32
    %c0_i32_0 = arith.constant 0 : i32
    %c0_i32_1 = arith.constant 0 : i32
    return %arg0, %c0_i32, %c0_i32_0 : i32, i32, i32
  }
  func.func @transform_7(%arg0: i32) -> (i32, i32, i32) {
    %c0_i32 = arith.constant 0 : i32
    %c0_i32_0 = arith.constant 0 : i32
    %c0_i32_1 = arith.constant 0 : i32
    return %arg0, %c0_i32, %c0_i32_0 : i32, i32, i32
  }
  func.func @transform_8(%arg0: i32) -> (i32, i32, i32) {
    %c0_i32 = arith.constant 0 : i32
    %c0_i32_0 = arith.constant 0 : i32
    %c0_i32_1 = arith.constant 0 : i32
    return %arg0, %c0_i32, %c0_i32_0 : i32, i32, i32
  }
  func.func @transform_9(%arg0: i32) -> (i32, i32, i32, i32) {
    %c0_i32 = arith.constant 0 : i32
    %c0_i32_0 = arith.constant 0 : i32
    %c0_i32_1 = arith.constant 0 : i32
    %c0_i32_2 = arith.constant 0 : i32
    return %arg0, %c0_i32, %c0_i32_0, %c0_i32_1 : i32, i32, i32, i32
  }
  func.func @transform_10(%arg0: i32) -> (i32, i32, i32, i32) {
    %c0_i32 = arith.constant 0 : i32
    %c0_i32_0 = arith.constant 0 : i32
    %c0_i32_1 = arith.constant 0 : i32
    %c0_i32_2 = arith.constant 0 : i32
    return %arg0, %c0_i32, %c0_i32_0, %c0_i32_1 : i32, i32, i32, i32
  }
  func.func @transform_11(%arg0: i32) -> (i32, i32, i32, i32) {
    %c0_i32 = arith.constant 0 : i32
    %c0_i32_0 = arith.constant 0 : i32
    %c0_i32_1 = arith.constant 0 : i32
    %c0_i32_2 = arith.constant 0 : i32
    return %arg0, %c0_i32, %c0_i32_0, %c0_i32_1 : i32, i32, i32, i32
  }
  func.func @transform_12(%arg0: i32) -> (i32, i32, i32, i32) {
    %c0_i32 = arith.constant 0 : i32
    %c0_i32_0 = arith.constant 0 : i32
    %c0_i32_1 = arith.constant 0 : i32
    %c0_i32_2 = arith.constant 0 : i32
    return %arg0, %c0_i32, %c0_i32_0, %c0_i32_1 : i32, i32, i32, i32
  }
  func.func @transform_13(%arg0: i32) -> (i32, i32, i32, i32) {
    %c0_i32 = arith.constant 0 : i32
    %c0_i32_0 = arith.constant 0 : i32
    %c0_i32_1 = arith.constant 0 : i32
    %c0_i32_2 = arith.constant 0 : i32
    return %arg0, %c0_i32, %c0_i32_0, %c0_i32_1 : i32, i32, i32, i32
  }
  func.func @transform_14(%arg0: i32) -> (i32, i32, i32, i32) {
    %c0_i32 = arith.constant 0 : i32
    %c0_i32_0 = arith.constant 0 : i32
    %c0_i32_1 = arith.constant 0 : i32
    %c0_i32_2 = arith.constant 0 : i32
    return %arg0, %c0_i32, %c0_i32_0, %c0_i32_1 : i32, i32, i32, i32
  }
  func.func @transform_15(%arg0: i32) -> (i32, i32, i32, i32) {
    %c0_i32 = arith.constant 0 : i32
    %c0_i32_0 = arith.constant 0 : i32
    %c0_i32_1 = arith.constant 0 : i32
    %c0_i32_2 = arith.constant 0 : i32
    return %arg0, %c0_i32, %c0_i32_0, %c0_i32_1 : i32, i32, i32, i32
  }
  func.func @transform_16(%arg0: i32) -> (i32, i32, i32) {
    %c0_i32 = arith.constant 0 : i32
    %c0_i32_0 = arith.constant 0 : i32
    %c0_i32_1 = arith.constant 0 : i32
    return %arg0, %c0_i32, %c0_i32_0 : i32, i32, i32
  }
  func.func @transform_17(%arg0: i32) -> (i32, i32, i32) {
    %c0_i32 = arith.constant 0 : i32
    %c0_i32_0 = arith.constant 0 : i32
    %c0_i32_1 = arith.constant 0 : i32
    return %arg0, %c0_i32, %c0_i32_0 : i32, i32, i32
  }
  func.func @transform_18(%arg0: i32) -> (i32, i32, i32) {
    %c0_i32 = arith.constant 0 : i32
    %c0_i32_0 = arith.constant 0 : i32
    %c0_i32_1 = arith.constant 0 : i32
    return %arg0, %c0_i32, %c0_i32_0 : i32, i32, i32
  }
  func.func @transform_19(%arg0: i32) -> (i32, i32, i32, i32) {
    %c0_i32 = arith.constant 0 : i32
    %c0_i32_0 = arith.constant 0 : i32
    %c0_i32_1 = arith.constant 0 : i32
    %c0_i32_2 = arith.constant 0 : i32
    return %arg0, %c0_i32, %c0_i32_0, %c0_i32_1 : i32, i32, i32, i32
  }
  func.func @transform_20(%arg0: i32) -> (i32, i32, i32, i32) {
    %c0_i32 = arith.constant 0 : i32
    %c0_i32_0 = arith.constant 0 : i32
    %c0_i32_1 = arith.constant 0 : i32
    %c0_i32_2 = arith.constant 0 : i32
    return %arg0, %c0_i32, %c0_i32_0, %c0_i32_1 : i32, i32, i32, i32
  }
  func.func @transform_21(%arg0: i32) -> (i32, i32, i32, i32) {
    %c0_i32 = arith.constant 0 : i32
    %c0_i32_0 = arith.constant 0 : i32
    %c0_i32_1 = arith.constant 0 : i32
    %c0_i32_2 = arith.constant 0 : i32
    return %arg0, %c0_i32, %c0_i32_0, %c0_i32_1 : i32, i32, i32, i32
  }
  func.func @transform_22(%arg0: i32) -> (i32, i32, i32, i32) {
    %c0_i32 = arith.constant 0 : i32
    %c0_i32_0 = arith.constant 0 : i32
    %c0_i32_1 = arith.constant 0 : i32
    %c0_i32_2 = arith.constant 0 : i32
    return %arg0, %c0_i32, %c0_i32_0, %c0_i32_1 : i32, i32, i32, i32
  }
  func.func @transform_23(%arg0: i32) -> (i32, i32, i32, i32) {
    %c0_i32 = arith.constant 0 : i32
    %c0_i32_0 = arith.constant 0 : i32
    %c0_i32_1 = arith.constant 0 : i32
    %c0_i32_2 = arith.constant 0 : i32
    return %arg0, %c0_i32, %c0_i32_0, %c0_i32_1 : i32, i32, i32, i32
  }
  func.func @transform_24(%arg0: i32) -> (i32, i32, i32, i32) {
    %c0_i32 = arith.constant 0 : i32
    %c0_i32_0 = arith.constant 0 : i32
    %c0_i32_1 = arith.constant 0 : i32
    %c0_i32_2 = arith.constant 0 : i32
    return %arg0, %c0_i32, %c0_i32_0, %c0_i32_1 : i32, i32, i32, i32
  }
  func.func @transform_25(%arg0: i32) -> (i32, i32, i32) {
    %c0_i32 = arith.constant 0 : i32
    %c0_i32_0 = arith.constant 0 : i32
    %c0_i32_1 = arith.constant 0 : i32
    return %arg0, %c0_i32, %c0_i32_0 : i32, i32, i32
  }
  func.func @transform_26(%arg0: i32) -> (i32, i32, i32) {
    %c0_i32 = arith.constant 0 : i32
    %c0_i32_0 = arith.constant 0 : i32
    %c0_i32_1 = arith.constant 0 : i32
    return %arg0, %c0_i32, %c0_i32_0 : i32, i32, i32
  }
  func.func @transform_27(%arg0: i32) -> (i32, i32, i32) {
    %c0_i32 = arith.constant 0 : i32
    %c0_i32_0 = arith.constant 0 : i32
    %c0_i32_1 = arith.constant 0 : i32
    return %arg0, %c0_i32, %c0_i32_0 : i32, i32, i32
  }
  func.func @transform_28(%arg0: i32) -> (i32, i32, i32) {
    %c0_i32 = arith.constant 0 : i32
    %c0_i32_0 = arith.constant 0 : i32
    %c0_i32_1 = arith.constant 0 : i32
    return %arg0, %c0_i32, %c0_i32_0 : i32, i32, i32
  }
  func.func @transform_29(%arg0: i32) -> (i32, i32) {
    %c0_i32 = arith.constant 0 : i32
    %c0_i32_0 = arith.constant 0 : i32
    %c0_i32_1 = arith.constant 0 : i32
    return %c0_i32, %c0_i32_0 : i32, i32
  }
}

</mosaic_0001>

<bundles_post_ra>
// kernel: _lambda_.4
= control target key start
LH: loop header
LB: loop body
LE: loop exit
PB: predicated region body
PF: predicated region fallthrough
CT: control target
= control target key end

     0   :  { %vm34_vm0 = vcmask 1041408   ;;  %v100_v0 = vmov 0.0   ;;  %vm101_vm1 = vmmov 0   ;;  %vm30_vm2 = vcmask 31744   ;;  %s137_s1 = inlined_call_operand.vmem [shape: bf16[4,32], index: 1, kind: input, shape index: {}]   ;;  %s138_s0 = inlined_call_operand.vmem [shape: bf16[16,4], index: 0, kind: input, shape index: {}]   ;;  %s139_s2 = inlined_call_operand.vmem [shape: f32[1,32], index: 2, kind: input, shape index: {}]   ;;  %s140_s3 = inlined_call_operand.vmem [shape: f32[16,32], index: 3, kind: output, shape index: {}]  }
   0x1   :  { %91 = vmatprep.subr.bf16.mxu0 %v100_v0  ;;  %v17_v1 = vld [vmem:[%s137_s1] sm:$0x3]  ;;  %93 = vmatprep.mubr.msk.bf16.mxu0 %vm101_vm1, %v100_v0  ;;  %vm79_vm3 = vcmask 261120  }
   0x2   :  { %v36_v2 = vsel %vm34_vm0, %v17_v1, 0  ;;  %v99_v3 = vld [vmem:[%s138_s0] sm:$0xff]  }
   0x3   :  { %92 = vmatpush3.bf16.msra.mxu0 %v36_v2  ;;  %v86_v4 = vld [vmem:[%s139_s2] ss:$0 sm:$0xff] }
   0x6   :  { %94 = vmatmul.mubr.msk.bf16.vlgmr.msra.gmra.mxu0 %vm30_vm2, %v99_v3 }
  0xc6   :  { %v72_v5 = vpop.f32.mrf.mxu0 }
  0xc7   :  { %v73_v6 = vadd.f32 %v86_v4, %v72_v5 }
  0xc8   :  { %v95_v7 = vpop.f32.mrf.mxu0 }
  0xc9   :  { %80 = vst.msk [vmem:[%s140_s3] sm:$0xff] %vm79_vm3, %v73_v6 }
  0xca   :  { %v75_v8 = vpop.f32.mrf.mxu0 }
  0xcb   :  { %v76_v9 = vadd.f32 %v86_v4, %v75_v8 }
  0xcc   :  { %v96_v10 = vpop.f32.mrf.mxu0 }
  0xcd   :  { %81 = vst.msk [vmem:[%s140_s3 + $0x8] sm:$0xff] %vm79_vm3, %v76_v9 }

// kernel: _lambda_.5
= control target key start
LH: loop header
LB: loop body
LE: loop exit
PB: predicated region body
PF: predicated region fallthrough
CT: control target
= control target key end

     0   :  { %v203_v0 = vmov 0.0   ;;  %vm204_vm0 = vmmov 0   ;;  %vm86_vm1 = vcmask 785408   ;;  %vm153_vm2 = vcmask 261120   ;;  %s282_s1 = inlined_call_operand.vmem [shape: bf16[96,32], index: 1, kind: input, shape index: {}]   ;;  %s283_s0 = inlined_call_operand.vmem [shape: bf16[16,96], index: 0, kind: input, shape index: {}]   ;;  %s284_s2 = inlined_call_operand.vmem [shape: f32[1,32], index: 2, kind: input, shape index: {}]   ;;  %s285_s3 = inlined_call_operand.vmem [shape: f32[16,32], index: 3, kind: input, shape index: {}]   ;;  %s286_s4 = inlined_call_operand.vmem [shape: f32[1,32], index: 4, kind: input, shape index: {}]   ;;  %s287_s5 = inlined_call_operand.vmem [shape: f32[1,32], index: 5, kind: input, shape index: {}]   ;;  %s288_s6 = inlined_call_operand.vmem [shape: f32[16,32], index: 6, kind: output, shape index: {}]  }
   0x1   :  { %178 = vmatprep.subr.bf16.mxu0 %v203_v0  ;;  %v196_v1 = vld [vmem:[%s282_s1 + $0x28] sm:$0xff]   ;;  %190 = vmatprep.mubr.msk.bf16.mxu0 %vm204_vm0, %v203_v0  ;;  %v197_v2 = vld [vmem:[%s282_s1 + $0x20] sm:$0xff]   ;;  %v198_v3 = vld [vmem:[%s282_s1 + $0x18] sm:$0xff]  }
   0x2   :  { %179 = vmatpush3.bf16.msra.mxu0 %v196_v1  ;;  %v199_v4 = vld [vmem:[%s282_s1 + $0x10] sm:$0xff]   ;;  %v200_v5 = vld [vmem:[%s282_s1 + $0x8] sm:$0xff]   ;;  %v201_v6 = vld [vmem:[%s282_s1] sm:$0xff]  }
   0x3   :  { %180 = vmatprep.subr.bf16.mxu0 %v203_v0  ;;  %v202_v7 = vld [vmem:[%s283_s0] sm:$0xff]   ;;  %v132_v17 = vld [vmem:[%s285_s3 + $0x8] sm:$0xff] }
   0x4   :  { %v160_v8 = vld [vmem:[%s284_s2] ss:$0 sm:$0xff] }
   0x5   :  { %v131_v10 = vld [vmem:[%s285_s3] sm:$0xff] }
   0x6   :  { %181 = vmatpush3.bf16.msra.mxu0 %v197_v2  ;;  %v169_v12 = vld [vmem:[%s286_s4] ss:$0 sm:$0xff] }
   0x7   :  { %182 = vmatprep.subr.bf16.mxu0 %v203_v0  ;;  %v170_v15 = vld [vmem:[%s287_s5] ss:$0 sm:$0xff] }
   0xa   :  { %183 = vmatpush3.bf16.msra.mxu0 %v198_v3 }
   0xb   :  { %184 = vmatprep.subr.bf16.mxu0 %v203_v0 }
   0xe   :  { %185 = vmatpush3.bf16.msra.mxu0 %v199_v4 }
   0xf   :  { %186 = vmatprep.subr.bf16.mxu0 %v203_v0 }
  0x12   :  { %187 = vmatpush3.bf16.msra.mxu0 %v200_v5 }
  0x13   :  { %188 = vmatprep.subr.bf16.mxu0 %v203_v0 }
  0x16   :  { %189 = vmatpush3.bf16.msra.mxu0 %v201_v6 }
  0x19   :  { %191 = vmatmul.mubr.msk.bf16.vlgmr.msra.gmra.mxu0 %vm86_vm1, %v202_v7 }
  0xd9   :  { %v124_v9 = vpop.f32.mrf.mxu0 }
  0xda   :  { %v125_v11 = vadd.f32 %v160_v8, %v124_v9 }
  0xdb   :  { %v192_v13 = vpop.f32.mrf.mxu0 }
  0xdc   :  { %v133_v14 = vadd.f32 %v131_v10, %v125_v11 }
  0xdd   :  { %v127_v16 = vpop.f32.mrf.mxu0 }
  0xde   :  { %v142_v18 = vmul.f32 %v169_v12, %v133_v14  ;;  %v128_v19 = vadd.f32 %v160_v8, %v127_v16 }
  0xdf   :  { %v193_v20 = vpop.f32.mrf.mxu0 }
  0xe0   :  { %v151_v21 = vadd.f32 %v170_v15, %v142_v18  ;;  %v134_v22 = vadd.f32 %v132_v17, %v128_v19 }
  0xe2   :  { %154 = vst.msk [vmem:[%s288_s6] sm:$0xff] %vm153_vm2, %v151_v21  ;;  %v143_v23 = vmul.f32 %v169_v12, %v134_v22 }
  0xe4   :  { %v152_v24 = vadd.f32 %v170_v15, %v143_v23 }
  0xe6   :  { %155 = vst.msk [vmem:[%s288_s6 + $0x8] sm:$0xff] %vm153_vm2, %v152_v24 }

// kernel: _lambda_.7
= control target key start
LH: loop header
LB: loop body
LE: loop exit
PB: predicated region body
PF: predicated region fallthrough
CT: control target
= control target key end

     0   :  { %v235_v1 = vmov 0.0   ;;  %vm236_vm0 = vmmov 0   ;;  %s294_s0 = inlined_call_operand.vmem [shape: bf16[2,32], index: 0, kind: input, shape index: {}]   ;;  %s295_s1 = inlined_call_operand.vmem [shape: bf16[32,32], index: 1, kind: input, shape index: {}]   ;;  %s296_s2 = inlined_call_operand.vmem [shape: f32[1,32], index: 2, kind: input, shape index: {}]   ;;  %s297_s3 = inlined_call_operand.vmem [shape: bf16[32,3], index: 3, kind: input, shape index: {}]   ;;  %s298_s4 = inlined_call_operand.vmem [shape: f32[1,3], index: 4, kind: input, shape index: {}]   ;;  %s299_s5 = inlined_call_operand.hbm [shape: f32[2,3], index: 5, kind: output, shape index: {}]  }
   0x1   :  { %v207_v0 = vld [vmem:[%s295_s1 + $0x8] sm:$0xff]   ;;  %188 = vmatprep.subr.bf16.mxu0 %v235_v1  ;;  %196 = vmatprep.subr.bf16.mxu1 %v235_v1  ;;  %v208_v2 = vld [vmem:[%s295_s1] sm:$0xff]  }
   0x2   :  { %189 = vmatpush3.bf16.msra.mxu0 %v207_v0  ;;  %192 = vmatprep.mubr.msk.bf16.mxu0 %vm236_vm0, %v235_v1 }
   0x3   :  { %190 = vmatprep.subr.bf16.mxu0 %v235_v1  ;;  %200 = vmatprep.mubr.msk.bf16.mxu1 %vm236_vm0, %v235_v1 }
   0x4   :  { %10 = vsyncpa [#allocation3], 0  ;;  %v22_v3 = vld [vmem:[%s294_s0] sm:$0x1]  ;;  %vm46_vm1 = vcmask 261120   ;;  %v209_v4 = vld [vmem:[%s297_s3 + $0x8] sm:$0xff]  }
   0x5   :  { %197 = vmatpush3.bf16.msra.mxu1 %v209_v4  ;;  %v210_v5 = vld [vmem:[%s297_s3] sm:$0xff]   ;;  %s237_s3 = smov [#allocation2]   ;;  %vm158_vm2 = vcmask 17408  }
   0x6   :  { %191 = vmatpush3.bf16.msra.mxu0 %v208_v2  ;;  %198 = vmatprep.subr.bf16.mxu1 %v235_v1  ;;  %v174_v6 = vld [vmem:[%s296_s2] ss:$0 sm:$0xff]  ;;  %s166_s30 = sshll.u32 %s237_s3, 4  ;;  %s167_s30 = int_to_ptr.vmem [resolvable:$true] %s166_s30 }
   0x7   :  { %v178_v14 = vld [vmem:[%s298_s4] ss:$0 sm:$0xff]  ;;  %s213_s2 = scalar_lea.vmem %s167_s30, 32  ;;  %p218_p1 = scmp.lt.s32.totalorder %s167_s30, %s167_s30 }
   0x8   :  { %p214_p0 = scmp.ne.s32.totalorder %s167_s30, %s213_s2  ;;  %p219_p2 = scmp.lt.s32.totalorder %s213_s2, %s213_s2 }
   0x9   :  { %193 = vmatmul.mubr.msk.bf16.vlgmr.msra.gmra.mxu0 %vm46_vm1, %v22_v3  ;;  %199 = vmatpush3.bf16.msra.mxu1 %v210_v5 }
   0xa   :  { %p220_p3 = por %p219_p2, %p218_p1 }
   0xc   :  { %p221_p4 = pnand %p220_p3, %p214_p0 }
  0xc9   :  { %v84_v7 = vpop.f32.mrf.mxu0 }
  0xca   :  { %v85_v8 = vadd.f32 %v174_v6, %v84_v7 }
  0xcb   :  { %v194_v9 = vpop.f32.mrf.mxu0 }
  0xcc   :  { %211 = vtanh.f32 %v85_v8 }
  0xcd   :  { %v87_v10 = vpop.f32.mrf.mxu0 }
  0xcf   :  { %v195_v11 = vpop.f32.mrf.mxu0 }
  0xd9   :  { %v212_v12 = vpop.eup %211 }
  0xda   :  { %v91_v13 = vpack.c.bf16 %v212_v12, %v212_v12 }
  0xdc   :  { %201 = vmatmul.mubr.msk.bf16.vlgmr.msra.gmra.mxu1 %vm46_vm1, %v91_v13 }
 0x19c   :  { %v152_v15 = vpop.f32.mrf.mxu1 }
 0x19d   :  { %v153_v16 = vadd.f32 %v178_v14, %v152_v15 }
 0x19e   :  { %v202_v17 = vpop.f32.mrf.mxu1 }
 0x19f   :  { %159 = vst.msk [vmem:[#allocation2] sm:$0x3] %vm158_vm2, %v153_v16 }
 0x1a0   :  { %v155_v18 = vpop.f32.mrf.mxu1 }
 0x1a1   :  { %224 = shalt.err (!%p221_p4)
}
 0x1a2   :  { %169 = dma.vmem_to_hbm [thread:$0]  %s167_s30, 32, %s299_s5, [#allocation3]   ;;  %v203_v19 = vpop.f32.mrf.mxu1 }
 0x1a3   :  { %233 = dma.done.wait [#allocation3], 32  }
 0x1a4   :  { %234 = vsyncadd [#allocation3], 4294967264 }
 0x1a5   :  { %173 = vsyncpa [#allocation3], 1 }

// kernel: _lambda_.6
= control target key start
LH: loop header
LB: loop body
LE: loop exit
PB: predicated region body
PF: predicated region fallthrough
CT: control target
= control target key end

     0   :  { %s5095_s6 = smov 1   ;;  %s5096_s10 = smov 2   ;;  %s5745_s0 = inlined_call_operand.smem [shape: u32[30], index: -1, kind: input, shape index: {}] }
   0x1   :  { %s5134_s5 = sld [smem:[%s5745_s0]]   ;;  %s5097_s14 = smov 3  }
   0x2   :  { %s5139_s9 = sld [smem:[%s5745_s0 + %s5095_s6]]   ;;  %s5098_s18 = smov 4  }
   0x3   :  { %s5144_s13 = sld [smem:[%s5745_s0 + %s5096_s10]]   ;;  %s5099_s22 = smov 5  }
   0x4   :  { %s5149_s17 = sld [smem:[%s5745_s0 + %s5097_s14]]   ;;  %s5100_s26 = smov 6  }
   0x5   :  { %s5154_s21 = sld [smem:[%s5745_s0 + %s5098_s18]]   ;;  %s5101_s30 = smov 7  }
   0x6   :  { %s5159_s25 = sld [smem:[%s5745_s0 + %s5099_s22]]   ;;  %s5102_s4 = smov 8  }
   0x7   :  { %5758 = sst [smem:[#allocation3_spill]] %s5134_s5  ;;  %s5103_s10 = smov 9  }
   0x8   :  { %5759 = sst [smem:[#allocation4_spill]] %s5139_s9  ;;  %s5104_s15 = smov 10  }
   0x9   :  { %5760 = sst [smem:[#allocation5_spill]] %s5144_s13  ;;  %s5105_s20 = smov 11  }
   0xa   :  { %5761 = sst [smem:[#allocation6_spill]] %s5149_s17  ;;  %s5107_s1 = smov 13  }
   0xb   :  { %5762 = sst [smem:[#allocation7_spill]] %s5154_s21  ;;  %s5108_s7 = smov 14  }
   0xc   :  { %5763 = sst [smem:[#allocation8_spill]] %s5159_s25  ;;  %s5110_s22 = smov 16  }
   0xd   :  { %s5164_s29 = sld [smem:[%s5745_s0 + %s5100_s26]]   ;;  %s5106_s26 = smov 12  }
   0xe   :  { %s5169_s3 = sld [smem:[%s5745_s0 + %s5101_s30]]   ;;  %s5111_s28 = smov 17  }
   0xf   :  { %s5174_s8 = sld [smem:[%s5745_s0 + %s5102_s4]]  }
  0x10   :  { %s5179_s14 = sld [smem:[%s5745_s0 + %s5103_s10]]  }
  0x11   :  { %s5184_s19 = sld [smem:[%s5745_s0 + %s5104_s15]]   ;;  %s5109_s15 = smov 15  }
  0x12   :  { %s5189_s24 = sld [smem:[%s5745_s0 + %s5105_s20]]  }
  0x13   :  { %5764 = sst [smem:[#allocation9_spill]] %s5164_s29 }
  0x14   :  { %5765 = sst [smem:[#allocation10_spill]] %s5169_s3 }
  0x15   :  { %5766 = sst [smem:[#allocation11_spill]] %s5174_s8 }
  0x16   :  { %5767 = sst [smem:[#allocation12_spill]] %s5179_s14 }
  0x17   :  { %5768 = sst [smem:[#allocation13_spill]] %s5184_s19 }
  0x18   :  { %5769 = sst [smem:[#allocation14_spill]] %s5189_s24 }
  0x19   :  { %s5194_s30 = sld [smem:[%s5745_s0 + %s5106_s26]]  }
  0x1a   :  { %s5199_s6 = sld [smem:[%s5745_s0 + %s5107_s1]]  }
  0x1b   :  { %s5204_s12 = sld [smem:[%s5745_s0 + %s5108_s7]]   ;;  %s5112_s7 = smov 18  }
  0x1c   :  { %s5209_s20 = sld [smem:[%s5745_s0 + %s5109_s15]]   ;;  %s5113_s15 = smov 19  }
  0x1d   :  { %s5214_s27 = sld [smem:[%s5745_s0 + %s5110_s22]]   ;;  %s5114_s22 = smov 20  }
  0x1e   :  { %s5219_s4 = sld [smem:[%s5745_s0 + %s5111_s28]]   ;;  %s5115_s28 = smov 21  }
  0x1f   :  { %5770 = sst [smem:[#allocation15_spill]] %s5194_s30 }
  0x20   :  { %5771 = sst [smem:[#allocation16_spill]] %s5199_s6 }
  0x21   :  { %5772 = sst [smem:[#allocation17_spill]] %s5204_s12 }
  0x22   :  { %5773 = sst [smem:[#allocation18_spill]] %s5209_s20 }
  0x23   :  { %5774 = sst [smem:[#allocation19_spill]] %s5214_s27 }
  0x24   :  { %5775 = sst [smem:[#allocation20_spill]] %s5219_s4 }
  0x25   :  { %s5224_s5 = sld [smem:[%s5745_s0 + %s5112_s7]]   ;;  %s5116_s7 = smov 22  }
  0x26   :  { %s5229_s20 = sld [smem:[%s5745_s0 + %s5113_s15]]   ;;  %s5117_s15 = smov 23  }
  0x27   :  { %s5234_s27 = sld [smem:[%s5745_s0 + %s5114_s22]]   ;;  %s5118_s22 = smov 24  }
  0x28   :  { %s5239_s4 = sld [smem:[%s5745_s0 + %s5115_s28]]   ;;  %s5119_s28 = smov 25  }
  0x2b   :  { %5776 = sst [smem:[#allocation21_spill]] %s5224_s5 }
  0x2c   :  { %5777 = sst [smem:[#allocation22_spill]] %s5229_s20 }
  0x2d   :  { %5778 = sst [smem:[#allocation23_spill]] %s5234_s27 }
  0x2e   :  { %5779 = sst [smem:[#allocation24_spill]] %s5239_s4 }
  0x2f   :  { %s5244_s5 = sld [smem:[%s5745_s0 + %s5116_s7]]   ;;  %s5120_s7 = smov 26  }
  0x30   :  { %s5249_s20 = sld [smem:[%s5745_s0 + %s5117_s15]]   ;;  %s5121_s15 = smov 27  }
  0x31   :  { %s5254_s27 = sld [smem:[%s5745_s0 + %s5118_s22]]   ;;  %s5122_s22 = smov 28  }
  0x32   :  { %s5259_s4 = sld [smem:[%s5745_s0 + %s5119_s28]]   ;;  %s5123_s28 = smov 29  }
  0x35   :  { %5780 = sst [smem:[#allocation25_spill]] %s5244_s5 }
  0x36   :  { %5781 = sst [smem:[#allocation26_spill]] %s5249_s20 }
  0x37   :  { %5782 = sst [smem:[#allocation27_spill]] %s5254_s27 }
  0x38   :  { %5783 = sst [smem:[#allocation28_spill]] %s5259_s4 }
  0x39   :  { %s5264_s5 = sld [smem:[%s5745_s0 + %s5120_s7]]   ;;  %s5281_s7 = smov 0  }
  0x3a   :  { %s5269_s20 = sld [smem:[%s5745_s0 + %s5121_s15]]  }
  0x3b   :  { %s5274_s27 = sld [smem:[%s5745_s0 + %s5122_s22]]  }
  0x3c   :  { %s5279_s4 = sld [smem:[%s5745_s0 + %s5123_s28]]  }
  0x40   :  { %5784 = sst [smem:[#allocation29_spill]] %s5269_s20 }
  0x41   :  { %5785 = sst [smem:[#allocation30_spill]] %s5274_s27 }
  0x42   :  { %5786 = sst [smem:[#allocation31_spill]] %s5279_s4 }
  0x43 LB: > { %5787 = sst [smem:[#allocation32_spill]] %s5093_s7  ;;  %s5287_s10 = sadd.s32 4294967295, %s5093_s7   ;;  %s5093_s7 = sphi %s5281_s7, %s69_s7  }
  0x44   : > { %5788 = sst [smem:[#allocation33_spill]] %s5287_s10  ;;  %p4387_p0 = scmp.ge.s32.totalorder %s5093_s7, 1 }
  0x45   : > { %p1051_p1 = scmp.lt.s32.totalorder %s5093_s7, 3 }
  0x47   : > { %p1052_p2 = pnand %p4387_p0, %p1051_p1 }
  0x49   : > { %1055 = sbr.rel (%p1052_p2) target bundleno = 6077 (0x17bd), region = 136 }
  0x4e   : > { %s5790_s9 = sld [smem:[#allocation4_spill]]  ;;  %p1226_p3 = scmp.lt.s32.totalorder %s5287_s10, 1 }
  0x4f   : > { %s5793_s25 = sld [smem:[#allocation8_spill]] }
  0x50   : > { %s5797_s14 = sld [smem:[#allocation12_spill]] }
  0x51   : > { %s5798_s19 = sld [smem:[#allocation13_spill]] }
  0x52   : > { %s5799_s24 = sld [smem:[#allocation14_spill]] }
  0x53   : > { %s5800_s30 = sld [smem:[#allocation15_spill]] }
  0x54   : > { %s5293_s0 = scalar_select %p1226_p3, %s5287_s10, 1 }
  0x55   : > { %s5801_s6 = sld [smem:[#allocation16_spill]] }
  0x56   : > { %s4598_s11 = sshll.u32 %s5293_s0, 4  ;;  %s5802_s12 = sld [smem:[#allocation17_spill]] }
  0x57   : > { %s5299_s16 = scalar_lea.vmem %s5790_s9, %s4598_s11  ;;  %s5805_s26 = sld [smem:[#allocation18_spill]] }
  0x58   : > { %5803 = sst [smem:[#allocation34_spill]] %s5299_s16  ;;  %s5306_s28 = scalar_lea.vmem %s5793_s25, %s4598_s11 }
  0x59   : > { %5806 = sst [smem:[#allocation35_spill]] %s5306_s28  ;;  %s4600_s13 = sshll.u32 %s5293_s0, 5 }
  0x5a   : > { %s5807_s1 = sld [smem:[#allocation20_spill]]  ;;  %s5316_s16 = scalar_lea.vmem %s5797_s14, %s4600_s13 }
  0x5b   : > { %s5808_s7 = sld [smem:[#allocation21_spill]]  ;;  %s4394_s17 = sshll.u32 %s5293_s0, 2 }
  0x5c   : > { %s5809_s10 = sld [smem:[#allocation22_spill]]  ;;  %s5320_s23 = scalar_lea.vmem %s5798_s19, %s4394_s17 }
  0x5d   : > { %s5810_s15 = sld [smem:[#allocation23_spill]]  ;;  %s5323_s25 = scalar_lea.vmem %s5799_s24, %s4600_s13 }
  0x5e   : > { %s5811_s9 = sld [smem:[#allocation24_spill]]  ;;  %s5326_s2 = scalar_lea.vmem %s5800_s30, %s4394_s17 }
  0x5f   : > { %5812 = sst [smem:[#allocation36_spill]] %s5316_s16  ;;  %s4602_s4 = sshll.u32 %s5293_s0, 6 }
  0x60   : > { %s5813_s18 = sld [smem:[#allocation25_spill]]  ;;  %s5330_s8 = scalar_lea.vmem %s5801_s6, %s4602_s4 }
  0x61   : > { %s5814_s20 = sld [smem:[#allocation26_spill]]  ;;  %s5333_s3 = scalar_lea.vmem %s5802_s12, %s4394_s17 }
  0x62   : > { %5815 = sst [smem:[#allocation37_spill]] %s5320_s23  ;;  %s4603_s29 = sshll.u32 %s5293_s0, 3 }
  0x63   : > { %s5816_s11 = sld [smem:[#allocation27_spill]]  ;;  %s5339_s23 = scalar_lea.vmem %s5805_s26, %s4603_s29 }
  0x64   : > { %5817 = sst [smem:[#allocation38_spill]] %s5323_s25  ;;  %s1291_s24 = scalar_lea.vmem %s5807_s1, %s5293_s0 }
  0x65   : > { %s5818_s21 = sld [smem:[#allocation28_spill]]  ;;  %s1294_s16 = scalar_lea.vmem %s5808_s7, %s5293_s0 }
  0x66   : > { %5819 = sst [smem:[#allocation39_spill]] %s5326_s2  ;;  %s5346_s25 = scalar_lea.vmem %s5809_s10, %s4600_s13 }
  0x67   : > { %s5820_s27 = sld [smem:[#allocation29_spill]]  ;;  %s5349_s30 = scalar_lea.vmem %s5810_s15, %s4394_s17 }
  0x68   : > { %5821 = sst [smem:[#allocation40_spill]] %s5330_s8  ;;  %s5352_s2 = scalar_lea.vmem %s5811_s9, %s4602_s4 }
  0x69   : > { %s5822_s14 = sld [smem:[#allocation30_spill]]  ;;  %s5355_s28 = scalar_lea.vmem %s5813_s18, %s4394_s17 }
  0x6a   : > { %5823 = sst [smem:[#allocation41_spill]] %s5333_s3  ;;  %s5358_s6 = scalar_lea.vmem %s5814_s20, %s4394_s17 }
  0x6b   : > { %s5361_s8 = scalar_lea.vmem %s5816_s11, %s4394_s17  ;;  %s5364_s12 = scalar_lea.vmem %s5818_s21, %s4603_s29 }
  0x6c   : > { %s1328_s3 = scalar_lea.vmem %s5264_s5, %s5293_s0  ;;  %s5824_s19 = sld [smem:[#allocation33_spill]] }
  0x6d   : > { %s1331_s22 = scalar_lea.vmem %s5820_s27, %s5293_s0 }
  0x6f   : > { %s1334_s26 = scalar_lea.vmem %s5822_s14, %s5293_s0 }
  0x72   : > { %p4413_p4 = scmp.ne.s32.totalorder %s5824_s19, 0 }
  0x73   : > { %s5825_s13 = sld [smem:[#allocation3_spill]] (!%p4413_p4) }
  0x74   : > { %1339 = sbr.rel (%p4413_p4) target bundleno = 123 (0x7b), region = 140 }
  0x79   : > { %v1340_v0 = vld [vmem:[%s5825_s13] sm:$0xff]  ;;  %vm1342_vm0 = vcmask 261120   ;;  %v1341_v1 = vld [vmem:[%s5825_s13 + $0x8] sm:$0xff] }
  0x7a   : > { %1343 = vst.msk [vmem:[#allocation2] sm:$0xff] %vm1342_vm0, %v1340_v0  ;;  %1344 = vst.msk [vmem:[#allocation2 + $0x8] sm:$0xff] %vm1342_vm0, %v1341_v1 }
  0x7b PF: > { %s5826_s9 = sld [smem:[#allocation35_spill]]  ;;  %v5124_v3 = vmov 0.0   ;;  %vm5125_vm1 = vmmov 0   ;;  %vm1371_vm2 = vcmask 261120   ;;  %vm1541_vm3 = vcmask 130048  }
  0x7c   : > { %s5827_s17 = sld [smem:[#allocation34_spill]]  ;;  %4711 = vmatprep.subr.bf16.mxu1 %v5124_v3  ;;  %4703 = vmatprep.subr.bf16.mxu0 %v5124_v3  ;;  %vm1709_vm4 = vcmask 31744   ;;  %vm1756_vm5 = vcmask 64512   ;;  %vm1772_vm6 = vcmask 1043456   ;;  %vm1928_vm7 = vcmask 1041408  }
  0x7d   : > { %4715 = vmatprep.mubr.msk.bf16.mxu1 %vm5125_vm1, %v5124_v3  ;;  %s5828_s21 = sld [smem:[#allocation38_spill]]  ;;  %4707 = vmatprep.mubr.msk.bf16.mxu0 %vm5125_vm1, %v5124_v3 }
  0x7e   : > { %s5829_s29 = sld [smem:[#allocation36_spill]] }
  0x7f   : > { %s5830_s14 = sld [smem:[#allocation9_spill]] }
  0x80   : > { %s5831_s19 = sld [smem:[#allocation10_spill]] }
  0x81   : > { %v5020_v2 = vld [vmem:[%s5826_s9 + $0x8] sm:$0xff]   ;;  %v5021_v4 = vld [vmem:[%s5826_s9] sm:$0xff]   ;;  %s5832_s20 = sld [smem:[#allocation11_spill]] }
  0x82   : > { %4712 = vmatpush3.bf16.msra.mxu1 %v5020_v2  ;;  %v1345_v5 = vld [vmem:[#allocation2] sm:$0xff]  ;;  %v1346_v6 = vld [vmem:[#allocation2 + $0x8] sm:$0xff]  ;;  %s5836_s10 = sld [smem:[#allocation39_spill]] }
  0x83   : > { %4713 = vmatprep.subr.bf16.mxu1 %v5124_v3  ;;  %v5022_v7 = vld [vmem:[%s5827_s17 + $0x8] sm:$0xff]   ;;  %v5385_v8 = vpack.c.bf16 %v1346_v6, %v1345_v5  ;;  %v5023_v9 = vld [vmem:[%s5827_s17] sm:$0xff]   ;;  %s5837_s15 = sld [smem:[#allocation37_spill]] }
  0x84   : > { %4704 = vmatpush3.bf16.msra.mxu0 %v5022_v7  ;;  %v5024_v10 = vld [vmem:[%s5828_s21] sm:$0xff]   ;;  %s5838_s18 = sld [smem:[#allocation40_spill]] }
  0x85   : > { %4705 = vmatprep.subr.bf16.mxu0 %v5124_v3  ;;  %v5025_v11 = vld [vmem:[%s5829_s29] sm:$0xff]   ;;  %s5833_s27 = scalar_lea.vmem %s5830_s14, %s5293_s0  ;;  %s5839_s1 = sld [smem:[#allocation41_spill]] }
  0x86   : > { %4714 = vmatpush3.bf16.msra.mxu1 %v5021_v4  ;;  %v4420_v12 = vld [vmem:[%s5833_s27] ss:$0 sm:$0xff]  ;;  %s5834_s4 = scalar_lea.vmem %s5831_s19, %s5293_s0  ;;  %s5840_s11 = sld [smem:[#allocation5_spill]] }
  0x87   : > { %4725 = vmatprep.subr.bf16.mxu1 %v5124_v3  ;;  %v4424_v15 = vld [vmem:[%s5834_s4] ss:$0 sm:$0xff]  ;;  %s5835_s7 = scalar_lea.vmem %s5832_s20, %s5293_s0  ;;  %s5841_s9 = sld [smem:[#allocation6_spill]] }
  0x88   : > { %4706 = vmatpush3.bf16.msra.mxu0 %v5023_v9  ;;  %v4425_v20 = vld [vmem:[%s5835_s7] ss:$0 sm:$0xff]  ;;  %s5842_s17 = sld [smem:[#allocation7_spill]] }
  0x89   : > { %4716 = vmatmul.mubr.msk.bf16.vlgmr.msra.gmra.mxu1 %vm1371_vm2, %v5385_v8  ;;  %4719 = vmatprep.subr.bf16.mxu0 %v5124_v3  ;;  %v4430_v30 = vld [vmem:[%s5836_s10] ss:$0 sm:$0xff]  ;;  %s5843_s14 = sld [smem:[#allocation19_spill]] }
  0x8a   : > { %4727 = vmatprep.mubr.msk.bf16.mxu1 %vm5125_vm1, %v5124_v3  ;;  %4726 = vmatpush3.bf16.msra.mxu1 %v5024_v10  ;;  %v4427_v37 = vld [vmem:[%s5837_s15] ss:$0 sm:$0xff]  ;;  %v5026_v50 = vld [vmem:[%s5838_s18 + $0x8] sm:$0xff]  }
  0x8b   : > { %4708 = vmatmul.mubr.msk.bf16.vlgmr.msra.gmra.mxu0 %vm1371_vm2, %v5385_v8  ;;  %4739 = vmatprep.subr.bf16.mxu1 %v5124_v3  ;;  %v5027_v51 = vld [vmem:[%s5838_s18] sm:$0xff]  }
  0x8c   : > { %4721 = vmatprep.mubr.msk.bf16.mxu0 %vm5125_vm1, %v5124_v3  ;;  %4720 = vmatpush3.bf16.msra.mxu0 %v5025_v11  ;;  %v4433_v10 = vld [vmem:[%s5839_s1] ss:$0 sm:$0xff]  ;;  %s5844_s19 = scalar_lea.vmem %s5840_s11, %s5293_s0 }
  0x8d   : > { %4731 = vmatprep.subr.bf16.mxu0 %v5124_v3  ;;  %s5845_s20 = scalar_lea.vmem %s5841_s9, %s5293_s0 }
  0x8e   : > { %s5846_s27 = scalar_lea.vmem %s5842_s17, %s5293_s0 }
  0x8f   : > { %s5847_s4 = scalar_lea.vmem %s5843_s14, %s5293_s0 }
 0x149   : > { %v1491_v13 = vpop.f32.mrf.mxu1 }
 0x14a   : > { %v1492_v14 = vadd.f32 %v4420_v12, %v1491_v13 }
 0x14b   : > { %v4717_v16 = vpop.f32.mrf.mxu1  ;;  %v5422_v26 = vpop.f32.mrf.mxu0 }
 0x14c   : > { %v1505_v18 = vmul.f32 %v4424_v15, %v1492_v14 }
 0x14d   : > { %v1494_v17 = vpop.f32.mrf.mxu1  ;;  %v4709_v27 = vpop.f32.mrf.mxu0 }
 0x14e   : > { %v1495_v19 = vadd.f32 %v4420_v12, %v1494_v17  ;;  %v1514_v23 = vadd.f32 %v4425_v20, %v1505_v18 }
 0x14f   : > { %v4718_v21 = vpop.f32.mrf.mxu1  ;;  %v5424_v28 = vpop.f32.mrf.mxu0 }
 0x150   : > { %v1506_v22 = vmul.f32 %v4424_v15, %v1495_v19 }
 0x151   : > { %v4710_v29 = vpop.f32.mrf.mxu0 }
 0x152   : > { %v1515_v24 = vadd.f32 %v4425_v20, %v1506_v22 }
 0x154   : > { %v5412_v25 = vpack.c.bf16 %v1515_v24, %v1514_v23 }
 0x156   : > { %4722 = vmatmul.mubr.msk.bf16.vlgmr.msra.gmra.mxu0 %vm1541_vm3, %v5412_v25  ;;  %4728 = vmatmul.mubr.msk.bf16.vlgmr.msra.gmra.mxu1 %vm1541_vm3, %v5412_v25 }
 0x157   : > { %4741 = vmatprep.mubr.msk.bf16.mxu1 %vm5125_vm1, %v5124_v3  ;;  %4735 = vmatprep.mubr.msk.bf16.mxu0 %vm5125_vm1, %v5124_v3 }
 0x158   : > { %4732 = vmatpush3.bf16.msra.mxu0 %v5026_v50 }
 0x159   : > { %4733 = vmatprep.subr.bf16.mxu0 %v5124_v3 }
 0x15c   : > { %4734 = vmatpush3.bf16.msra.mxu0 %v5027_v51  ;;  %v4418_v51 = vld [vmem:[%s5845_s20] ss:$0 sm:$0xff] }
 0x15d   : > { %4745 = vmatprep.subr.bf16.mxu0 %v5124_v3 }
 0x15f   : > { %4736 = vmatmul.mubr.msk.bf16.vlgmr.msra.gmra.mxu0 %vm1371_vm2, %v5385_v8 }
 0x160   : > { %4747 = vmatprep.mubr.msk.bf16.mxu0 %vm5125_vm1, %v5124_v3 }
 0x216   : > { %v1579_v31 = vpop.f32.mrf.mxu0  ;;  %v1635_v32 = vpop.f32.mrf.mxu1 }
 0x217   : > { %v1636_v33 = vadd.f32 %v4430_v30, %v1635_v32  ;;  %v1580_v44 = vadd.f32 %v4427_v37, %v1579_v31  ;;  %v5028_v31 = vld [vmem:[%s5829_s29 + $0x8] sm:$0xff]  }
 0x218   : > { %v4723_v34 = vpop.f32.mrf.mxu0  ;;  %v4729_v35 = vpop.f32.mrf.mxu1 }
 0x219   : > { %v1707_v36 = vpack.c.bf16 %v1636_v33, %v1636_v33  ;;  %v1706_v46 = vpack.c.bf16 %v1580_v44, %v1580_v44  ;;  %v1924_v33 = vld [vmem:[%s5339_s23] sm:$0x3] }
 0x21a   : > { %v1582_v38 = vpop.f32.mrf.mxu0  ;;  %v1638_v39 = vpop.f32.mrf.mxu1  ;;  %v1930_v34 = vsel %vm1928_vm7, %v1924_v33, 0 }
 0x21b   : > { %v1714_v40 = vsel %vm1709_vm4, %v1707_v36, 0  ;;  %v1639_v41 = vadd.f32 %v4430_v30, %v1638_v39  ;;  %v1583_v48 = vadd.f32 %v4427_v37, %v1582_v38 }
 0x21c   : > { %v4724_v42 = vpop.f32.mrf.mxu0  ;;  %v4730_v43 = vpop.f32.mrf.mxu1  ;;  %4740 = vmatpush3.bf16.xpose.msra.mxu1 %v1714_v40  ;;  %v5029_v40 = vld [vmem:[%s5828_s21 + $0x8] sm:$0xff]  }
 0x21d   : > { %4751 = vmatprep.subr.bf16.mxu1 %v5124_v3  ;;  %v1817_v45 = vpack.c.bf16 %v1639_v41, %v1639_v41  ;;  %v1816_v49 = vpack.c.bf16 %v1583_v48, %v1583_v48 }
 0x21f   : > { %v1823_v47 = vsel %vm1709_vm4, %v1817_v45, 0  ;;  %v1699_v11 = vpop.f32.mrf.mxu0 }
 0x220   : > { %v1700_v12 = vadd.f32 %v4433_v10, %v1699_v11 }
 0x221   : > { %v4737_v13 = vpop.f32.mrf.mxu0 }
 0x222   : > { %v1708_v14 = vpack.c.bf16 %v1700_v12, %v1700_v12 }
 0x223   : > { %4742 = vmatmul.mubr.msk.bf16.vlgmr.msra.gmra.mxu1 %vm1709_vm4, %v1706_v46  ;;  %v1702_v15 = vpop.f32.mrf.mxu0 }
 0x224   : > { %4752 = vmatpush3.bf16.xpose.msra.mxu1 %v1823_v47  ;;  %4753 = vmatprep.mubr.msk.bf16.mxu1 %vm5125_vm1, %v5124_v3  ;;  %v1774_v16 = vsel %vm1772_vm6, %v1708_v14, 0  ;;  %v1703_v17 = vadd.f32 %v4433_v10, %v1702_v15 }
 0x225   : > { %4763 = vmatprep.subr.bf16.mxu1 %v5124_v3  ;;  %v4738_v18 = vpop.f32.mrf.mxu0  ;;  %4746 = vmatpush3.bf16.msra.mxu0 %v1774_v16 }
 0x226   : > { %4757 = vmatprep.subr.bf16.mxu0 %v5124_v3  ;;  %v1818_v22 = vpack.c.bf16 %v1703_v17, %v1703_v17 }
 0x228   : > { %v1881_v27 = vsel %vm1772_vm6, %v1818_v22, 0 }
 0x22b   : > { %4754 = vmatmul.mubr.msk.bf16.vlgmr.msra.gmra.mxu1 %vm1709_vm4, %v1816_v49  ;;  %v4414_v49 = vld [vmem:[%s5844_s19] ss:$0 sm:$0xff] }
 0x22c   : > { %4765 = vmatprep.mubr.msk.bf16.mxu1 %vm5125_vm1, %v5124_v3  ;;  %4764 = vmatpush3.bf16.msra.mxu1 %v1930_v34  ;;  %v1410_v50 = vadd.f32 %v4414_v49, %v5422_v26 }
 0x22d   : > { %4775 = vmatprep.subr.bf16.mxu1 %v5124_v3 }
 0x2e3   : > { %v1750_v52 = vpop.f32.mrf.mxu1 }
 0x2e4   : > { %v1757_v53 = vsel %vm1756_vm5, %v1750_v52, -inf }
 0x2e5   : > { %1758 = vmax.xlane.f32.xlu0 %v1757_v53  ;;  %v4743_v54 = vpop.f32.mrf.mxu1  ;;  %v1413_v53 = vadd.f32 %v4414_v49, %v5424_v28 }
 0x2e6   : > { %v4419_v54 = vld [vmem:[%s5846_s27] ss:$0 sm:$0xff] }
 0x2e7   : > { %v1753_v55 = vpop.f32.mrf.mxu1 }
 0x2e8   : > { %v1424_v55 = vmul.f32 %v4418_v51, %v1413_v53 }
 0x2e9   : > { %v4744_v56 = vpop.f32.mrf.mxu1 }
 0x2eb   : > { %v1859_v57 = vpop.f32.mrf.mxu1 }
 0x2ec   : > { %v1865_v58 = vsel %vm1756_vm5, %v1859_v57, -inf }
 0x2ed   : > { %1866 = vmax.xlane.f32.xlu0 %v1865_v58  ;;  %v4755_v59 = vpop.f32.mrf.mxu1 }
 0x2ee   : > { %v1433_v59 = vadd.f32 %v4419_v54, %v1424_v55 }
 0x2ef   : > { %v1862_v60 = vpop.f32.mrf.mxu1 }
 0x2f1   : > { %v4756_v61 = vpop.f32.mrf.mxu1 }
 0x36e   : > { %v1759_v62 = vpop.xlane.xlu0 %1758 }
 0x36f   : > { %v1760_v63 = vsub.f32 %v1750_v52, %v1759_v62  ;;  %v1423_v52 = vmul.f32 %v4418_v51, %v1410_v50 }
 0x371   : > { %v1761_v0 = vmul.f32 1.442695, %v1760_v63  ;;  %v1432_v56 = vadd.f32 %v4419_v54, %v1423_v52 }
 0x373   : > { %5053 = vpow2.f32 %v1761_v0 }
 0x376   : > { %v1867_v1 = vpop.xlane.xlu0 %1866 }
 0x377   : > { %v1868_v2 = vsub.f32 %v1859_v57, %v1867_v1  ;;  %v4426_v57 = vld [vmem:[%s5847_s4] ss:$0 sm:$0xff] }
 0x378   : > { %v1524_v58 = vadd.f32 %v4426_v57, %v1432_v56  ;;  %v1525_v26 = vadd.f32 %v4426_v57, %v1433_v59 }
 0x379   : > { %v1869_v4 = vmul.f32 1.442695, %v1868_v2  ;;  %v4451_v2 = vld [vmem:[%s5836_s10 + $0x1] ss:$0 sm:$0xff] }
 0x37b   : > { %5055 = vpow2.f32 %v1869_v4 }
 0x380   : > { %v5054_v5 = vpop.eup %5053 }
 0x381   : > { %v1763_v6 = vsel %vm1756_vm5, %v5054_v5, 0.0 }
 0x382   : > { %1764 = vadd.xlane.f32.xlu1 %v1763_v6 }
 0x388   : > { %v5056_v7 = vpop.eup %5055 }
 0x389   : > { %v1871_v9 = vsel %vm1756_vm5, %v5056_v7, 0.0 }
 0x38a   : > { %1872 = vadd.xlane.f32.xlu1 %v1871_v9 }
 0x40b   : > { %v1765_v19 = vpop.xlane.xlu1 %1764 }
 0x40c   : > { %5057 = vrcp.f32 %v1765_v19  ;;  %v5030_v19 = vld [vmem:[%s5838_s18 + $0x18] sm:$0xff]  }
 0x413   : > { %v1873_v20 = vpop.xlane.xlu1 %1872 }
 0x414   : > { %5059 = vrcp.f32 %v1873_v20  ;;  %v5031_v20 = vld [vmem:[%s5838_s18 + $0x10] sm:$0xff]  }
 0x419   : > { %v5058_v21 = vpop.eup %5057 }
 0x41a   : > { %v1767_v23 = vmul.f32 %v5058_v21, %v5054_v5 }
 0x41c   : > { %v1768_v24 = vpack.c.bf16 %v1767_v23, %v1767_v23 }
 0x41e   : > { %4748 = vmatmul.mubr.msk.bf16.vlgmr.msra.gmra.mxu0 %vm1756_vm5, %v1768_v24 }
 0x41f   : > { %4758 = vmatpush3.bf16.msra.mxu0 %v1881_v27  ;;  %4759 = vmatprep.mubr.msk.bf16.mxu0 %vm5125_vm1, %v5124_v3 }
 0x420   : > { %4769 = vmatprep.subr.bf16.mxu0 %v5124_v3 }
 0x421   : > { %v5060_v29 = vpop.eup %5059 }
 0x422   : > { %v1875_v30 = vmul.f32 %v5060_v29, %v5056_v7  ;;  %v4445_v7 = vld [vmem:[%s5837_s15 + $0x1] ss:$0 sm:$0xff] }
 0x424   : > { %v1876_v32 = vpack.c.bf16 %v1875_v30, %v1875_v30 }
 0x426   : > { %4760 = vmatmul.mubr.msk.bf16.vlgmr.msra.gmra.mxu0 %vm1756_vm5, %v1876_v32 }
 0x427   : > { %4770 = vmatpush3.bf16.msra.mxu0 %v5028_v31  ;;  %4771 = vmatprep.mubr.msk.bf16.mxu0 %vm5125_vm1, %v5124_v3 }
 0x428   : > { %4781 = vmatprep.subr.bf16.mxu0 %v5124_v3 }
 0x42e   : > { %4772 = vmatmul.mubr.msk.bf16.vlgmr.msra.gmra.mxu0 %vm1541_vm3, %v5412_v25 }
 0x42f   : > { %4785 = vmatprep.mubr.msk.bf16.mxu0 %vm5125_vm1, %v5124_v3  ;;  %4782 = vmatpush3.bf16.msra.mxu0 %v5030_v19 }
 0x430   : > { %4783 = vmatprep.subr.bf16.mxu0 %v5124_v3 }
 0x433   : > { %4784 = vmatpush3.bf16.msra.mxu0 %v5031_v20 }
 0x434   : > { %4795 = vmatprep.subr.bf16.mxu0 %v5124_v3 }
 0x436   : > { %4786 = vmatmul.mubr.msk.bf16.vlgmr.msra.gmra.mxu0 %vm1371_vm2, %v5385_v8 }
 0x437   : > { %4797 = vmatprep.mubr.msk.bf16.mxu0 %vm5125_vm1, %v5124_v3 }
 0x4de   : > { %v1810_v35 = vpop.f32.mrf.mxu0 }
 0x4e0   : > { %v4749_v36 = vpop.f32.mrf.mxu0 }
 0x4e2   : > { %v1813_v37 = vpop.f32.mrf.mxu0 }
 0x4e4   : > { %v4750_v38 = vpop.f32.mrf.mxu0 }
 0x4e6   : > { %v1917_v39 = vpop.f32.mrf.mxu0 }
 0x4e7   : > { %v1923_v41 = vpack.c.bf16 %v1917_v39, %v1810_v35 }
 0x4e8   : > { %v4761_v42 = vpop.f32.mrf.mxu0 }
 0x4e9   : > { %4766 = vmatmul.mubr.msk.bf16.vlgmr.msra.gmra.mxu1 %vm1709_vm4, %v1923_v41 }
 0x4ea   : > { %v1920_v43 = vpop.f32.mrf.mxu0  ;;  %4776 = vmatpush3.bf16.msra.mxu1 %v5029_v40  ;;  %4777 = vmatprep.mubr.msk.bf16.mxu1 %vm5125_vm1, %v5124_v3 }
 0x4eb   : > { %4789 = vmatprep.subr.bf16.mxu1 %v5124_v3 }
 0x4ec   : > { %v4762_v44 = vpop.f32.mrf.mxu0 }
 0x4ed   : > { %v4459_v44 = vld [vmem:[%s5839_s1 + $0x1] ss:$0 sm:$0xff] }
 0x4ee   : > { %v2026_v45 = vpop.f32.mrf.mxu0 }
 0x4ef   : > { %v2027_v13 = vadd.f32 %v4445_v7, %v2026_v45 }
 0x4f0   : > { %v4773_v46 = vpop.f32.mrf.mxu0 }
 0x4f1   : > { %4778 = vmatmul.mubr.msk.bf16.vlgmr.msra.gmra.mxu1 %vm1541_vm3, %v5412_v25  ;;  %v2157_v15 = vpack.c.bf16 %v2027_v13, %v2027_v13 }
 0x4f2   : > { %v2029_v47 = vpop.f32.mrf.mxu0  ;;  %4791 = vmatprep.mubr.msk.bf16.mxu1 %vm5125_vm1, %v5124_v3 }
 0x4f3   : > { %v2030_v17 = vadd.f32 %v4445_v7, %v2029_v47 }
 0x4f4   : > { %v4774_v48 = vpop.f32.mrf.mxu0 }
 0x4f5   : > { %v2264_v18 = vpack.c.bf16 %v2030_v17, %v2030_v17 }
 0x4f6   : > { %v2150_v45 = vpop.f32.mrf.mxu0 }
 0x4f7   : > { %v2151_v46 = vadd.f32 %v4459_v44, %v2150_v45 }
 0x4f8   : > { %v4787_v47 = vpop.f32.mrf.mxu0 }
 0x4f9   : > { %v2159_v48 = vpack.c.bf16 %v2151_v46, %v2151_v46 }
 0x4fa   : > { %v2153_v49 = vpop.f32.mrf.mxu0 }
 0x4fb   : > { %v2222_v50 = vsel %vm1772_vm6, %v2159_v48, 0  ;;  %v2154_v51 = vadd.f32 %v4459_v44, %v2153_v49 }
 0x4fc   : > { %v4788_v52 = vpop.f32.mrf.mxu0  ;;  %4796 = vmatpush3.bf16.msra.mxu0 %v2222_v50 }
 0x4fd   : > { %4807 = vmatprep.subr.bf16.mxu0 %v5124_v3  ;;  %v2266_v56 = vpack.c.bf16 %v2154_v51, %v2154_v51 }
 0x4ff   : > { %v2329_v59 = vsel %vm1772_vm6, %v2266_v56, 0 }
 0x5a9   : > { %v1966_v60 = vpop.f32.mrf.mxu1 }
 0x5aa   : > { %v5493_v61 = vadd.f32 %v1966_v60, %v1524_v58 }
 0x5ab   : > { %v4767_v62 = vpop.f32.mrf.mxu1 }
 0x5ad   : > { %v1969_v63 = vpop.f32.mrf.mxu1 }
 0x5ae   : > { %v5495_v0 = vadd.f32 %v1969_v63, %v1525_v26  ;;  %v5032_v26 = vld [vmem:[%s5829_s29 + $0x10] sm:$0xff]  }
 0x5af   : > { %v4768_v1 = vpop.f32.mrf.mxu1 }
 0x5b0   : > { %v4467_v1 = vld [vmem:[%s5339_s23 + $0x2] sm:$0x3] }
 0x5b1   : > { %v2084_v28 = vpop.f32.mrf.mxu1 }
 0x5b2   : > { %v2085_v4 = vadd.f32 %v4451_v2, %v2084_v28 }
 0x5b3   : > { %v4779_v5 = vpop.f32.mrf.mxu1 }
 0x5b4   : > { %v2158_v6 = vpack.c.bf16 %v2085_v4, %v2085_v4 }
 0x5b5   : > { %v2087_v9 = vpop.f32.mrf.mxu1 }
 0x5b6   : > { %v2164_v10 = vsel %vm1709_vm4, %v2158_v6, 0  ;;  %v2088_v11 = vadd.f32 %v4451_v2, %v2087_v9  ;;  %v2378_v2 = vsel %vm1928_vm7, %v4467_v1, 0  ;;  %v5033_v9 = vld [vmem:[%s5828_s21 + $0x10] sm:$0xff]  }
 0x5b7   : > { %v4780_v12 = vpop.f32.mrf.mxu1  ;;  %4790 = vmatpush3.bf16.xpose.msra.mxu1 %v2164_v10 }
 0x5b8   : > { %4801 = vmatprep.subr.bf16.mxu1 %v5124_v3  ;;  %v2265_v14 = vpack.c.bf16 %v2088_v11, %v2088_v11 }
 0x5ba   : > { %v2271_v16 = vsel %vm1709_vm4, %v2265_v14, 0 }
 0x5be   : > { %4792 = vmatmul.mubr.msk.bf16.vlgmr.msra.gmra.mxu1 %vm1709_vm4, %v2157_v15 }
 0x5bf   : > { %4802 = vmatpush3.bf16.xpose.msra.mxu1 %v2271_v16  ;;  %4803 = vmatprep.mubr.msk.bf16.mxu1 %vm5125_vm1, %v5124_v3 }
 0x5c0   : > { %4813 = vmatprep.subr.bf16.mxu1 %v5124_v3 }
 0x5c6   : > { %4804 = vmatmul.mubr.msk.bf16.vlgmr.msra.gmra.mxu1 %vm1709_vm4, %v2264_v18 }
 0x5c7   : > { %4815 = vmatprep.mubr.msk.bf16.mxu1 %vm5125_vm1, %v5124_v3  ;;  %4814 = vmatpush3.bf16.msra.mxu1 %v2378_v2 }
 0x5c8   : > { %4825 = vmatprep.subr.bf16.mxu1 %v5124_v3 }
 0x67e   : > { %v2200_v21 = vpop.f32.mrf.mxu1 }
 0x67f   : > { %v2206_v22 = vsel %vm1756_vm5, %v2200_v21, -inf }
 0x680   : > { %2207 = vmax.xlane.f32.xlu0 %v2206_v22  ;;  %v4793_v23 = vpop.f32.mrf.mxu1 }
 0x682   : > { %v2203_v24 = vpop.f32.mrf.mxu1 }
 0x683   : > { %v4478_v24 = vld [vmem:[%s5836_s10 + $0x2] ss:$0 sm:$0xff] }
 0x684   : > { %v4794_v27 = vpop.f32.mrf.mxu1 }
 0x686   : > { %v2307_v29 = vpop.f32.mrf.mxu1 }
 0x687   : > { %v2313_v30 = vsel %vm1756_vm5, %v2307_v29, -inf }
 0x688   : > { %2314 = vmax.xlane.f32.xlu1 %v2313_v30  ;;  %v4805_v31 = vpop.f32.mrf.mxu1 }
 0x68a   : > { %v2310_v32 = vpop.f32.mrf.mxu1 }
 0x68b   : > { %v4472_v32 = vld [vmem:[%s5837_s15 + $0x2] ss:$0 sm:$0xff] }
 0x68c   : > { %v4806_v33 = vpop.f32.mrf.mxu1 }
 0x709   : > { %v2208_v34 = vpop.xlane.xlu0 %2207 }
 0x70a   : > { %v2209_v35 = vsub.f32 %v2200_v21, %v2208_v34 }
 0x70c   : > { %v2210_v36 = vmul.f32 1.442695, %v2209_v35 }
 0x70e   : > { %5061 = vpow2.f32 %v2210_v36 }
 0x711   : > { %v2315_v37 = vpop.xlane.xlu1 %2314 }
 0x712   : > { %v2316_v38 = vsub.f32 %v2307_v29, %v2315_v37 }
 0x714   : > { %v2317_v39 = vmul.f32 1.442695, %v2316_v38 }
 0x716   : > { %5063 = vpow2.f32 %v2317_v39 }
 0x71b   : > { %v5062_v40 = vpop.eup %5061 }
 0x71c   : > { %v2212_v41 = vsel %vm1756_vm5, %v5062_v40, 0.0 }
 0x71d   : > { %2213 = vadd.xlane.f32.xlu0 %v2212_v41  ;;  %v5034_v41 = vld [vmem:[%s5838_s18 + $0x28] sm:$0xff]  }
 0x723   : > { %v5064_v42 = vpop.eup %5063 }
 0x724   : > { %v2319_v43 = vsel %vm1756_vm5, %v5064_v42, 0.0 }
 0x725   : > { %2320 = vadd.xlane.f32.xlu1 %v2319_v43 }
 0x7a6   : > { %v2214_v53 = vpop.xlane.xlu0 %2213 }
 0x7a7   : > { %5065 = vrcp.f32 %v2214_v53 }
 0x7ae   : > { %v2321_v54 = vpop.xlane.xlu1 %2320 }
 0x7af   : > { %5067 = vrcp.f32 %v2321_v54 }
 0x7b4   : > { %v5066_v55 = vpop.eup %5065 }
 0x7b5   : > { %v2216_v57 = vmul.f32 %v5066_v55, %v5062_v40 }
 0x7b7   : > { %v2217_v58 = vpack.c.bf16 %v2216_v57, %v2216_v57 }
 0x7b9   : > { %4798 = vmatmul.mubr.msk.bf16.vlgmr.msra.gmra.mxu0 %vm1756_vm5, %v2217_v58 }
 0x7ba   : > { %4808 = vmatpush3.bf16.msra.mxu0 %v2329_v59  ;;  %4809 = vmatprep.mubr.msk.bf16.mxu0 %vm5125_vm1, %v5124_v3 }
 0x7bb   : > { %4819 = vmatprep.subr.bf16.mxu0 %v5124_v3 }
 0x7bc   : > { %v5068_v60 = vpop.eup %5067 }
 0x7bd   : > { %v2323_v62 = vmul.f32 %v5068_v60, %v5064_v42  ;;  %v5035_v42 = vld [vmem:[%s5838_s18 + $0x20] sm:$0xff]  }
 0x7bf   : > { %v2324_v63 = vpack.c.bf16 %v2323_v62, %v2323_v62 }
 0x7c1   : > { %4810 = vmatmul.mubr.msk.bf16.vlgmr.msra.gmra.mxu0 %vm1756_vm5, %v2324_v63  ;;  %v4486_v63 = vld [vmem:[%s5839_s1 + $0x2] ss:$0 sm:$0xff] }
 0x7c2   : > { %4820 = vmatpush3.bf16.msra.mxu0 %v5032_v26  ;;  %4821 = vmatprep.mubr.msk.bf16.mxu0 %vm5125_vm1, %v5124_v3 }
 0x7c3   : > { %4831 = vmatprep.subr.bf16.mxu0 %v5124_v3 }
 0x7c9   : > { %4822 = vmatmul.mubr.msk.bf16.vlgmr.msra.gmra.mxu0 %vm1541_vm3, %v5412_v25 }
 0x7ca   : > { %4835 = vmatprep.mubr.msk.bf16.mxu0 %vm5125_vm1, %v5124_v3  ;;  %4832 = vmatpush3.bf16.msra.mxu0 %v5034_v41 }
 0x7cb   : > { %4833 = vmatprep.subr.bf16.mxu0 %v5124_v3 }
 0x7ce   : > { %4834 = vmatpush3.bf16.msra.mxu0 %v5035_v42 }
 0x7cf   : > { %4845 = vmatprep.subr.bf16.mxu0 %v5124_v3 }
 0x7d1   : > { %4836 = vmatmul.mubr.msk.bf16.vlgmr.msra.gmra.mxu0 %vm1371_vm2, %v5385_v8 }
 0x7d2   : > { %4847 = vmatprep.mubr.msk.bf16.mxu0 %vm5125_vm1, %v5124_v3 }
 0x879   : > { %v2258_v28 = vpop.f32.mrf.mxu0 }
 0x87b   : > { %v4799_v4 = vpop.f32.mrf.mxu0 }
 0x87d   : > { %v2261_v5 = vpop.f32.mrf.mxu0 }
 0x87f   : > { %v4800_v6 = vpop.f32.mrf.mxu0 }
 0x881   : > { %v2365_v7 = vpop.f32.mrf.mxu0 }
 0x882   : > { %v2371_v10 = vpack.c.bf16 %v2365_v7, %v2258_v28 }
 0x883   : > { %v4811_v11 = vpop.f32.mrf.mxu0 }
 0x884   : > { %4816 = vmatmul.mubr.msk.bf16.vlgmr.msra.gmra.mxu1 %vm1709_vm4, %v2371_v10 }
 0x885   : > { %v2368_v12 = vpop.f32.mrf.mxu0  ;;  %4826 = vmatpush3.bf16.msra.mxu1 %v5033_v9  ;;  %4827 = vmatprep.mubr.msk.bf16.mxu1 %vm5125_vm1, %v5124_v3 }
 0x886   : > { %4839 = vmatprep.subr.bf16.mxu1 %v5124_v3 }
 0x887   : > { %v4812_v13 = vpop.f32.mrf.mxu0 }
 0x889   : > { %v2474_v14 = vpop.f32.mrf.mxu0 }
 0x88b   : > { %v4823_v15 = vpop.f32.mrf.mxu0 }
 0x88c   : > { %4828 = vmatmul.mubr.msk.bf16.vlgmr.msra.gmra.mxu1 %vm1541_vm3, %v5412_v25 }
 0x88d   : > { %v2477_v16 = vpop.f32.mrf.mxu0  ;;  %4841 = vmatprep.mubr.msk.bf16.mxu1 %vm5125_vm1, %v5124_v3 }
 0x88e   : > { %v2478_v39 = vadd.f32 %v4472_v32, %v2477_v16 }
 0x88f   : > { %v4824_v17 = vpop.f32.mrf.mxu0 }
 0x890   : > { %v2712_v40 = vpack.c.bf16 %v2478_v39, %v2478_v39 }
 0x891   : > { %v2598_v1 = vpop.f32.mrf.mxu0 }
 0x892   : > { %v2599_v2 = vadd.f32 %v4486_v63, %v2598_v1 }
 0x893   : > { %v4837_v28 = vpop.f32.mrf.mxu0 }
 0x894   : > { %v2607_v4 = vpack.c.bf16 %v2599_v2, %v2599_v2 }
 0x895   : > { %v2601_v5 = vpop.f32.mrf.mxu0 }
 0x896   : > { %v2670_v6 = vsel %vm1772_vm6, %v2607_v4, 0  ;;  %v2602_v7 = vadd.f32 %v4486_v63, %v2601_v5 }
 0x897   : > { %v4838_v9 = vpop.f32.mrf.mxu0  ;;  %4846 = vmatpush3.bf16.msra.mxu0 %v2670_v6 }
 0x898   : > { %4857 = vmatprep.subr.bf16.mxu0 %v5124_v3  ;;  %v2714_v13 = vpack.c.bf16 %v2602_v7, %v2602_v7 }
 0x89a   : > { %v2777_v16 = vsel %vm1772_vm6, %v2714_v13, 0 }
 0x944   : > { %v2414_v18 = vpop.f32.mrf.mxu1 }
 0x945   : > { %v5551_v19 = vadd.f32 %v2414_v18, %v5493_v61  ;;  %v2475_v61 = vadd.f32 %v4472_v32, %v2474_v14 }
 0x946   : > { %v4817_v20 = vpop.f32.mrf.mxu1 }
 0x947   : > { %v2605_v37 = vpack.c.bf16 %v2475_v61, %v2475_v61  ;;  %v5036_v20 = vld [vmem:[%s5829_s29 + $0x18] sm:$0xff]  }
 0x948   : > { %v2417_v21 = vpop.f32.mrf.mxu1 }
 0x949   : > { %v5554_v22 = vadd.f32 %v2417_v21, %v5495_v0 }
 0x94a   : > { %v4818_v23 = vpop.f32.mrf.mxu1 }
 0x94b   : > { %v4494_v23 = vld [vmem:[%s5339_s23 + $0x4] sm:$0x3] }
 0x94c   : > { %v2532_v27 = vpop.f32.mrf.mxu1 }
 0x94d   : > { %v2533_v29 = vadd.f32 %v4478_v24, %v2532_v27 }
 0x94e   : > { %v4829_v30 = vpop.f32.mrf.mxu1 }
 0x94f   : > { %v2606_v31 = vpack.c.bf16 %v2533_v29, %v2533_v29 }
 0x950   : > { %v2535_v33 = vpop.f32.mrf.mxu1 }
 0x951   : > { %v2612_v34 = vsel %vm1709_vm4, %v2606_v31, 0  ;;  %v2536_v35 = vadd.f32 %v4478_v24, %v2535_v33  ;;  %v2826_v24 = vsel %vm1928_vm7, %v4494_v23, 0  ;;  %v5037_v33 = vld [vmem:[%s5828_s21 + $0x18] sm:$0xff]  }
 0x952   : > { %v4830_v36 = vpop.f32.mrf.mxu1  ;;  %4840 = vmatpush3.bf16.xpose.msra.mxu1 %v2612_v34 }
 0x953   : > { %4851 = vmatprep.subr.bf16.mxu1 %v5124_v3  ;;  %v2713_v0 = vpack.c.bf16 %v2536_v35, %v2536_v35 }
 0x955   : > { %v2719_v38 = vsel %vm1709_vm4, %v2713_v0, 0 }
 0x959   : > { %4842 = vmatmul.mubr.msk.bf16.vlgmr.msra.gmra.mxu1 %vm1709_vm4, %v2605_v37 }
 0x95a   : > { %4852 = vmatpush3.bf16.xpose.msra.mxu1 %v2719_v38  ;;  %4853 = vmatprep.mubr.msk.bf16.mxu1 %vm5125_vm1, %v5124_v3 }
 0x95b   : > { %4863 = vmatprep.subr.bf16.mxu1 %v5124_v3 }
 0x961   : > { %4854 = vmatmul.mubr.msk.bf16.vlgmr.msra.gmra.mxu1 %vm1709_vm4, %v2712_v40 }
 0x962   : > { %4865 = vmatprep.mubr.msk.bf16.mxu1 %vm5125_vm1, %v5124_v3  ;;  %4864 = vmatpush3.bf16.msra.mxu1 %v2826_v24 }
 0x963   : > { %4875 = vmatprep.subr.bf16.mxu1 %v5124_v3 }
 0xa19   : > { %v2648_v43 = vpop.f32.mrf.mxu1 }
 0xa1a   : > { %v2654_v44 = vsel %vm1756_vm5, %v2648_v43, -inf }
 0xa1b   : > { %2655 = vmax.xlane.f32.xlu0 %v2654_v44  ;;  %v4843_v45 = vpop.f32.mrf.mxu1 }
 0xa1d   : > { %v2651_v46 = vpop.f32.mrf.mxu1 }
 0xa1e   : > { %v4505_v46 = vld [vmem:[%s5836_s10 + $0x3] ss:$0 sm:$0xff] }
 0xa1f   : > { %v4844_v47 = vpop.f32.mrf.mxu1 }
 0xa21   : > { %v2755_v48 = vpop.f32.mrf.mxu1 }
 0xa22   : > { %v2761_v49 = vsel %vm1756_vm5, %v2755_v48, -inf }
 0xa23   : > { %2762 = vmax.xlane.f32.xlu1 %v2761_v49  ;;  %v4855_v50 = vpop.f32.mrf.mxu1 }
 0xa24   : > { %v4499_v50 = vld [vmem:[%s5837_s15 + $0x3] ss:$0 sm:$0xff] }
 0xa25   : > { %v2758_v51 = vpop.f32.mrf.mxu1 }
 0xa27   : > { %v4856_v52 = vpop.f32.mrf.mxu1 }
 0xaa4   : > { %v2656_v53 = vpop.xlane.xlu0 %2655 }
 0xaa5   : > { %v2657_v54 = vsub.f32 %v2648_v43, %v2656_v53 }
 0xaa7   : > { %v2658_v55 = vmul.f32 1.442695, %v2657_v54 }
 0xaa9   : > { %5069 = vpow2.f32 %v2658_v55 }
 0xaac   : > { %v2763_v56 = vpop.xlane.xlu1 %2762 }
 0xaad   : > { %v2764_v57 = vsub.f32 %v2755_v48, %v2763_v56 }
 0xaaf   : > { %v2765_v58 = vmul.f32 1.442695, %v2764_v57 }
 0xab1   : > { %5071 = vpow2.f32 %v2765_v58 }
 0xab6   : > { %v5070_v59 = vpop.eup %5069 }
 0xab7   : > { %v2660_v60 = vsel %vm1756_vm5, %v5070_v59, 0.0 }
 0xab8   : > { %2661 = vadd.xlane.f32.xlu0 %v2660_v60  ;;  %v5039_v60 = vld [vmem:[%s5838_s18 + $0x30] sm:$0xff]  }
 0xabe   : > { %v5072_v62 = vpop.eup %5071 }
 0xabf   : > { %v2767_v26 = vsel %vm1756_vm5, %v5072_v62, 0.0 }
 0xac0   : > { %2768 = vadd.xlane.f32.xlu1 %v2767_v26 }
 0xb41   : > { %v2662_v10 = vpop.xlane.xlu0 %2661 }
 0xb42   : > { %5073 = vrcp.f32 %v2662_v10 }
 0xb49   : > { %v2769_v11 = vpop.xlane.xlu1 %2768 }
 0xb4a   : > { %5075 = vrcp.f32 %v2769_v11 }
 0xb4f   : > { %v5074_v12 = vpop.eup %5073 }
 0xb50   : > { %v2664_v14 = vmul.f32 %v5074_v12, %v5070_v59  ;;  %v5038_v59 = vld [vmem:[%s5838_s18 + $0x38] sm:$0xff]  }
 0xb52   : > { %v2665_v15 = vpack.c.bf16 %v2664_v14, %v2664_v14 }
 0xb54   : > { %4848 = vmatmul.mubr.msk.bf16.vlgmr.msra.gmra.mxu0 %vm1756_vm5, %v2665_v15 }
 0xb55   : > { %4858 = vmatpush3.bf16.msra.mxu0 %v2777_v16  ;;  %4859 = vmatprep.mubr.msk.bf16.mxu0 %vm5125_vm1, %v5124_v3 }
 0xb56   : > { %4869 = vmatprep.subr.bf16.mxu0 %v5124_v3 }
 0xb57   : > { %v5076_v17 = vpop.eup %5075 }
 0xb58   : > { %v2771_v18 = vmul.f32 %v5076_v17, %v5072_v62 }
 0xb5a   : > { %v2772_v21 = vpack.c.bf16 %v2771_v18, %v2771_v18  ;;  %v4513_v18 = vld [vmem:[%s5839_s1 + $0x3] ss:$0 sm:$0xff] }
 0xb5c   : > { %4860 = vmatmul.mubr.msk.bf16.vlgmr.msra.gmra.mxu0 %vm1756_vm5, %v2772_v21 }
 0xb5d   : > { %4870 = vmatpush3.bf16.msra.mxu0 %v5036_v20  ;;  %4871 = vmatprep.mubr.msk.bf16.mxu0 %vm5125_vm1, %v5124_v3 }
 0xb5e   : > { %4881 = vmatprep.subr.bf16.mxu0 %v5124_v3 }
 0xb64   : > { %4872 = vmatmul.mubr.msk.bf16.vlgmr.msra.gmra.mxu0 %vm1541_vm3, %v5412_v25 }
 0xb65   : > { %4885 = vmatprep.mubr.msk.bf16.mxu0 %vm5125_vm1, %v5124_v3  ;;  %4882 = vmatpush3.bf16.msra.mxu0 %v5038_v59 }
 0xb66   : > { %4883 = vmatprep.subr.bf16.mxu0 %v5124_v3 }
 0xb69   : > { %4884 = vmatpush3.bf16.msra.mxu0 %v5039_v60 }
 0xb6a   : > { %4895 = vmatprep.subr.bf16.mxu0 %v5124_v3 }
 0xb6c   : > { %4886 = vmatmul.mubr.msk.bf16.vlgmr.msra.gmra.mxu0 %vm1371_vm2, %v5385_v8 }
 0xb6d   : > { %4897 = vmatprep.mubr.msk.bf16.mxu0 %vm5125_vm1, %v5124_v3 }
 0xc14   : > { %v2706_v27 = vpop.f32.mrf.mxu0 }
 0xc16   : > { %v4849_v29 = vpop.f32.mrf.mxu0 }
 0xc18   : > { %v2709_v30 = vpop.f32.mrf.mxu0 }
 0xc1a   : > { %v4850_v31 = vpop.f32.mrf.mxu0 }
 0xc1c   : > { %v2813_v32 = vpop.f32.mrf.mxu0 }
 0xc1d   : > { %v2819_v34 = vpack.c.bf16 %v2813_v32, %v2706_v27 }
 0xc1e   : > { %v4861_v35 = vpop.f32.mrf.mxu0 }
 0xc1f   : > { %4866 = vmatmul.mubr.msk.bf16.vlgmr.msra.gmra.mxu1 %vm1709_vm4, %v2819_v34 }
 0xc20   : > { %v2816_v36 = vpop.f32.mrf.mxu0  ;;  %4876 = vmatpush3.bf16.msra.mxu1 %v5037_v33  ;;  %4877 = vmatprep.mubr.msk.bf16.mxu1 %vm5125_vm1, %v5124_v3 }
 0xc21   : > { %4889 = vmatprep.subr.bf16.mxu1 %v5124_v3 }
 0xc22   : > { %v4862_v61 = vpop.f32.mrf.mxu0 }
 0xc24   : > { %v2922_v0 = vpop.f32.mrf.mxu0 }
 0xc26   : > { %v4873_v37 = vpop.f32.mrf.mxu0 }
 0xc27   : > { %4878 = vmatmul.mubr.msk.bf16.vlgmr.msra.gmra.mxu1 %vm1541_vm3, %v5412_v25 }
 0xc28   : > { %v2925_v38 = vpop.f32.mrf.mxu0  ;;  %4891 = vmatprep.mubr.msk.bf16.mxu1 %vm5125_vm1, %v5124_v3 }
 0xc29   : > { %v2926_v57 = vadd.f32 %v4499_v50, %v2925_v38 }
 0xc2a   : > { %v4874_v39 = vpop.f32.mrf.mxu0 }
 0xc2b   : > { %v3160_v58 = vpack.c.bf16 %v2926_v57, %v2926_v57 }
 0xc2c   : > { %v3046_v20 = vpop.f32.mrf.mxu0 }
 0xc2d   : > { %v3047_v21 = vadd.f32 %v4513_v18, %v3046_v20 }
 0xc2e   : > { %v4887_v23 = vpop.f32.mrf.mxu0 }
 0xc2f   : > { %v3055_v24 = vpack.c.bf16 %v3047_v21, %v3047_v21 }
 0xc30   : > { %v3049_v27 = vpop.f32.mrf.mxu0 }
 0xc31   : > { %v3118_v29 = vsel %vm1772_vm6, %v3055_v24, 0  ;;  %v3050_v30 = vadd.f32 %v4513_v18, %v3049_v27  ;;  %v4533_v27 = vld [vmem:[%s5361_s8] ss:$0 sm:$0xff] }
 0xc32   : > { %v4888_v31 = vpop.f32.mrf.mxu0  ;;  %4896 = vmatpush3.bf16.msra.mxu0 %v3118_v29 }
 0xc33   : > { %4907 = vmatprep.subr.bf16.mxu0 %v5124_v3  ;;  %v3162_v35 = vpack.c.bf16 %v3050_v30, %v3050_v30 }
 0xcdf   : > { %v2862_v40 = vpop.f32.mrf.mxu1 }
 0xce0   : > { %v5610_v41 = vadd.f32 %v2862_v40, %v5551_v19  ;;  %v2923_v19 = vadd.f32 %v4499_v50, %v2922_v0  ;;  %v3225_v0 = vsel %vm1772_vm6, %v3162_v35, 0  ;;  %v4521_v40 = vld [vmem:[%s5339_s23 + $0x6] sm:$0x3]  ;;  %v4537_v35 = vld [vmem:[%s5349_s30 + $0x1] ss:$0 sm:$0xff] }
 0xce1   : > { %v4867_v42 = vpop.f32.mrf.mxu1 }
 0xce2   : > { %v3053_v55 = vpack.c.bf16 %v2923_v19, %v2923_v19  ;;  %v3274_v42 = vsel %vm1928_vm7, %v4521_v40, 0  ;;  %v4523_v19 = vld [vmem:[%s1291_s24] ss:$0 sm:$0xff] }
 0xce3   : > { %v2865_v43 = vpop.f32.mrf.mxu1 }
 0xce4   : > { %v5613_v44 = vadd.f32 %v2865_v43, %v5554_v22 }
 0xce5   : > { %v4868_v45 = vpop.f32.mrf.mxu1 }
 0xce7   : > { %v2980_v47 = vpop.f32.mrf.mxu1 }
 0xce8   : > { %v2981_v48 = vadd.f32 %v4505_v46, %v2980_v47 }
 0xce9   : > { %v4879_v49 = vpop.f32.mrf.mxu1 }
 0xcea   : > { %v3054_v25 = vpack.c.bf16 %v2981_v48, %v2981_v48 }
 0xceb   : > { %v2983_v51 = vpop.f32.mrf.mxu1 }
 0xcec   : > { %v3060_v52 = vsel %vm1709_vm4, %v3054_v25, 0  ;;  %v2984_v53 = vadd.f32 %v4505_v46, %v2983_v51 }
 0xced   : > { %v4880_v54 = vpop.f32.mrf.mxu1  ;;  %4890 = vmatpush3.bf16.xpose.msra.mxu1 %v3060_v52  ;;  %v5040_v52 = vld [vmem:[%s5346_s25] sm:$0xff]  }
 0xcee   : > { %4901 = vmatprep.subr.bf16.mxu1 %v5124_v3  ;;  %v3161_v22 = vpack.c.bf16 %v2984_v53, %v2984_v53 }
 0xcf0   : > { %v3167_v56 = vsel %vm1709_vm4, %v3161_v22, 0 }
 0xcf4   : > { %4892 = vmatmul.mubr.msk.bf16.vlgmr.msra.gmra.mxu1 %vm1709_vm4, %v3053_v55 }
 0xcf5   : > { %4902 = vmatpush3.bf16.xpose.msra.mxu1 %v3167_v56  ;;  %4903 = vmatprep.mubr.msk.bf16.mxu1 %vm5125_vm1, %v5124_v3 }
 0xcf6   : > { %4913 = vmatprep.subr.bf16.mxu1 %v5124_v3 }
 0xcfc   : > { %4904 = vmatmul.mubr.msk.bf16.vlgmr.msra.gmra.mxu1 %vm1709_vm4, %v3160_v58  ;;  %v4524_v58 = vld [vmem:[%s1294_s16] ss:$0 sm:$0xff] }
 0xcfd   : > { %4915 = vmatprep.mubr.msk.bf16.mxu1 %vm5125_vm1, %v5124_v3  ;;  %4914 = vmatpush3.bf16.msra.mxu1 %v3274_v42 }
 0xcfe   : > { %4925 = vmatprep.subr.bf16.mxu1 %v5124_v3 }
 0xdb4   : > { %v3096_v62 = vpop.f32.mrf.mxu1 }
 0xdb5   : > { %v3102_v26 = vsel %vm1756_vm5, %v3096_v62, -inf }
 0xdb6   : > { %3103 = vmax.xlane.f32.xlu0 %v3102_v26  ;;  %v4893_v63 = vpop.f32.mrf.mxu1 }
 0xdb8   : > { %v3099_v1 = vpop.f32.mrf.mxu1 }
 0xdb9   : > { %v5042_v1 = vld [vmem:[%s5352_s2] sm:$0xff]  }
 0xdba   : > { %v4894_v2 = vpop.f32.mrf.mxu1 }
 0xdbc   : > { %v3203_v28 = vpop.f32.mrf.mxu1 }
 0xdbd   : > { %v3209_v4 = vsel %vm1756_vm5, %v3203_v28, -inf }
 0xdbe   : > { %3210 = vmax.xlane.f32.xlu1 %v3209_v4  ;;  %v4905_v5 = vpop.f32.mrf.mxu1 }
 0xdc0   : > { %v3206_v6 = vpop.f32.mrf.mxu1 }
 0xdc2   : > { %v4906_v7 = vpop.f32.mrf.mxu1 }
 0xe3f   : > { %v3104_v9 = vpop.xlane.xlu0 %3103 }
 0xe40   : > { %v3105_v8 = vsub.f32 %v3096_v62, %v3104_v9 }
 0xe42   : > { %v3106_v10 = vmul.f32 1.442695, %v3105_v8 }
 0xe44   : > { %5077 = vpow2.f32 %v3106_v10 }
 0xe47   : > { %v3211_v11 = vpop.xlane.xlu1 %3210 }
 0xe48   : > { %v3212_v12 = vsub.f32 %v3203_v28, %v3211_v11  ;;  %v5043_v11 = vld [vmem:[%s5346_s25 + $0x8] sm:$0xff]  }
 0xe4a   : > { %v3213_v13 = vmul.f32 1.442695, %v3212_v12  ;;  %v4528_v12 = vld [vmem:[%s5355_s28] ss:$0 sm:$0xff] }
 0xe4c   : > { %5079 = vpow2.f32 %v3213_v13 }
 0xe51   : > { %v5078_v14 = vpop.eup %5077 }
 0xe52   : > { %v3108_v15 = vsel %vm1756_vm5, %v5078_v14, 0.0 }
 0xe53   : > { %3109 = vadd.xlane.f32.xlu0 %v3108_v15 }
 0xe59   : > { %v5080_v16 = vpop.eup %5079 }
 0xe5a   : > { %v3215_v17 = vsel %vm1756_vm5, %v5080_v16, 0.0 }
 0xe5b   : > { %3216 = vadd.xlane.f32.xlu1 %v3215_v17  ;;  %v4532_v17 = vld [vmem:[%s5358_s6] ss:$0 sm:$0xff] }
 0xedc   : > { %v3110_v32 = vpop.xlane.xlu0 %3109 }
 0xedd   : > { %5081 = vrcp.f32 %v3110_v32 }
 0xee4   : > { %v3217_v33 = vpop.xlane.xlu1 %3216 }
 0xee5   : > { %5083 = vrcp.f32 %v3217_v33  ;;  %v5044_v33 = vld [vmem:[%s5352_s2 + $0x18] sm:$0xff]  }
 0xeea   : > { %v5082_v34 = vpop.eup %5081 }
 0xeeb   : > { %v3112_v36 = vmul.f32 %v5082_v34, %v5078_v14  ;;  %v5045_v34 = vld [vmem:[%s5352_s2 + $0x10] sm:$0xff]  }
 0xeed   : > { %v3113_v61 = vpack.c.bf16 %v3112_v36, %v3112_v36 }
 0xeef   : > { %4898 = vmatmul.mubr.msk.bf16.vlgmr.msra.gmra.mxu0 %vm1756_vm5, %v3113_v61 }
 0xef0   : > { %4908 = vmatpush3.bf16.msra.mxu0 %v3225_v0  ;;  %4909 = vmatprep.mubr.msk.bf16.mxu0 %vm5125_vm1, %v5124_v3 }
 0xef1   : > { %4919 = vmatprep.subr.bf16.mxu0 %v5124_v3 }
 0xef2   : > { %v5084_v37 = vpop.eup %5083 }
 0xef3   : > { %v3219_v38 = vmul.f32 %v5084_v37, %v5080_v16 }
 0xef5   : > { %v3220_v39 = vpack.c.bf16 %v3219_v38, %v3219_v38 }
 0xef7   : > { %4910 = vmatmul.mubr.msk.bf16.vlgmr.msra.gmra.mxu0 %vm1756_vm5, %v3220_v39 }
 0xef8   : > { %4921 = vmatprep.mubr.msk.bf16.mxu0 %vm5125_vm1, %v5124_v3  ;;  %4920 = vmatpush3.bf16.msra.mxu0 %v5040_v52 }
 0xef9   : > { %4933 = vmatprep.subr.bf16.mxu0 %v5124_v3 }
 0xfaf   : > { %v3154_v43 = vpop.f32.mrf.mxu0 }
 0xfb1   : > { %v4899_v45 = vpop.f32.mrf.mxu0 }
 0xfb2   : > { %v5046_v45 = vld [vmem:[%s5346_s25 + $0x10] sm:$0xff]  }
 0xfb3   : > { %v3157_v46 = vpop.f32.mrf.mxu0 }
 0xfb4   : > { %v4545_v46 = vld [vmem:[%s5355_s28 + $0x1] ss:$0 sm:$0xff] }
 0xfb5   : > { %v4900_v47 = vpop.f32.mrf.mxu0 }
 0xfb7   : > { %v3261_v48 = vpop.f32.mrf.mxu0 }
 0xfb8   : > { %v3267_v49 = vpack.c.bf16 %v3261_v48, %v3154_v43 }
 0xfb9   : > { %v4911_v25 = vpop.f32.mrf.mxu0 }
 0xfba   : > { %4916 = vmatmul.mubr.msk.bf16.vlgmr.msra.gmra.mxu1 %vm1709_vm4, %v3267_v49 }
 0xfbb   : > { %v3264_v50 = vpop.f32.mrf.mxu0  ;;  %4929 = vmatprep.mubr.msk.bf16.mxu1 %vm5125_vm1, %v5124_v3 }
 0xfbc   : > { %v4550_v50 = vld [vmem:[%s5358_s6 + $0x1] ss:$0 sm:$0xff] }
 0xfbd   : > { %v4912_v51 = vpop.f32.mrf.mxu0 }
0x107a   : > { %v3310_v53 = vpop.f32.mrf.mxu1 }
0x107b   : > { %v3317_v54 = vadd.f32 %v3310_v53, %v5610_v41  ;;  %v5041_v41 = vld [vmem:[%s5352_s2 + $0x8] sm:$0xff]  }
0x107c   : > { %v4917_v22 = vpop.f32.mrf.mxu1  ;;  %4926 = vmatpush3.bf16.msra.mxu1 %v5041_v41 }
0x107d   : > { %v3326_v56 = vmul.f32 %v4523_v19, %v3317_v54  ;;  %4927 = vmatprep.subr.bf16.mxu1 %v5124_v3  ;;  %v4552_v22 = vld [vmem:[%s5361_s8 + $0x1] ss:$0 sm:$0xff] }
0x107e   : > { %v3313_v55 = vpop.f32.mrf.mxu1 }
0x107f   : > { %v3318_v57 = vadd.f32 %v3313_v55, %v5613_v44  ;;  %v3335_v62 = vadd.f32 %v4524_v58, %v3326_v56  ;;  %v4525_v44 = vld [vmem:[%s5349_s30] ss:$0 sm:$0xff] }
0x1080   : > { %v4918_v59 = vpop.f32.mrf.mxu1  ;;  %4928 = vmatpush3.bf16.msra.mxu1 %v5042_v1 }
0x1081   : > { %v3327_v60 = vmul.f32 %v4523_v19, %v3318_v57  ;;  %4939 = vmatprep.subr.bf16.mxu1 %v5124_v3  ;;  %v5047_v59 = vld [vmem:[%s5352_s2 + $0x28] sm:$0xff]  }
0x1083   : > { %v3336_v26 = vadd.f32 %v4524_v58, %v3327_v60  ;;  %v5048_v60 = vld [vmem:[%s5352_s2 + $0x20] sm:$0xff]  }
0x1085   : > { %v3337_v63 = vpack.c.bf16 %v3336_v26, %v3335_v62 }
0x1087   : > { %4922 = vmatmul.mubr.msk.bf16.vlgmr.msra.gmra.mxu0 %vm1541_vm3, %v3337_v63 }
0x1088   : > { %4935 = vmatprep.mubr.msk.bf16.mxu0 %vm5125_vm1, %v5124_v3  ;;  %4934 = vmatpush3.bf16.msra.mxu0 %v5043_v11 }
0x1089   : > { %4947 = vmatprep.subr.bf16.mxu0 %v5124_v3 }
0x1147   : > { %v3390_v2 = vpop.f32.mrf.mxu0 }
0x1148   : > { %v3391_v4 = vadd.f32 %v4525_v44, %v3390_v2 }
0x1149   : > { %v4923_v28 = vpop.f32.mrf.mxu0 }
0x114a   : > { %v3397_v9 = vmax.f32 %v3391_v4, 0.0 }
0x114b   : > { %v3393_v5 = vpop.f32.mrf.mxu0 }
0x114c   : > { %v3394_v6 = vadd.f32 %v4525_v44, %v3393_v5 }
0x114d   : > { %v4924_v7 = vpop.f32.mrf.mxu0 }
0x114e   : > { %v3398_v8 = vmax.f32 %v3394_v6, 0.0  ;;  %v5049_v6 = vld [vmem:[%s5346_s25 + $0x18] sm:$0xff]   ;;  %v4564_v7 = vld [vmem:[%s5355_s28 + $0x2] ss:$0 sm:$0xff] }
0x1150   : > { %v3399_v10 = vpack.c.bf16 %v3398_v8, %v3397_v9 }
0x1152   : > { %4930 = vmatmul.mubr.msk.bf16.vlgmr.msra.gmra.mxu1 %vm1371_vm2, %v3399_v10 }
0x1153   : > { %4943 = vmatprep.mubr.msk.bf16.mxu1 %vm5125_vm1, %v5124_v3  ;;  %4940 = vmatpush3.bf16.msra.mxu1 %v5044_v33 }
0x1154   : > { %4941 = vmatprep.subr.bf16.mxu1 %v5124_v3 }
0x1157   : > { %4942 = vmatpush3.bf16.msra.mxu1 %v5045_v34 }
0x1158   : > { %4953 = vmatprep.subr.bf16.mxu1 %v5124_v3 }
0x1212   : > { %v3460_v13 = vpop.f32.mrf.mxu1 }
0x1213   : > { %v3461_v14 = vadd.f32 %v4528_v12, %v3460_v13 }
0x1214   : > { %v4931_v15 = vpop.f32.mrf.mxu1 }
0x1215   : > { %v3467_v16 = vadd.f32 %v3461_v14, %v3335_v62  ;;  %v4556_v62 = vld [vmem:[%s5349_s30 + $0x2] ss:$0 sm:$0xff] }
0x1216   : > { %v3463_v18 = vpop.f32.mrf.mxu1 }
0x1217   : > { %v3464_v20 = vadd.f32 %v4528_v12, %v3463_v18  ;;  %v3476_v23 = vmul.f32 %v4532_v17, %v3467_v16  ;;  %v4569_v12 = vld [vmem:[%s5358_s6 + $0x2] ss:$0 sm:$0xff] }
0x1218   : > { %v4932_v21 = vpop.f32.mrf.mxu1  ;;  %v4571_v18 = vld [vmem:[%s5361_s8 + $0x2] ss:$0 sm:$0xff] }
0x1219   : > { %v3468_v24 = vadd.f32 %v3464_v20, %v3336_v26  ;;  %v3485_v30 = vadd.f32 %v4533_v27, %v3476_v23 }
0x121b   : > { %v3477_v29 = vmul.f32 %v4532_v17, %v3468_v24 }
0x121d   : > { %v3486_v31 = vadd.f32 %v4533_v27, %v3477_v29  ;;  %v5050_v27 = vld [vmem:[%s5352_s2 + $0x38] sm:$0xff]   ;;  %v5051_v29 = vld [vmem:[%s5352_s2 + $0x30] sm:$0xff]  }
0x121f   : > { %v3487_v32 = vpack.c.bf16 %v3486_v31, %v3485_v30 }
0x1221   : > { %4936 = vmatmul.mubr.msk.bf16.vlgmr.msra.gmra.mxu0 %vm1541_vm3, %v3487_v32 }
0x1222   : > { %4949 = vmatprep.mubr.msk.bf16.mxu0 %vm5125_vm1, %v5124_v3  ;;  %4948 = vmatpush3.bf16.msra.mxu0 %v5046_v45  ;;  %v4588_v45 = vld [vmem:[%s5358_s6 + $0x3] ss:$0 sm:$0xff] }
0x1223   : > { %4961 = vmatprep.subr.bf16.mxu0 %v5124_v3 }
0x12e1   : > { %v3542_v36 = vpop.f32.mrf.mxu0 }
0x12e2   : > { %v3543_v0 = vadd.f32 %v4537_v35, %v3542_v36 }
0x12e3   : > { %v4937_v61 = vpop.f32.mrf.mxu0 }
0x12e4   : > { %v3549_v40 = vmax.f32 %v3543_v0, 0.0 }
0x12e5   : > { %v3545_v37 = vpop.f32.mrf.mxu0 }
0x12e6   : > { %v3546_v38 = vadd.f32 %v4537_v35, %v3545_v37 }
0x12e7   : > { %v4938_v39 = vpop.f32.mrf.mxu0 }
0x12e8   : > { %v3550_v42 = vmax.f32 %v3546_v38, 0.0  ;;  %v5052_v38 = vld [vmem:[%s5364_s12] sm:$0xff]  }
0x12ea   : > { %v3551_v43 = vpack.c.bf16 %v3550_v42, %v3549_v40 }
0x12ec   : > { %4944 = vmatmul.mubr.msk.bf16.vlgmr.msra.gmra.mxu1 %vm1371_vm2, %v3551_v43 }
0x12ed   : > { %4957 = vmatprep.mubr.msk.bf16.mxu1 %vm5125_vm1, %v5124_v3  ;;  %4954 = vmatpush3.bf16.msra.mxu1 %v5047_v59 }
0x12ee   : > { %4955 = vmatprep.subr.bf16.mxu1 %v5124_v3 }
0x12f1   : > { %4956 = vmatpush3.bf16.msra.mxu1 %v5048_v60  ;;  %v4595_v60 = vld [vmem:[%s1334_s26] ss:$0 sm:$0xff] }
0x12f2   : > { %4967 = vmatprep.subr.bf16.mxu1 %v5124_v3 }
0x13ac   : > { %v3614_v47 = vpop.f32.mrf.mxu1 }
0x13ad   : > { %v3615_v48 = vadd.f32 %v4545_v46, %v3614_v47 }
0x13ae   : > { %v4945_v49 = vpop.f32.mrf.mxu1 }
0x13af   : > { %v3621_v25 = vadd.f32 %v3615_v48, %v3485_v30  ;;  %v4575_v30 = vld [vmem:[%s5349_s30 + $0x3] ss:$0 sm:$0xff]  ;;  %s5852_s30 = sld [smem:[#allocation31_spill]] }
0x13b0   : > { %v3617_v51 = vpop.f32.mrf.mxu1 }
0x13b1   : > { %v3618_v52 = vadd.f32 %v4545_v46, %v3617_v51  ;;  %v3631_v54 = vmul.f32 %v4550_v50, %v3621_v25 }
0x13b2   : > { %v4946_v53 = vpop.f32.mrf.mxu1 }
0x13b3   : > { %v3622_v19 = vadd.f32 %v3618_v52, %v3486_v31  ;;  %v3641_v56 = vadd.f32 %v4552_v22, %v3631_v54 }
0x13b5   : > { %v3632_v55 = vmul.f32 %v4550_v50, %v3622_v19  ;;  %v4590_v50 = vld [vmem:[%s5361_s8 + $0x3] ss:$0 sm:$0xff]  ;;  %v4591_v19 = vld [vmem:[%s1328_s3] ss:$0 sm:$0xff] }
0x13b7   : > { %v3642_v57 = vadd.f32 %v4552_v22, %v3632_v55 }
0x13b9   : > { %v3643_v58 = vpack.c.bf16 %v3642_v57, %v3641_v56 }
0x13bb   : > { %4950 = vmatmul.mubr.msk.bf16.vlgmr.msra.gmra.mxu0 %vm1541_vm3, %v3643_v58  ;;  %v5085_v58 = vld [vmem:[#allocation2] sm:$0xff] }
0x13bc   : > { %4963 = vmatprep.mubr.msk.bf16.mxu0 %vm5125_vm1, %v5124_v3  ;;  %4962 = vmatpush3.bf16.msra.mxu0 %v5049_v6 }
0x13bd   : > { %4975 = vmatprep.subr.bf16.mxu0 %v5124_v3 }
0x147b   : > { %v3698_v26 = vpop.f32.mrf.mxu0 }
0x147c   : > { %v3699_v41 = vadd.f32 %v4556_v62, %v3698_v26 }
0x147d   : > { %v4951_v63 = vpop.f32.mrf.mxu0 }
0x147e   : > { %v3705_v28 = vmax.f32 %v3699_v41, 0.0 }
0x147f   : > { %v3701_v1 = vpop.f32.mrf.mxu0 }
0x1480   : > { %v3702_v44 = vadd.f32 %v4556_v62, %v3701_v1 }
0x1481   : > { %v4952_v2 = vpop.f32.mrf.mxu0 }
0x1482   : > { %v3706_v4 = vmax.f32 %v3702_v44, 0.0  ;;  %v5086_v44 = vld [vmem:[#allocation2 + $0x8] sm:$0xff] }
0x1484   : > { %v3707_v5 = vpack.c.bf16 %v3706_v4, %v3705_v28 }
0x1486   : > { %4958 = vmatmul.mubr.msk.bf16.vlgmr.msra.gmra.mxu1 %vm1371_vm2, %v3707_v5 }
0x1487   : > { %4971 = vmatprep.mubr.msk.bf16.mxu1 %vm5125_vm1, %v5124_v3  ;;  %4968 = vmatpush3.bf16.msra.mxu1 %v5050_v27 }
0x1488   : > { %4969 = vmatprep.subr.bf16.mxu1 %v5124_v3 }
0x148b   : > { %4970 = vmatpush3.bf16.msra.mxu1 %v5051_v29 }
0x1546   : > { %v3770_v9 = vpop.f32.mrf.mxu1 }
0x1547   : > { %v3771_v8 = vadd.f32 %v4564_v7, %v3770_v9 }
0x1548   : > { %v4959_v10 = vpop.f32.mrf.mxu1 }
0x1549   : > { %v3777_v11 = vadd.f32 %v3771_v8, %v3641_v56  ;;  %v4594_v56 = vld [vmem:[%s1331_s22] ss:$0 sm:$0xff] }
0x154a   : > { %v3773_v13 = vpop.f32.mrf.mxu1 }
0x154b   : > { %v3774_v14 = vadd.f32 %v4564_v7, %v3773_v13  ;;  %v3787_v16 = vmul.f32 %v4569_v12, %v3777_v11 }
0x154c   : > { %v4960_v15 = vpop.f32.mrf.mxu1 }
0x154d   : > { %v3778_v17 = vadd.f32 %v3774_v14, %v3642_v57  ;;  %v3797_v21 = vadd.f32 %v4571_v18, %v3787_v16 }
0x154f   : > { %v3788_v20 = vmul.f32 %v4569_v12, %v3778_v17 }
0x1551   : > { %v3798_v23 = vadd.f32 %v4571_v18, %v3788_v20 }
0x1553   : > { %v3799_v24 = vpack.c.bf16 %v3798_v23, %v3797_v21 }
0x1555   : > { %4964 = vmatmul.mubr.msk.bf16.vlgmr.msra.gmra.mxu0 %vm1541_vm3, %v3799_v24 }
0x1556   : > { %4977 = vmatprep.mubr.msk.bf16.mxu0 %vm5125_vm1, %v5124_v3  ;;  %4976 = vmatpush3.bf16.msra.mxu0 %v5052_v38  ;;  %v4583_v3 = vld [vmem:[%s5355_s28 + $0x3] ss:$0 sm:$0xff] }
0x1615   : > { %v3854_v31 = vpop.f32.mrf.mxu0 }
0x1616   : > { %v3855_v33 = vadd.f32 %v4575_v30, %v3854_v31 }
0x1617   : > { %v4965_v32 = vpop.f32.mrf.mxu0 }
0x1618   : > { %v3861_v61 = vmax.f32 %v3855_v33, 0.0 }
0x1619   : > { %v3857_v34 = vpop.f32.mrf.mxu0 }
0x161a   : > { %v3858_v35 = vadd.f32 %v4575_v30, %v3857_v34 }
0x161b   : > { %v4966_v36 = vpop.f32.mrf.mxu0 }
0x161c   : > { %v3862_v0 = vmax.f32 %v3858_v35, 0.0 }
0x161e   : > { %v3863_v37 = vpack.c.bf16 %v3862_v0, %v3861_v61 }
0x1620   : > { %4972 = vmatmul.mubr.msk.bf16.vlgmr.msra.gmra.mxu1 %vm1371_vm2, %v3863_v37 }
0x16e0   : > { %v3926_v39 = vpop.f32.mrf.mxu1 }
0x16e1   : > { %v3927_v40 = vadd.f32 %v4583_v3, %v3926_v39 }
0x16e2   : > { %v4973_v42 = vpop.f32.mrf.mxu1 }
0x16e3   : > { %v3933_v43 = vadd.f32 %v3927_v40, %v3797_v21 }
0x16e4   : > { %v3929_v46 = vpop.f32.mrf.mxu1 }
0x16e5   : > { %v3930_v47 = vadd.f32 %v4583_v3, %v3929_v46  ;;  %v3943_v49 = vmul.f32 %v4588_v45, %v3933_v43 }
0x16e6   : > { %v4974_v48 = vpop.f32.mrf.mxu1 }
0x16e7   : > { %v3934_v25 = vadd.f32 %v3930_v47, %v3798_v23  ;;  %v3953_v52 = vadd.f32 %v4590_v50, %v3943_v49 }
0x16e9   : > { %v3944_v51 = vmul.f32 %v4588_v45, %v3934_v25 }
0x16eb   : > { %v3954_v53 = vadd.f32 %v4590_v50, %v3944_v51 }
0x16ed   : > { %v3955_v54 = vpack.c.bf16 %v3954_v53, %v3953_v52 }
0x16ef   : > { %4978 = vmatmul.mubr.msk.bf16.vlgmr.msra.gmra.mxu0 %vm1541_vm3, %v3955_v54 }
0x17af   : > { %v4008_v22 = vpop.f32.mrf.mxu0 }
0x17b0   : > { %v4009_v55 = vadd.f32 %v4591_v19, %v4008_v22 }
0x17b1   : > { %v4979_v57 = vpop.f32.mrf.mxu0 }
0x17b2   : > { %v4015_v59 = vadd.f32 %v5085_v58, %v4009_v55 }
0x17b3   : > { %v4011_v62 = vpop.f32.mrf.mxu0 }
0x17b4   : > { %v4024_v26 = vmul.f32 %v4594_v56, %v4015_v59  ;;  %v4012_v63 = vadd.f32 %v4591_v19, %v4011_v62 }
0x17b5   : > { %v4980_v41 = vpop.f32.mrf.mxu0 }
0x17b6   : > { %v4033_v1 = vadd.f32 %v4595_v60, %v4024_v26  ;;  %v4016_v2 = vadd.f32 %v5086_v44, %v4012_v63 }
0x17b8   : > { %4035 = vst.msk [vmem:[#allocation2] sm:$0xff] %vm1371_vm2, %v4033_v1  ;;  %4037 = vst.msk [vmem:[%s5852_s30] sm:$0xff] %vm1371_vm2, %v4033_v1  ;;  %v4025_v28 = vmul.f32 %v4594_v56, %v4016_v2 }
0x17ba   : > { %v4034_v4 = vadd.f32 %v4595_v60, %v4025_v28 }
0x17bc   : > { %4036 = vst.msk [vmem:[#allocation2 + $0x8] sm:$0xff] %vm1371_vm2, %v4034_v4  ;;  %4038 = vst.msk [vmem:[%s5852_s30 + $0x8] sm:$0xff] %vm1371_vm2, %v4034_v4 }
0x17bd PF: > { %s5853_s3 = sld [smem:[#allocation32_spill]] }
0x17c3   : > { %s69_s7 = sadd.s32 1, %s5853_s3  }
0x17c4   : > { %p66_p5 = scmp.ge.s32.totalorder %s69_s7, 4  }
0x17c6   :  { %68 = sbr.rel (!%p66_p5) target bundleno = 67 (0x43), region = 315 }

</bundles_post_ra>
